<compile_context>
chip_gen: v5e
topology: v5e:2x2
jax: 0.10.0
libtpu: 0.0.40
codegen_flags: <defaults>
</compile_context>

<pallas_src>
import jax
import jax.numpy as jnp
import numpy as np
from jax import lax
from jax.experimental import pallas as pl
from jax.experimental.pallas import tpu as pltpu


F = 104  # per-image frame pitch (rows) shared by the conv1-pool frame and conv2 frames


# ----------------------------- fused Pallas kernel -----------------------------

def fused_dqn_kernel(p1_ref, w1_ref, b1_ref, m1_ref, w2_ref, b2_ref, m2_ref,
                     fw1_ref, fb1_ref, fw2_ref, fb2_ref, o_ref,
                     rmax_sc, flat_sc):
    """Whole DQN forward for one batch block of B images.

    p1_ref  : (4*B*104, 9*Cin) bf16  conv1 im2col patches, rows (quadrant, image, frame row)
                                     frame row 20 + 9*i + j holds pool-cell (i, j); rest zero
    w1_ref  : (9*Cin, 64)  bf16      conv1 weight as matmul RHS (rows (dy, dx, c))
    b1_ref  : (1, 64)      f32
    m1_ref  : (B*104, 1)   f32       1.0 on interior frame rows (the real 7x7 map), else 0
    w2_ref  : (576, 64)    bf16      conv2 weight (rows (dy, dx, cin))
    b2_ref  : (1, 64)      f32
    m2_ref  : ((B-1)*104+81, 1) f32  1.0 on valid conv2 output rows, else 0
    fw1_ref : (1024, 256)  bf16      fc1 weight, input dim permuted to (pi, pj, c)
    fb1_ref : (1, 256)     f32
    fw2_ref : (256, A_pad) bf16      fc2 weight, action dim lane-padded to 128
    fb2_ref : (1, A_pad)   f32
    o_ref   : (1, B, A_pad) f32
    rmax_sc : ((B-1)*104+71, 64) f32 scratch: pooled (pad=1) maxima frame
    flat_sc : (B, 1024)    f32       scratch: lane-dense fc1 input (pi, pj, c)
    """
    f32 = jnp.float32
    bf16 = jnp.bfloat16
    B = o_ref.shape[1]
    Q = B * F                    # rows of one conv1 quadrant slab == conv2-input frame rows
    M2 = (B - 1) * F + 81        # batch-folded conv2 output rows
    MR = M2 - 10                 # pooled-max (rmax) rows

    # ---- conv1 (3x3 valid): ONE batch-folded im2col matmul over all 4 pool quadrants ----
    y1 = jnp.dot(p1_ref[...], w1_ref[...], preferred_element_type=f32)       # (4Q, 64)
    # ---- maxpool 2x2/2: max of the 4 quadrant slabs (bias/ReLU commute with max) ----
    pool = jnp.maximum(jnp.maximum(y1[0:Q], y1[Q:2 * Q]),
                       jnp.maximum(y1[2 * Q:3 * Q], y1[3 * Q:4 * Q]))         # (Q, 64)
    # ---- bias + ReLU + interior mask -> zero-padded 9x9 conv2 input frames ----
    pad = jnp.maximum(pool + b1_ref[...], 0.0) * m1_ref[...]                  # (Q, 64)

    # ---- conv2 (3x3, pad=1): 9 batch-folded row-shifted slab matmuls, K = 64 ----
    # TODO(synk): lane-concatenate the 9 slabs into one (M2, 576) operand for a single
    # K=576 MXU pass on v6e/v7x.
    parts = []
    for t in range(9):
        off = 9 * (t // 3) + (t % 3)                                          # 0 .. 20
        parts.append(jnp.dot(pad[off:off + M2].astype(bf16),
                             w2_ref[64 * t:64 * (t + 1), :],
                             preferred_element_type=f32))
    acc2 = (((parts[0] + parts[1]) + (parts[2] + parts[3]))
            + ((parts[4] + parts[5]) + (parts[6] + parts[7]))) + parts[8]
    y2 = jnp.maximum(acc2 + b2_ref[...], 0.0) * m2_ref[...]                   # (M2, 64)

    # ---- maxpool 2x2/2 pad=1 (values >= 0, so zero padding never wins) ----
    cmax = jnp.maximum(y2[0:M2 - 1], y2[1:M2])
    rmax_sc[...] = jnp.maximum(cmax[0:MR], cmax[9:M2 - 1])                    # (MR, 64)

    # ---- gather the 16 pooled positions of every image -> lane-dense (B, 1024) ----
    for p in range(16):
        off = 18 * (p // 4) + 2 * (p % 4)
        flat_sc[:, 64 * p:64 * (p + 1)] = rmax_sc[pl.ds(off, B, stride=F), :]

    # ---- fc1 (1024 -> 256) + ReLU: single batch-folded matmul ----
    h = jnp.dot(flat_sc[...].astype(bf16), fw1_ref[...],
                preferred_element_type=f32) + fb1_ref[...]
    h = jnp.maximum(h, 0.0)
    # ---- fc2 (256 -> n_actions, lane-padded to 128): unmasked lane-dense store ----
    o_ref[0] = jnp.dot(h.astype(bf16), fw2_ref[...],
                       preferred_element_type=f32) + fb2_ref[...]


# ------------------------------- wrapper & prep ---------------------------------

def prepare_params(params):
    """One-time weight preparation: transposes / permutations and bf16 casts."""
    cw1, cb1, cw2, cb2, fw1, fb1, fw2, fb2 = params
    cin = cw1.shape[1]
    n_actions = fw2.shape[0]
    a_pad = ((n_actions + 127) // 128) * 128

    w1m = jnp.transpose(cw1, (2, 3, 1, 0)).reshape(9 * cin, 64).astype(jnp.bfloat16)
    w2m = jnp.transpose(cw2, (2, 3, 1, 0)).reshape(9 * 64, 64).astype(jnp.bfloat16)
    b1 = cb1.reshape(1, 64).astype(jnp.float32)
    b2 = cb2.reshape(1, 64).astype(jnp.float32)

    # fc1: transpose and permute the input dim from NCHW flatten (c, pi, pj) to (pi, pj, c)
    fw1p = jnp.transpose(fw1.reshape(256, 64, 4, 4), (2, 3, 1, 0)).reshape(1024, 256)
    fw1p = fw1p.astype(jnp.bfloat16)
    fb1r = fb1.reshape(1, 256).astype(jnp.float32)
    # fc2: transpose and lane-pad the action dim (unmasked, lane-dense output store)
    fw2p = jnp.zeros((256, a_pad), jnp.float32).at[:, :n_actions].set(fw2.T)
    fw2p = fw2p.astype(jnp.bfloat16)
    fb2p = jnp.zeros((1, a_pad), jnp.float32).at[:, :n_actions].set(fb2.reshape(1, -1))

    return (w1m, b1, w2m, b2, fw1p, fb1r, fw2p, fb2p), n_actions


def _has_megacore():
    """True on chips with 2 TensorCores per device (v4 / v5p / v7x)."""
    try:
        kind = jax.devices()[0].device_kind.lower()
    except Exception:
        return False
    return any(tag in kind for tag in ("v4", "v5p", "v7", "7x"))


def _pick_block_b(n, cap=16):
    """Largest batch block <= cap dividing N.  On single-TensorCore chips (v5e/v6e) use one
    grid block; on dual-core chips keep >= 2 blocks (when possible) so both cores get work."""
    divisors = [d for d in range(1, min(n, cap) + 1) if n % d == 0]
    if _has_megacore():
        split = [d for d in divisors if n // d >= 2]
        if split:
            return max(split)
    return max(divisors)


def _build_patches(x_nchw):
    """(N, Cin, 16, 16) -> (4, N, 104, 9*Cin) conv1 im2col patches.
    Quadrant (di, dj); frame row 20 + 9*i + j holds the patch of conv1 output (2i+di, 2j+dj)
    (the pixel that pools into pool-cell (i, j)); all other frame rows are zero."""
    n, cin = x_nchw.shape[0], x_nchw.shape[1]
    xh = jnp.transpose(x_nchw, (0, 2, 3, 1))                            # NHWC
    quads = []
    for di in range(2):
        for dj in range(2):
            taps = []
            for dy in range(3):
                for dx in range(3):
                    sl = xh[:, di + dy:di + dy + 13:2, dj + dx:dj + dx + 13:2, :]  # (N,7,7,C)
                    taps.append(sl)
            quads.append(jnp.concatenate(taps, axis=-1))                # (N, 7, 7, 9*Cin)
    p = jnp.stack(quads, axis=0)                                        # (4, N, 7, 7, 9C)
    p = jnp.pad(p, ((0, 0), (0, 0), (0, 0), (0, 2), (0, 0)))            # j padded 7 -> 9
    p = p.reshape(4, n, 63, 9 * cin)
    p = jnp.pad(p, ((0, 0), (0, 0), (20, 21), (0, 0)))                  # (4, N, 104, 9C)
    return p


def _arrange_for_blocks(p, grid_n, block_b):
    """(4, N, 104, K) -> (N*416, K) with rows ordered (block, quadrant, image, frame)."""
    _, n, frame, k = p.shape
    p = p.reshape(4, grid_n, block_b, frame, k)
    p = jnp.transpose(p, (1, 0, 2, 3, 4))
    return p.reshape(grid_n * 4 * block_b * frame, k)


def _build_masks(block_b):
    """Interior masks (f32), tiled for one batch block."""
    l = np.arange(F)
    # conv2-input frame: real pool1 values at rows 20 + 9*i + j (i, j in [0, 7))
    m1 = ((l >= 20) & (l <= 82) & ((l - 20) % 9 < 7)).astype(np.float32)
    # conv2-output frame: valid outputs at rows 9*ii + jj with ii, jj in [1, 8)
    q = np.arange(F)
    m2 = ((q < 81) & ((q // 9) >= 1) & ((q // 9) <= 7) &
          ((q % 9) >= 1) & ((q % 9) <= 7)).astype(np.float32)
    m2rows = (block_b - 1) * F + 81
    mask1 = np.tile(m1, block_b).reshape(block_b * F, 1)
    mask2 = np.tile(m2, block_b)[:m2rows].reshape(m2rows, 1)
    return jnp.asarray(mask1), jnp.asarray(mask2)


def dqn_forward(x_nchw, prep, n_actions, block_b=None):
    (w1m, b1, w2m, b2, fw1p, fb1r, fw2p, fb2p) = prep
    n, cin, hh, ww = x_nchw.shape
    assert (hh, ww) == (16, 16), "kernel is specialized to 16x16 observations"
    if block_b is None:
        block_b = _pick_block_b(n)
    assert n % block_b == 0
    grid_n = n // block_b
    a_pad = fw2p.shape[1]
    m2rows = (block_b - 1) * F + 81

    p1 = _build_patches(x_nchw)                                         # (4, N, 104, 9*Cin)
    p1 = _arrange_for_blocks(p1, grid_n, block_b).astype(jnp.bfloat16)  # (N*416, 9*Cin)
    mask1, mask2 = _build_masks(block_b)

    def _const_spec(arr):
        nd = arr.ndim
        return pl.BlockSpec(arr.shape, lambda i, _nd=nd: (0,) * _nd)

    out = pl.pallas_call(
        fused_dqn_kernel,
        out_shape=jax.ShapeDtypeStruct((grid_n, block_b, a_pad), jnp.float32),
        grid=(grid_n,),
        in_specs=[pl.BlockSpec((block_b * 4 * F, 9 * cin), lambda i: (i, 0)),
                  _const_spec(w1m), _const_spec(b1), _const_spec(mask1),
                  _const_spec(w2m), _const_spec(b2), _const_spec(mask2),
                  _const_spec(fw1p), _const_spec(fb1r),
                  _const_spec(fw2p), _const_spec(fb2p)],
        out_specs=pl.BlockSpec((1, block_b, a_pad), lambda i: (i, 0, 0)),
        scratch_shapes=[pltpu.VMEM((m2rows - 10, 64), jnp.float32),
                        pltpu.VMEM((block_b, 1024), jnp.float32)],
        compiler_params=pltpu.CompilerParams(dimension_semantics=("parallel",)),
    )(p1, w1m, b1, mask1, w2m, b2, mask2, fw1p, fb1r, fw2p, fb2p)

    return out.reshape(n, a_pad)[:, :n_actions]


# --------------------------- params & pure-JAX reference ------------------------

def init_params(key, obs_shape=(4, 16, 16), n_actions=5):
    cin = obs_shape[0]
    ks = jax.random.split(key, 8)

    def w(k, shape, fan_in):
        return jax.random.normal(k, shape, jnp.float32) / np.float32(np.sqrt(fan_in))

    cw1 = w(ks[0], (64, cin, 3, 3), cin * 9)
    cb1 = 0.1 * jax.random.normal(ks[1], (64,), jnp.float32)
    cw2 = w(ks[2], (64, 64, 3, 3), 64 * 9)
    cb2 = 0.1 * jax.random.normal(ks[3], (64,), jnp.float32)
    conv_out = 64 * 4 * 4
    fw1 = w(ks[4], (256, conv_out), conv_out)
    fb1 = 0.1 * jax.random.normal(ks[5], (256,), jnp.float32)
    fw2 = w(ks[6], (n_actions, 256), 256)
    fb2 = 0.1 * jax.random.normal(ks[7], (n_actions,), jnp.float32)
    return (cw1, cb1, cw2, cb2, fw1, fb1, fw2, fb2)


def ref_forward(x, params):
    """Pure-JAX f32 reference matching the PyTorch module semantics (NCHW)."""
    (cw1, cb1, cw2, cb2, fw1, fb1, fw2, fb2) = params
    dn = ('NCHW', 'OIHW', 'NCHW')
    y = lax.conv_general_dilated(x, cw1, (1, 1), 'VALID', dimension_numbers=dn)
    y = jnp.maximum(y + cb1[None, :, None, None], 0.0)
    y = lax.reduce_window(y, -jnp.inf, lax.max, (1, 1, 2, 2), (1, 1, 2, 2), 'VALID')
    y = lax.conv_general_dilated(y, cw2, (1, 1), ((1, 1), (1, 1)), dimension_numbers=dn)
    y = jnp.maximum(y + cb2[None, :, None, None], 0.0)
    y = lax.reduce_window(y, -jnp.inf, lax.max, (1, 1, 2, 2), (1, 1, 2, 2),
                          ((0, 0), (0, 0), (1, 1), (1, 1)))
    flat = y.reshape(x.shape[0], -1)
    h = jnp.maximum(flat @ fw1.T + fb1, 0.0)
    return h @ fw2.T + fb2


if __name__ == "__main__":
    key = jax.random.PRNGKey(0)
    kx, kp = jax.random.split(key)
    obs_shape = (4, 16, 16)
    n_actions = 5

    params = init_params(kp, obs_shape, n_actions)
    x = jax.random.normal(kx, (2,) + obs_shape, jnp.float32)

    prep_arrays, n_act = prepare_params(params)
    fwd = jax.jit(lambda xx: dqn_forward(xx, prep_arrays, n_act))

    out = jax.block_until_ready(fwd(x))
    ref = jax.block_until_ready(ref_forward(x, params))
    # bf16 MXU operands with f32 accumulation -> looser tolerance than the f32 reference.
    np.testing.assert_allclose(np.asarray(out), np.asarray(ref), rtol=5e-2, atol=5e-2)
    print("KERNEL_OK")
</pallas_src>

<mosaic_0001>
module attributes {stable_mosaic.version = 11 : i64} {
  func.func @fused_dqn_kernel(%arg0: i32, %arg1: memref<832x36xbf16, #tpu.memory_space<vmem>>, %arg2: memref<36x64xbf16, #tpu.memory_space<vmem>>, %arg3: memref<1x64xf32, #tpu.memory_space<vmem>>, %arg4: memref<208x1xf32, #tpu.memory_space<vmem>>, %arg5: memref<576x64xbf16, #tpu.memory_space<vmem>>, %arg6: memref<1x64xf32, #tpu.memory_space<vmem>>, %arg7: memref<185x1xf32, #tpu.memory_space<vmem>>, %arg8: memref<1024x256xbf16, #tpu.memory_space<vmem>>, %arg9: memref<1x256xf32, #tpu.memory_space<vmem>>, %arg10: memref<256x128xbf16, #tpu.memory_space<vmem>>, %arg11: memref<1x128xf32, #tpu.memory_space<vmem>>, %arg12: memref<1x2x128xf32, #tpu.memory_space<vmem>>, %arg13: memref<175x64xf32, #tpu.memory_space<vmem>>, %arg14: memref<2x1024xf32, #tpu.memory_space<vmem>>) attributes {dimension_semantics = [#tpu.dimension_semantics<parallel>], iteration_bounds = array<i64: 1>, scalar_prefetch = 0 : i64, scratch_operands = 2 : i64, tpu.core_type = #tpu.core_type<tc>, window_params = [{transform_indices = @transform_0, window_bounds = array<i64: 832, 36>}, {pipeline_mode = #tpu.pipeline_mode<synchronous>, transform_indices = @transform_1, window_bounds = array<i64: 36, 64>}, {pipeline_mode = #tpu.pipeline_mode<synchronous>, transform_indices = @transform_2, window_bounds = array<i64: 1, 64>}, {pipeline_mode = #tpu.pipeline_mode<synchronous>, transform_indices = @transform_3, window_bounds = array<i64: 208, 1>}, {pipeline_mode = #tpu.pipeline_mode<synchronous>, transform_indices = @transform_4, window_bounds = array<i64: 576, 64>}, {pipeline_mode = #tpu.pipeline_mode<synchronous>, transform_indices = @transform_5, window_bounds = array<i64: 1, 64>}, {pipeline_mode = #tpu.pipeline_mode<synchronous>, transform_indices = @transform_6, window_bounds = array<i64: 185, 1>}, {pipeline_mode = #tpu.pipeline_mode<synchronous>, transform_indices = @transform_7, window_bounds = array<i64: 1024, 256>}, {pipeline_mode = #tpu.pipeline_mode<synchronous>, transform_indices = @transform_8, window_bounds = array<i64: 1, 256>}, {pipeline_mode = #tpu.pipeline_mode<synchronous>, transform_indices = @transform_9, window_bounds = array<i64: 256, 128>}, {pipeline_mode = #tpu.pipeline_mode<synchronous>, transform_indices = @transform_10, window_bounds = array<i64: 1, 128>}, {transform_indices = @transform_11, window_bounds = array<i64: 1, 2, 128>}]} {
    %c0 = arith.constant 0 : index
    %c0_0 = arith.constant 0 : index
    %0 = vector.load %arg1[%c0, %c0_0] : memref<832x36xbf16, #tpu.memory_space<vmem>>, vector<832x36xbf16>
    %c0_1 = arith.constant 0 : index
    %c0_2 = arith.constant 0 : index
    %1 = vector.load %arg2[%c0_1, %c0_2] : memref<36x64xbf16, #tpu.memory_space<vmem>>, vector<36x64xbf16>
    %cst = arith.constant dense<0.000000e+00> : vector<832x64xf32>
    %2 = tpu.matmul %0, %1, %cst {dimension_numbers = #tpu.dot_dimension_numbers<[1], [0], [0], [1], [0, 0, 1, 1], [], []>} : vector<832x36xbf16>, vector<36x64xbf16>, vector<832x64xf32> -> vector<832x64xf32>
    %3 = vector.extract_strided_slice %2 {offsets = [0, 0], sizes = [208, 64], strides = [1, 1]} : vector<832x64xf32> to vector<208x64xf32>
    %4 = vector.extract_strided_slice %2 {offsets = [208, 0], sizes = [208, 64], strides = [1, 1]} : vector<832x64xf32> to vector<208x64xf32>
    %5 = arith.maximumf %3, %4 : vector<208x64xf32>
    %6 = vector.extract_strided_slice %2 {offsets = [416, 0], sizes = [208, 64], strides = [1, 1]} : vector<832x64xf32> to vector<208x64xf32>
    %7 = vector.extract_strided_slice %2 {offsets = [624, 0], sizes = [208, 64], strides = [1, 1]} : vector<832x64xf32> to vector<208x64xf32>
    %8 = arith.maximumf %6, %7 : vector<208x64xf32>
    %9 = arith.maximumf %5, %8 : vector<208x64xf32>
    %c0_3 = arith.constant 0 : index
    %c0_4 = arith.constant 0 : index
    %10 = vector.load %arg3[%c0_3, %c0_4] : memref<1x64xf32, #tpu.memory_space<vmem>>, vector<1x64xf32>
    %11 = vector.broadcast %10 : vector<1x64xf32> to vector<208x64xf32>
    %12 = arith.addf %9, %11 : vector<208x64xf32>
    %cst_5 = arith.constant 0.000000e+00 : f32
    %13 = vector.broadcast %cst_5 : f32 to vector<208x64xf32>
    %14 = arith.maximumf %12, %13 : vector<208x64xf32>
    %c0_6 = arith.constant 0 : index
    %c0_7 = arith.constant 0 : index
    %15 = vector.load %arg4[%c0_6, %c0_7] : memref<208x1xf32, #tpu.memory_space<vmem>>, vector<208x1xf32>
    %16 = vector.broadcast %15 : vector<208x1xf32> to vector<208x64xf32>
    %17 = arith.mulf %14, %16 : vector<208x64xf32>
    %18 = vector.extract_strided_slice %17 {offsets = [0, 0], sizes = [185, 64], strides = [1, 1]} : vector<208x64xf32> to vector<185x64xf32>
    %19 = arith.truncf %18 : vector<185x64xf32> to vector<185x64xbf16>
    %c0_8 = arith.constant 0 : index
    %c0_9 = arith.constant 0 : index
    %20 = vector.load %arg5[%c0_8, %c0_9] : memref<576x64xbf16, #tpu.memory_space<vmem>>, vector<64x64xbf16>
    %cst_10 = arith.constant dense<0.000000e+00> : vector<185x64xf32>
    %21 = tpu.matmul %19, %20, %cst_10 {dimension_numbers = #tpu.dot_dimension_numbers<[1], [0], [0], [1], [0, 0, 1, 1], [], []>} : vector<185x64xbf16>, vector<64x64xbf16>, vector<185x64xf32> -> vector<185x64xf32>
    %22 = vector.extract_strided_slice %17 {offsets = [1, 0], sizes = [185, 64], strides = [1, 1]} : vector<208x64xf32> to vector<185x64xf32>
    %23 = arith.truncf %22 : vector<185x64xf32> to vector<185x64xbf16>
    %c64 = arith.constant 64 : index
    %c0_11 = arith.constant 0 : index
    %24 = vector.load %arg5[%c64, %c0_11] : memref<576x64xbf16, #tpu.memory_space<vmem>>, vector<64x64xbf16>
    %cst_12 = arith.constant dense<0.000000e+00> : vector<185x64xf32>
    %25 = tpu.matmul %23, %24, %cst_12 {dimension_numbers = #tpu.dot_dimension_numbers<[1], [0], [0], [1], [0, 0, 1, 1], [], []>} : vector<185x64xbf16>, vector<64x64xbf16>, vector<185x64xf32> -> vector<185x64xf32>
    %26 = vector.extract_strided_slice %17 {offsets = [2, 0], sizes = [185, 64], strides = [1, 1]} : vector<208x64xf32> to vector<185x64xf32>
    %27 = arith.truncf %26 : vector<185x64xf32> to vector<185x64xbf16>
    %c128 = arith.constant 128 : index
    %c0_13 = arith.constant 0 : index
    %28 = vector.load %arg5[%c128, %c0_13] : memref<576x64xbf16, #tpu.memory_space<vmem>>, vector<64x64xbf16>
    %cst_14 = arith.constant dense<0.000000e+00> : vector<185x64xf32>
    %29 = tpu.matmul %27, %28, %cst_14 {dimension_numbers = #tpu.dot_dimension_numbers<[1], [0], [0], [1], [0, 0, 1, 1], [], []>} : vector<185x64xbf16>, vector<64x64xbf16>, vector<185x64xf32> -> vector<185x64xf32>
    %30 = vector.extract_strided_slice %17 {offsets = [9, 0], sizes = [185, 64], strides = [1, 1]} : vector<208x64xf32> to vector<185x64xf32>
    %31 = arith.truncf %30 : vector<185x64xf32> to vector<185x64xbf16>
    %c192 = arith.constant 192 : index
    %c0_15 = arith.constant 0 : index
    %32 = vector.load %arg5[%c192, %c0_15] : memref<576x64xbf16, #tpu.memory_space<vmem>>, vector<64x64xbf16>
    %cst_16 = arith.constant dense<0.000000e+00> : vector<185x64xf32>
    %33 = tpu.matmul %31, %32, %cst_16 {dimension_numbers = #tpu.dot_dimension_numbers<[1], [0], [0], [1], [0, 0, 1, 1], [], []>} : vector<185x64xbf16>, vector<64x64xbf16>, vector<185x64xf32> -> vector<185x64xf32>
    %34 = vector.extract_strided_slice %17 {offsets = [10, 0], sizes = [185, 64], strides = [1, 1]} : vector<208x64xf32> to vector<185x64xf32>
    %35 = arith.truncf %34 : vector<185x64xf32> to vector<185x64xbf16>
    %c256 = arith.constant 256 : index
    %c0_17 = arith.constant 0 : index
    %36 = vector.load %arg5[%c256, %c0_17] : memref<576x64xbf16, #tpu.memory_space<vmem>>, vector<64x64xbf16>
    %cst_18 = arith.constant dense<0.000000e+00> : vector<185x64xf32>
    %37 = tpu.matmul %35, %36, %cst_18 {dimension_numbers = #tpu.dot_dimension_numbers<[1], [0], [0], [1], [0, 0, 1, 1], [], []>} : vector<185x64xbf16>, vector<64x64xbf16>, vector<185x64xf32> -> vector<185x64xf32>
    %38 = vector.extract_strided_slice %17 {offsets = [11, 0], sizes = [185, 64], strides = [1, 1]} : vector<208x64xf32> to vector<185x64xf32>
    %39 = arith.truncf %38 : vector<185x64xf32> to vector<185x64xbf16>
    %c320 = arith.constant 320 : index
    %c0_19 = arith.constant 0 : index
    %40 = vector.load %arg5[%c320, %c0_19] : memref<576x64xbf16, #tpu.memory_space<vmem>>, vector<64x64xbf16>
    %cst_20 = arith.constant dense<0.000000e+00> : vector<185x64xf32>
    %41 = tpu.matmul %39, %40, %cst_20 {dimension_numbers = #tpu.dot_dimension_numbers<[1], [0], [0], [1], [0, 0, 1, 1], [], []>} : vector<185x64xbf16>, vector<64x64xbf16>, vector<185x64xf32> -> vector<185x64xf32>
    %42 = vector.extract_strided_slice %17 {offsets = [18, 0], sizes = [185, 64], strides = [1, 1]} : vector<208x64xf32> to vector<185x64xf32>
    %43 = arith.truncf %42 : vector<185x64xf32> to vector<185x64xbf16>
    %c384 = arith.constant 384 : index
    %c0_21 = arith.constant 0 : index
    %44 = vector.load %arg5[%c384, %c0_21] : memref<576x64xbf16, #tpu.memory_space<vmem>>, vector<64x64xbf16>
    %cst_22 = arith.constant dense<0.000000e+00> : vector<185x64xf32>
    %45 = tpu.matmul %43, %44, %cst_22 {dimension_numbers = #tpu.dot_dimension_numbers<[1], [0], [0], [1], [0, 0, 1, 1], [], []>} : vector<185x64xbf16>, vector<64x64xbf16>, vector<185x64xf32> -> vector<185x64xf32>
    %46 = vector.extract_strided_slice %17 {offsets = [19, 0], sizes = [185, 64], strides = [1, 1]} : vector<208x64xf32> to vector<185x64xf32>
    %47 = arith.truncf %46 : vector<185x64xf32> to vector<185x64xbf16>
    %c448 = arith.constant 448 : index
    %c0_23 = arith.constant 0 : index
    %48 = vector.load %arg5[%c448, %c0_23] : memref<576x64xbf16, #tpu.memory_space<vmem>>, vector<64x64xbf16>
    %cst_24 = arith.constant dense<0.000000e+00> : vector<185x64xf32>
    %49 = tpu.matmul %47, %48, %cst_24 {dimension_numbers = #tpu.dot_dimension_numbers<[1], [0], [0], [1], [0, 0, 1, 1], [], []>} : vector<185x64xbf16>, vector<64x64xbf16>, vector<185x64xf32> -> vector<185x64xf32>
    %50 = vector.extract_strided_slice %17 {offsets = [20, 0], sizes = [185, 64], strides = [1, 1]} : vector<208x64xf32> to vector<185x64xf32>
    %51 = arith.truncf %50 : vector<185x64xf32> to vector<185x64xbf16>
    %c512 = arith.constant 512 : index
    %c0_25 = arith.constant 0 : index
    %52 = vector.load %arg5[%c512, %c0_25] : memref<576x64xbf16, #tpu.memory_space<vmem>>, vector<64x64xbf16>
    %cst_26 = arith.constant dense<0.000000e+00> : vector<185x64xf32>
    %53 = tpu.matmul %51, %52, %cst_26 {dimension_numbers = #tpu.dot_dimension_numbers<[1], [0], [0], [1], [0, 0, 1, 1], [], []>} : vector<185x64xbf16>, vector<64x64xbf16>, vector<185x64xf32> -> vector<185x64xf32>
    %54 = arith.addf %21, %25 : vector<185x64xf32>
    %55 = arith.addf %29, %33 : vector<185x64xf32>
    %56 = arith.addf %54, %55 : vector<185x64xf32>
    %57 = arith.addf %37, %41 : vector<185x64xf32>
    %58 = arith.addf %45, %49 : vector<185x64xf32>
    %59 = arith.addf %57, %58 : vector<185x64xf32>
    %60 = arith.addf %56, %59 : vector<185x64xf32>
    %61 = arith.addf %60, %53 : vector<185x64xf32>
    %c0_27 = arith.constant 0 : index
    %c0_28 = arith.constant 0 : index
    %62 = vector.load %arg6[%c0_27, %c0_28] : memref<1x64xf32, #tpu.memory_space<vmem>>, vector<1x64xf32>
    %63 = vector.broadcast %62 : vector<1x64xf32> to vector<185x64xf32>
    %64 = arith.addf %61, %63 : vector<185x64xf32>
    %cst_29 = arith.constant 0.000000e+00 : f32
    %65 = vector.broadcast %cst_29 : f32 to vector<185x64xf32>
    %66 = arith.maximumf %64, %65 : vector<185x64xf32>
    %c0_30 = arith.constant 0 : index
    %c0_31 = arith.constant 0 : index
    %67 = vector.load %arg7[%c0_30, %c0_31] : memref<185x1xf32, #tpu.memory_space<vmem>>, vector<185x1xf32>
    %68 = vector.broadcast %67 : vector<185x1xf32> to vector<185x64xf32>
    %69 = arith.mulf %66, %68 : vector<185x64xf32>
    %70 = vector.extract_strided_slice %69 {offsets = [0, 0], sizes = [184, 64], strides = [1, 1]} : vector<185x64xf32> to vector<184x64xf32>
    %71 = vector.extract_strided_slice %69 {offsets = [1, 0], sizes = [184, 64], strides = [1, 1]} : vector<185x64xf32> to vector<184x64xf32>
    %72 = arith.maximumf %70, %71 : vector<184x64xf32>
    %73 = vector.extract_strided_slice %72 {offsets = [0, 0], sizes = [175, 64], strides = [1, 1]} : vector<184x64xf32> to vector<175x64xf32>
    %74 = vector.extract_strided_slice %72 {offsets = [9, 0], sizes = [175, 64], strides = [1, 1]} : vector<184x64xf32> to vector<175x64xf32>
    %75 = arith.maximumf %73, %74 : vector<175x64xf32>
    %c0_32 = arith.constant 0 : index
    %c0_33 = arith.constant 0 : index
    %76 = vector.load %arg13[%c0_32, %c0_33] : memref<175x64xf32, #tpu.memory_space<vmem>>, vector<175x64xf32>
    tpu.vector_store %arg13[%c0_32, %c0_33], %75 {strides = array<i32>} : memref<175x64xf32, #tpu.memory_space<vmem>>, vector<175x64xf32>,
    %c0_34 = arith.constant 0 : index
    %c0_35 = arith.constant 0 : index
    %77 = tpu.strided_load %arg13[%c0_34, %c0_35] {strides = array<i32: 104, 1>} : memref<175x64xf32, #tpu.memory_space<vmem>>, vector<2x64xf32>
    %c0_36 = arith.constant 0 : index
    %c0_37 = arith.constant 0 : index
    %78 = vector.load %arg14[%c0_36, %c0_37] : memref<2x1024xf32, #tpu.memory_space<vmem>>, vector<2x64xf32>
    tpu.vector_store %arg14[%c0_36, %c0_37], %77 {strides = array<i32>} : memref<2x1024xf32, #tpu.memory_space<vmem>>, vector<2x64xf32>,
    %c2 = arith.constant 2 : index
    %c0_38 = arith.constant 0 : index
    %79 = tpu.strided_load %arg13[%c2, %c0_38] {strides = array<i32: 104, 1>} : memref<175x64xf32, #tpu.memory_space<vmem>>, vector<2x64xf32>
    %c0_39 = arith.constant 0 : index
    %c64_40 = arith.constant 64 : index
    %80 = vector.load %arg14[%c0_39, %c64_40] : memref<2x1024xf32, #tpu.memory_space<vmem>>, vector<2x64xf32>
    tpu.vector_store %arg14[%c0_39, %c64_40], %79 {strides = array<i32>} : memref<2x1024xf32, #tpu.memory_space<vmem>>, vector<2x64xf32>,
    %c4 = arith.constant 4 : index
    %c0_41 = arith.constant 0 : index
    %81 = tpu.strided_load %arg13[%c4, %c0_41] {strides = array<i32: 104, 1>} : memref<175x64xf32, #tpu.memory_space<vmem>>, vector<2x64xf32>
    %c0_42 = arith.constant 0 : index
    %c128_43 = arith.constant 128 : index
    %82 = vector.load %arg14[%c0_42, %c128_43] : memref<2x1024xf32, #tpu.memory_space<vmem>>, vector<2x64xf32>
    tpu.vector_store %arg14[%c0_42, %c128_43], %81 {strides = array<i32>} : memref<2x1024xf32, #tpu.memory_space<vmem>>, vector<2x64xf32>,
    %c6 = arith.constant 6 : index
    %c0_44 = arith.constant 0 : index
    %83 = tpu.strided_load %arg13[%c6, %c0_44] {strides = array<i32: 104, 1>} : memref<175x64xf32, #tpu.memory_space<vmem>>, vector<2x64xf32>
    %c0_45 = arith.constant 0 : index
    %c192_46 = arith.constant 192 : index
    %84 = vector.load %arg14[%c0_45, %c192_46] : memref<2x1024xf32, #tpu.memory_space<vmem>>, vector<2x64xf32>
    tpu.vector_store %arg14[%c0_45, %c192_46], %83 {strides = array<i32>} : memref<2x1024xf32, #tpu.memory_space<vmem>>, vector<2x64xf32>,
    %c18 = arith.constant 18 : index
    %c0_47 = arith.constant 0 : index
    %85 = tpu.strided_load %arg13[%c18, %c0_47] {strides = array<i32: 104, 1>} : memref<175x64xf32, #tpu.memory_space<vmem>>, vector<2x64xf32>
    %c0_48 = arith.constant 0 : index
    %c256_49 = arith.constant 256 : index
    %86 = vector.load %arg14[%c0_48, %c256_49] : memref<2x1024xf32, #tpu.memory_space<vmem>>, vector<2x64xf32>
    tpu.vector_store %arg14[%c0_48, %c256_49], %85 {strides = array<i32>} : memref<2x1024xf32, #tpu.memory_space<vmem>>, vector<2x64xf32>,
    %c20 = arith.constant 20 : index
    %c0_50 = arith.constant 0 : index
    %87 = tpu.strided_load %arg13[%c20, %c0_50] {strides = array<i32: 104, 1>} : memref<175x64xf32, #tpu.memory_space<vmem>>, vector<2x64xf32>
    %c0_51 = arith.constant 0 : index
    %c320_52 = arith.constant 320 : index
    %88 = vector.load %arg14[%c0_51, %c320_52] : memref<2x1024xf32, #tpu.memory_space<vmem>>, vector<2x64xf32>
    tpu.vector_store %arg14[%c0_51, %c320_52], %87 {strides = array<i32>} : memref<2x1024xf32, #tpu.memory_space<vmem>>, vector<2x64xf32>,
    %c22 = arith.constant 22 : index
    %c0_53 = arith.constant 0 : index
    %89 = tpu.strided_load %arg13[%c22, %c0_53] {strides = array<i32: 104, 1>} : memref<175x64xf32, #tpu.memory_space<vmem>>, vector<2x64xf32>
    %c0_54 = arith.constant 0 : index
    %c384_55 = arith.constant 384 : index
    %90 = vector.load %arg14[%c0_54, %c384_55] : memref<2x1024xf32, #tpu.memory_space<vmem>>, vector<2x64xf32>
    tpu.vector_store %arg14[%c0_54, %c384_55], %89 {strides = array<i32>} : memref<2x1024xf32, #tpu.memory_space<vmem>>, vector<2x64xf32>,
    %c24 = arith.constant 24 : index
    %c0_56 = arith.constant 0 : index
    %91 = tpu.strided_load %arg13[%c24, %c0_56] {strides = array<i32: 104, 1>} : memref<175x64xf32, #tpu.memory_space<vmem>>, vector<2x64xf32>
    %c0_57 = arith.constant 0 : index
    %c448_58 = arith.constant 448 : index
    %92 = vector.load %arg14[%c0_57, %c448_58] : memref<2x1024xf32, #tpu.memory_space<vmem>>, vector<2x64xf32>
    tpu.vector_store %arg14[%c0_57, %c448_58], %91 {strides = array<i32>} : memref<2x1024xf32, #tpu.memory_space<vmem>>, vector<2x64xf32>,
    %c36 = arith.constant 36 : index
    %c0_59 = arith.constant 0 : index
    %93 = tpu.strided_load %arg13[%c36, %c0_59] {strides = array<i32: 104, 1>} : memref<175x64xf32, #tpu.memory_space<vmem>>, vector<2x64xf32>
    %c0_60 = arith.constant 0 : index
    %c512_61 = arith.constant 512 : index
    %94 = vector.load %arg14[%c0_60, %c512_61] : memref<2x1024xf32, #tpu.memory_space<vmem>>, vector<2x64xf32>
    tpu.vector_store %arg14[%c0_60, %c512_61], %93 {strides = array<i32>} : memref<2x1024xf32, #tpu.memory_space<vmem>>, vector<2x64xf32>,
    %c38 = arith.constant 38 : index
    %c0_62 = arith.constant 0 : index
    %95 = tpu.strided_load %arg13[%c38, %c0_62] {strides = array<i32: 104, 1>} : memref<175x64xf32, #tpu.memory_space<vmem>>, vector<2x64xf32>
    %c0_63 = arith.constant 0 : index
    %c576 = arith.constant 576 : index
    %96 = vector.load %arg14[%c0_63, %c576] : memref<2x1024xf32, #tpu.memory_space<vmem>>, vector<2x64xf32>
    tpu.vector_store %arg14[%c0_63, %c576], %95 {strides = array<i32>} : memref<2x1024xf32, #tpu.memory_space<vmem>>, vector<2x64xf32>,
    %c40 = arith.constant 40 : index
    %c0_64 = arith.constant 0 : index
    %97 = tpu.strided_load %arg13[%c40, %c0_64] {strides = array<i32: 104, 1>} : memref<175x64xf32, #tpu.memory_space<vmem>>, vector<2x64xf32>
    %c0_65 = arith.constant 0 : index
    %c640 = arith.constant 640 : index
    %98 = vector.load %arg14[%c0_65, %c640] : memref<2x1024xf32, #tpu.memory_space<vmem>>, vector<2x64xf32>
    tpu.vector_store %arg14[%c0_65, %c640], %97 {strides = array<i32>} : memref<2x1024xf32, #tpu.memory_space<vmem>>, vector<2x64xf32>,
    %c42 = arith.constant 42 : index
    %c0_66 = arith.constant 0 : index
    %99 = tpu.strided_load %arg13[%c42, %c0_66] {strides = array<i32: 104, 1>} : memref<175x64xf32, #tpu.memory_space<vmem>>, vector<2x64xf32>
    %c0_67 = arith.constant 0 : index
    %c704 = arith.constant 704 : index
    %100 = vector.load %arg14[%c0_67, %c704] : memref<2x1024xf32, #tpu.memory_space<vmem>>, vector<2x64xf32>
    tpu.vector_store %arg14[%c0_67, %c704], %99 {strides = array<i32>} : memref<2x1024xf32, #tpu.memory_space<vmem>>, vector<2x64xf32>,
    %c54 = arith.constant 54 : index
    %c0_68 = arith.constant 0 : index
    %101 = tpu.strided_load %arg13[%c54, %c0_68] {strides = array<i32: 104, 1>} : memref<175x64xf32, #tpu.memory_space<vmem>>, vector<2x64xf32>
    %c0_69 = arith.constant 0 : index
    %c768 = arith.constant 768 : index
    %102 = vector.load %arg14[%c0_69, %c768] : memref<2x1024xf32, #tpu.memory_space<vmem>>, vector<2x64xf32>
    tpu.vector_store %arg14[%c0_69, %c768], %101 {strides = array<i32>} : memref<2x1024xf32, #tpu.memory_space<vmem>>, vector<2x64xf32>,
    %c56 = arith.constant 56 : index
    %c0_70 = arith.constant 0 : index
    %103 = tpu.strided_load %arg13[%c56, %c0_70] {strides = array<i32: 104, 1>} : memref<175x64xf32, #tpu.memory_space<vmem>>, vector<2x64xf32>
    %c0_71 = arith.constant 0 : index
    %c832 = arith.constant 832 : index
    %104 = vector.load %arg14[%c0_71, %c832] : memref<2x1024xf32, #tpu.memory_space<vmem>>, vector<2x64xf32>
    tpu.vector_store %arg14[%c0_71, %c832], %103 {strides = array<i32>} : memref<2x1024xf32, #tpu.memory_space<vmem>>, vector<2x64xf32>,
    %c58 = arith.constant 58 : index
    %c0_72 = arith.constant 0 : index
    %105 = tpu.strided_load %arg13[%c58, %c0_72] {strides = array<i32: 104, 1>} : memref<175x64xf32, #tpu.memory_space<vmem>>, vector<2x64xf32>
    %c0_73 = arith.constant 0 : index
    %c896 = arith.constant 896 : index
    %106 = vector.load %arg14[%c0_73, %c896] : memref<2x1024xf32, #tpu.memory_space<vmem>>, vector<2x64xf32>
    tpu.vector_store %arg14[%c0_73, %c896], %105 {strides = array<i32>} : memref<2x1024xf32, #tpu.memory_space<vmem>>, vector<2x64xf32>,
    %c60 = arith.constant 60 : index
    %c0_74 = arith.constant 0 : index
    %107 = tpu.strided_load %arg13[%c60, %c0_74] {strides = array<i32: 104, 1>} : memref<175x64xf32, #tpu.memory_space<vmem>>, vector<2x64xf32>
    %c0_75 = arith.constant 0 : index
    %c960 = arith.constant 960 : index
    %108 = vector.load %arg14[%c0_75, %c960] : memref<2x1024xf32, #tpu.memory_space<vmem>>, vector<2x64xf32>
    tpu.vector_store %arg14[%c0_75, %c960], %107 {strides = array<i32>} : memref<2x1024xf32, #tpu.memory_space<vmem>>, vector<2x64xf32>,
    %c0_76 = arith.constant 0 : index
    %c0_77 = arith.constant 0 : index
    %109 = vector.load %arg14[%c0_76, %c0_77] : memref<2x1024xf32, #tpu.memory_space<vmem>>, vector<2x1024xf32>
    %110 = arith.truncf %109 : vector<2x1024xf32> to vector<2x1024xbf16>
    %c0_78 = arith.constant 0 : index
    %c0_79 = arith.constant 0 : index
    %111 = vector.load %arg8[%c0_78, %c0_79] : memref<1024x256xbf16, #tpu.memory_space<vmem>>, vector<1024x256xbf16>
    %cst_80 = arith.constant dense<0.000000e+00> : vector<2x256xf32>
    %112 = tpu.matmul %110, %111, %cst_80 {dimension_numbers = #tpu.dot_dimension_numbers<[1], [0], [0], [1], [0, 0, 1, 1], [], []>} : vector<2x1024xbf16>, vector<1024x256xbf16>, vector<2x256xf32> -> vector<2x256xf32>
    %c0_81 = arith.constant 0 : index
    %c0_82 = arith.constant 0 : index
    %113 = vector.load %arg9[%c0_81, %c0_82] : memref<1x256xf32, #tpu.memory_space<vmem>>, vector<1x256xf32>
    %114 = vector.broadcast %113 : vector<1x256xf32> to vector<2x256xf32>
    %115 = arith.addf %112, %114 : vector<2x256xf32>
    %cst_83 = arith.constant 0.000000e+00 : f32
    %116 = vector.broadcast %cst_83 : f32 to vector<2x256xf32>
    %117 = arith.maximumf %115, %116 : vector<2x256xf32>
    %118 = arith.truncf %117 : vector<2x256xf32> to vector<2x256xbf16>
    %c0_84 = arith.constant 0 : index
    %c0_85 = arith.constant 0 : index
    %119 = vector.load %arg10[%c0_84, %c0_85] : memref<256x128xbf16, #tpu.memory_space<vmem>>, vector<256x128xbf16>
    %cst_86 = arith.constant dense<0.000000e+00> : vector<2x128xf32>
    %120 = tpu.matmul %118, %119, %cst_86 {dimension_numbers = #tpu.dot_dimension_numbers<[1], [0], [0], [1], [0, 0, 1, 1], [], []>} : vector<2x256xbf16>, vector<256x128xbf16>, vector<2x128xf32> -> vector<2x128xf32>
    %c0_87 = arith.constant 0 : index
    %c0_88 = arith.constant 0 : index
    %121 = vector.load %arg11[%c0_87, %c0_88] : memref<1x128xf32, #tpu.memory_space<vmem>>, vector<1x128xf32>
    %122 = vector.broadcast %121 : vector<1x128xf32> to vector<2x128xf32>
    %123 = arith.addf %120, %122 : vector<2x128xf32>
    %c0_89 = arith.constant 0 : index
    %c0_90 = arith.constant 0 : index
    %c0_91 = arith.constant 0 : index
    %124 = vector.load %arg12[%c0_89, %c0_90, %c0_91] : memref<1x2x128xf32, #tpu.memory_space<vmem>>, vector<1x2x128xf32>
    %125 = vector.shape_cast %124 : vector<1x2x128xf32> to vector<2x128xf32>
    %126 = vector.shape_cast %123 : vector<2x128xf32> to vector<1x2x128xf32>
    tpu.vector_store %arg12[%c0_89, %c0_90, %c0_91], %126 {strides = array<i32>} : memref<1x2x128xf32, #tpu.memory_space<vmem>>, vector<1x2x128xf32>,
    return
  }
  func.func @transform_0(%arg0: i32) -> (i32, i32) {
    %c0_i32 = arith.constant 0 : i32
    %c0_i32_0 = arith.constant 0 : i32
    return %arg0, %c0_i32 : i32, i32
  }
  func.func @transform_1(%arg0: i32) -> (i32, i32) {
    %c0_i32 = arith.constant 0 : i32
    %c0_i32_0 = arith.constant 0 : i32
    %c0_i32_1 = arith.constant 0 : i32
    return %c0_i32, %c0_i32_0 : i32, i32
  }
  func.func @transform_2(%arg0: i32) -> (i32, i32) {
    %c0_i32 = arith.constant 0 : i32
    %c0_i32_0 = arith.constant 0 : i32
    %c0_i32_1 = arith.constant 0 : i32
    return %c0_i32, %c0_i32_0 : i32, i32
  }
  func.func @transform_3(%arg0: i32) -> (i32, i32) {
    %c0_i32 = arith.constant 0 : i32
    %c0_i32_0 = arith.constant 0 : i32
    %c0_i32_1 = arith.constant 0 : i32
    return %c0_i32, %c0_i32_0 : i32, i32
  }
  func.func @transform_4(%arg0: i32) -> (i32, i32) {
    %c0_i32 = arith.constant 0 : i32
    %c0_i32_0 = arith.constant 0 : i32
    %c0_i32_1 = arith.constant 0 : i32
    return %c0_i32, %c0_i32_0 : i32, i32
  }
  func.func @transform_5(%arg0: i32) -> (i32, i32) {
    %c0_i32 = arith.constant 0 : i32
    %c0_i32_0 = arith.constant 0 : i32
    %c0_i32_1 = arith.constant 0 : i32
    return %c0_i32, %c0_i32_0 : i32, i32
  }
  func.func @transform_6(%arg0: i32) -> (i32, i32) {
    %c0_i32 = arith.constant 0 : i32
    %c0_i32_0 = arith.constant 0 : i32
    %c0_i32_1 = arith.constant 0 : i32
    return %c0_i32, %c0_i32_0 : i32, i32
  }
  func.func @transform_7(%arg0: i32) -> (i32, i32) {
    %c0_i32 = arith.constant 0 : i32
    %c0_i32_0 = arith.constant 0 : i32
    %c0_i32_1 = arith.constant 0 : i32
    return %c0_i32, %c0_i32_0 : i32, i32
  }
  func.func @transform_8(%arg0: i32) -> (i32, i32) {
    %c0_i32 = arith.constant 0 : i32
    %c0_i32_0 = arith.constant 0 : i32
    %c0_i32_1 = arith.constant 0 : i32
    return %c0_i32, %c0_i32_0 : i32, i32
  }
  func.func @transform_9(%arg0: i32) -> (i32, i32) {
    %c0_i32 = arith.constant 0 : i32
    %c0_i32_0 = arith.constant 0 : i32
    %c0_i32_1 = arith.constant 0 : i32
    return %c0_i32, %c0_i32_0 : i32, i32
  }
  func.func @transform_10(%arg0: i32) -> (i32, i32) {
    %c0_i32 = arith.constant 0 : i32
    %c0_i32_0 = arith.constant 0 : i32
    %c0_i32_1 = arith.constant 0 : i32
    return %c0_i32, %c0_i32_0 : i32, i32
  }
  func.func @transform_11(%arg0: i32) -> (i32, i32, i32) {
    %c0_i32 = arith.constant 0 : i32
    %c0_i32_0 = arith.constant 0 : i32
    %c0_i32_1 = arith.constant 0 : i32
    return %arg0, %c0_i32, %c0_i32_0 : i32, i32, i32
  }
}

</mosaic_0001>

<bundles_post_ra>
// kernel: _lambda_.1
= control target key start
LH: loop header
LB: loop body
LE: loop exit
PB: predicated region body
PF: predicated region fallthrough
CT: control target
= control target key end

     0   :  { %vm581_vm0 = vcmask 1041408   ;;  %s8678_s0 = inlined_call_operand.vmem [shape: bf16[832,36], index: 0, kind: input, shape index: {}]   ;;  %s8679_s1 = inlined_call_operand.vmem [shape: bf16[36,64], index: 1, kind: input, shape index: {}]   ;;  %s8680_s2 = inlined_call_operand.vmem [shape: f32[1,64], index: 2, kind: input, shape index: {}]   ;;  %s8681_s3 = inlined_call_operand.vmem [shape: f32[208,1], index: 3, kind: input, shape index: {}]   ;;  %s8682_s4 = inlined_call_operand.vmem [shape: bf16[576,64], index: 4, kind: input, shape index: {}]   ;;  %s8683_s5 = inlined_call_operand.vmem [shape: f32[1,64], index: 5, kind: input, shape index: {}]   ;;  %s8684_s6 = inlined_call_operand.vmem [shape: f32[185,1], index: 6, kind: input, shape index: {}]   ;;  %s8685_s7 = inlined_call_operand.vmem [shape: bf16[1024,256], index: 7, kind: input, shape index: {}]   ;;  %s8686_s8 = inlined_call_operand.vmem [shape: f32[1,256], index: 8, kind: input, shape index: {}]   ;;  %s8687_s9 = inlined_call_operand.vmem [shape: bf16[256,128], index: 9, kind: input, shape index: {}]   ;;  %s8688_s10 = inlined_call_operand.vmem [shape: f32[1,128], index: 10, kind: input, shape index: {}]   ;;  %s8689_s11 = inlined_call_operand.hbm [shape: f32[1,2,128], index: 11, kind: output, shape index: {}]  }
   0x1   :  { %v148_v0 = vld [vmem:[%s8679_s1 + $0x10] sm:$0x3] }
   0x2   :  { %v418_v1 = vunpack.c.l.b16 %v148_v0 }
   0x4   :  { %v421_v2 = vpack.c.b16 %v418_v1, %v418_v1 }
   0x5   :  { %16 = vsyncpa [#allocation5], 0  ;;  %v5764_v4 = vld [vmem:[%s8679_s1 + $0x8] sm:$0xff]  ;;  %v5763_v5 = vld [vmem:[%s8679_s1] sm:$0xff]  ;;  %vm424_vm1 = vcmask 293888   ;;  %vm2358_vm3 = vcmask 1046528  }
   0x6   :  { %v583_v3 = vsel %vm581_vm0, %v421_v2, 0  ;;  %v5711_v6 = vld [vmem:[%s8678_s0] sm:$0xff]  ;;  %v5712_v7 = vld [vmem:[%s8678_s0 + $0x8] sm:$0xff]  ;;  %v5713_v8 = vld [vmem:[%s8678_s0 + $0x10] sm:$0xff]  ;;  %vm1692_vm2 = vsmask.f32 6400 }
   0x7   :  { %590 = vmatpush.bf16.msra.mxu0 %v583_v3  ;;  %5945 = vmatpush.bf16.msra.mxu1 %v583_v3  ;;  %v5714_v9 = vld [vmem:[%s8678_s0 + $0x18] sm:$0xff]  ;;  %v5715_v10 = vld [vmem:[%s8678_s0 + $0x20] sm:$0xff]  ;;  %v5716_v11 = vld [vmem:[%s8678_s0 + $0x28] sm:$0xff]  ;;  %vm1198_vm4 = vsmask.f32 7424  ;;  %vm1318_vm5 = vcmask 523264  }
   0x8   :  { %5946 = vmatpush.bf16.msra.mxu2 %v583_v3  ;;  %v5717_v12 = vld [vmem:[%s8678_s0 + $0x30] sm:$0xff]  ;;  %v5718_v13 = vld [vmem:[%s8678_s0 + $0x38] sm:$0xff]  ;;  %v5719_v14 = vld [vmem:[%s8678_s0 + $0x40] sm:$0xff]  ;;  %vm2087_vm6 = vcmask 1045504   ;;  %vm3343_vm7 = vcmask 517120   ;;  %s5988_s12 = smov 64  }
   0x9   :  { %v5720_v17 = vld [vmem:[%s8678_s0 + $0x48] sm:$0xff]  ;;  %v5721_v20 = vld [vmem:[%s8678_s0 + $0x50] sm:$0xff]  ;;  %v5722_v23 = vld [vmem:[%s8678_s0 + $0x58] sm:$0xff]  ;;  %vm3351_vm8 = vcmask 1041920   ;;  %s5989_s29 = smov [#allocation4]  }
   0xa   :  { %v5723_v26 = vld [vmem:[%s8678_s0 + $0x60] sm:$0xff]  ;;  %v5724_v29 = vld [vmem:[%s8678_s0 + $0x68] sm:$0xff]  ;;  %v5725_v32 = vld [vmem:[%s8678_s0 + $0x70] sm:$0xff]  ;;  %s4604_s30 = sshll.u32 %s5989_s29, 4  ;;  %s4605_s30 = int_to_ptr.vmem [resolvable:$true] %s4604_s30 }
   0xb   :  { %591 = vmatpush.bf16.msra.mxu0 %v5764_v4  ;;  %5947 = vmatpush.bf16.msra.mxu1 %v5764_v4  ;;  %v5726_v35 = vld [vmem:[%s8678_s0 + $0x78] sm:$0xff]  ;;  %v5727_v38 = vld [vmem:[%s8678_s0 + $0x80] sm:$0xff]  ;;  %v5728_v41 = vld [vmem:[%s8678_s0 + $0x88] sm:$0xff] }
   0xc   :  { %5948 = vmatpush.bf16.msra.mxu2 %v5764_v4  ;;  %v5729_v44 = vld [vmem:[%s8678_s0 + $0x90] sm:$0xff]  ;;  %v5730_v47 = vld [vmem:[%s8678_s0 + $0x98] sm:$0xff]  ;;  %v5731_v50 = vld [vmem:[%s8678_s0 + $0xa0] sm:$0xff] }
   0xd   :  { %v5732_v53 = vld [vmem:[%s8678_s0 + $0xa8] sm:$0xff]  ;;  %v5733_v56 = vld [vmem:[%s8678_s0 + $0xb0] sm:$0xff]  ;;  %v5734_v59 = vld [vmem:[%s8678_s0 + $0xb8] sm:$0xff] }
   0xe   :  { %v5735_v62 = vld [vmem:[%s8678_s0 + $0xc0] sm:$0xff]  ;;  %v5736_v1 = vld [vmem:[%s8678_s0 + $0xc8] sm:$0xff]  ;;  %v5737_v4 = vld [vmem:[%s8678_s0 + $0xd0] sm:$0xff] }
   0xf   :  { %592 = vmatpush.bf16.msra.mxu0 %v5763_v5  ;;  %5949 = vmatpush.bf16.msra.mxu1 %v5763_v5 }
  0x10   :  { %5950 = vmatpush.bf16.msra.mxu2 %v5763_v5 }
  0x12   :  { %4831 = vmatmul.msk.bf16.vlgmr.msra.gmra.mxu0 %vm424_vm1, %v5711_v6 }
  0x22   :  { %4832 = vmatmul.msk.bf16.gmra.mxu0 %vm424_vm1, %v5712_v7  ;;  %v5738_v7 = vld [vmem:[%s8678_s0 + $0xd8] sm:$0xff] }
  0x32   :  { %4833 = vmatmul.msk.bf16.gmra.mxu0 %vm424_vm1, %v5713_v8 }
  0x42   :  { %4834 = vmatmul.msk.bf16.gmra.mxu0 %vm424_vm1, %v5714_v9 }
  0x52   :  { %4835 = vmatmul.msk.bf16.gmra.mxu0 %vm424_vm1, %v5715_v10  ;;  %v5739_v10 = vld [vmem:[%s8678_s0 + $0xe0] sm:$0xff] }
  0x62   :  { %4836 = vmatmul.msk.bf16.gmra.mxu0 %vm424_vm1, %v5716_v11 }
  0x72   :  { %4837 = vmatmul.msk.bf16.gmra.mxu0 %vm424_vm1, %v5717_v12 }
  0x82   :  { %4838 = vmatmul.msk.bf16.gmra.mxu0 %vm424_vm1, %v5718_v13  ;;  %v5740_v13 = vld [vmem:[%s8678_s0 + $0xe8] sm:$0xff] }
  0x8f   :  { %v6094_v15 = vpop.f32.mrf.mxu0 }
  0x92   :  { %4839 = vmatmul.msk.bf16.gmra.mxu0 %vm424_vm1, %v5719_v14 }
  0x97   :  { %v6097_v16 = vpop.f32.mrf.mxu0 }
  0x9f   :  { %v6102_v18 = vpop.f32.mrf.mxu0 }
  0xa2   :  { %4840 = vmatmul.msk.bf16.gmra.mxu0 %vm424_vm1, %v5720_v17 }
  0xa7   :  { %v6105_v19 = vpop.f32.mrf.mxu0 }
  0xaf   :  { %v6110_v21 = vpop.f32.mrf.mxu0 }
  0xb2   :  { %4841 = vmatmul.msk.bf16.gmra.mxu0 %vm424_vm1, %v5721_v20  ;;  %v5741_v20 = vld [vmem:[%s8678_s0 + $0xf0] sm:$0xff] }
  0xb7   :  { %v6113_v22 = vpop.f32.mrf.mxu0 }
  0xbf   :  { %v6118_v24 = vpop.f32.mrf.mxu0 }
  0xc2   :  { %4842 = vmatmul.msk.bf16.gmra.mxu0 %vm424_vm1, %v5722_v23 }
  0xc7   :  { %v6121_v25 = vpop.f32.mrf.mxu0 }
  0xcf   :  { %v6126_v27 = vpop.f32.mrf.mxu0 }
  0xd2   :  { %4843 = vmatmul.msk.bf16.gmra.mxu0 %vm424_vm1, %v5723_v26 }
  0xd7   :  { %v6129_v28 = vpop.f32.mrf.mxu0 }
  0xdf   :  { %v6134_v30 = vpop.f32.mrf.mxu0 }
  0xe0   :  { %8699 = vst [vmem:[#allocation7_spill] sm:$0xff] %v6134_v30 }
  0xe2   :  { %4844 = vmatmul.msk.bf16.gmra.mxu0 %vm424_vm1, %v5724_v29  ;;  %v5742_v29 = vld [vmem:[%s8678_s0 + $0xf8] sm:$0xff] }
  0xe7   :  { %v6137_v31 = vpop.f32.mrf.mxu0 }
  0xe8   :  { %8700 = vst [vmem:[#allocation8_spill] sm:$0xff] %v6137_v31 }
  0xef   :  { %v6142_v33 = vpop.f32.mrf.mxu0 }
  0xf0   :  { %8701 = vst [vmem:[#allocation9_spill] sm:$0xff] %v6142_v33 }
  0xf2   :  { %4845 = vmatmul.msk.bf16.gmra.mxu0 %vm424_vm1, %v5725_v32 }
  0xf7   :  { %v6145_v34 = vpop.f32.mrf.mxu0 }
  0xf8   :  { %8702 = vst [vmem:[#allocation10_spill] sm:$0xff] %v6145_v34 }
  0xff   :  { %v6150_v36 = vpop.f32.mrf.mxu0 }
 0x100   :  { %8703 = vst [vmem:[#allocation11_spill] sm:$0xff] %v6150_v36  ;;  %v2944_v36 = vld [vmem:[%s8684_s6 + $0xa0] sm:$0xff] }
 0x102   :  { %4846 = vmatmul.msk.bf16.gmra.mxu0 %vm424_vm1, %v5726_v35 }
 0x107   :  { %v6153_v37 = vpop.f32.mrf.mxu0 }
 0x108   :  { %8704 = vst [vmem:[#allocation12_spill] sm:$0xff] %v6153_v37 }
 0x10f   :  { %v6158_v39 = vpop.f32.mrf.mxu0 }
 0x110   :  { %8705 = vst [vmem:[#allocation13_spill] sm:$0xff] %v6158_v39 }
 0x112   :  { %4847 = vmatmul.msk.bf16.gmra.mxu0 %vm424_vm1, %v5727_v38  ;;  %v5743_v38 = vld [vmem:[%s8678_s0 + $0x100] sm:$0xff] }
 0x117   :  { %v6161_v40 = vpop.f32.mrf.mxu0 }
 0x118   :  { %8706 = vst [vmem:[#allocation14_spill] sm:$0xff] %v6161_v40  ;;  %v2934_v40 = vld [vmem:[%s8684_s6 + $0x50] sm:$0xff] }
 0x11f   :  { %v6166_v42 = vpop.f32.mrf.mxu0 }
 0x120   :  { %8707 = vst [vmem:[#allocation15_spill] sm:$0xff] %v6166_v42  ;;  %v2931_v42 = vld [vmem:[%s8684_s6 + $0x38] sm:$0xff] }
 0x122   :  { %4848 = vmatmul.msk.bf16.gmra.mxu0 %vm424_vm1, %v5728_v41 }
 0x127   :  { %v6169_v43 = vpop.f32.mrf.mxu0 }
 0x128   :  { %8708 = vst [vmem:[#allocation16_spill] sm:$0xff] %v6169_v43  ;;  %v2929_v43 = vld [vmem:[%s8684_s6 + $0x28] sm:$0xff] }
 0x12f   :  { %v6174_v45 = vpop.f32.mrf.mxu0 }
 0x132   :  { %4849 = vmatmul.msk.bf16.gmra.mxu0 %vm424_vm1, %v5729_v44  ;;  %v991_v44 = vld [vmem:[%s8681_s3 + $0x18] sm:$0xff] }
 0x137   :  { %v6177_v46 = vpop.f32.mrf.mxu0 }
 0x13f   :  { %v6182_v48 = vpop.f32.mrf.mxu0 }
 0x142   :  { %4850 = vmatmul.msk.bf16.gmra.mxu0 %vm424_vm1, %v5730_v47  ;;  %v989_v47 = vld [vmem:[%s8681_s3 + $0x8] sm:$0xff] }
 0x147   :  { %v6185_v49 = vpop.f32.mrf.mxu0 }
 0x14f   :  { %v6190_v51 = vpop.f32.mrf.mxu0 }
 0x152   :  { %4851 = vmatmul.msk.bf16.gmra.mxu0 %vm424_vm1, %v5731_v50  ;;  %v5987_v50 = vmov 0  }
 0x153   :  { %5955 = vset.pattern.permute.xlu1 %v5987_v50  ;;  %5954 = vset.pattern.permute.xlu0 %v5987_v50 }
 0x154   :  { %1031 = vperm.xlu1 %5955, %v991_v44   ;;  %1021 = vperm.xlu0 %5954, %v989_v47   ;;  %v5760_v47 = vld [vmem:[%s8678_s0 + $0x188] sm:$0xff] }
 0x155   :  { %5956 = vset.pattern.permute.xlu2 %v5987_v50  ;;  %4880 = vmatmul.msk.bf16.vlgmr.msra.gmra.mxu1 %vm424_vm1, %v5760_v47  ;;  %v1001_v50 = vld [vmem:[%s8681_s3 + $0x68] sm:$0xff]  ;;  %v1007_v47 = vld [vmem:[%s8681_s3 + $0x98] sm:$0xff] }
 0x157   :  { %v6193_v52 = vpop.f32.mrf.mxu0 }
 0x15f   :  { %v6198_v54 = vpop.f32.mrf.mxu0 }
 0x162   :  { %4852 = vmatmul.msk.bf16.gmra.mxu0 %vm424_vm1, %v5732_v53 }
 0x167   :  { %v6201_v55 = vpop.f32.mrf.mxu0 }
 0x16f   :  { %v6206_v57 = vpop.f32.mrf.mxu0 }
 0x172   :  { %4853 = vmatmul.msk.bf16.gmra.mxu0 %vm424_vm1, %v5733_v56  ;;  %v992_v56 = vld [vmem:[%s8681_s3 + $0x20] sm:$0xff] }
 0x173   :  { %1036 = vperm.xlu1 %5955, %v992_v56   ;;  %v1000_v56 = vld [vmem:[%s8681_s3 + $0x60] sm:$0xff] }
 0x177   :  { %v6209_v58 = vpop.f32.mrf.mxu0 }
 0x17f   :  { %v6214_v60 = vpop.f32.mrf.mxu0 }
 0x182   :  { %4854 = vmatmul.msk.bf16.gmra.mxu0 %vm424_vm1, %v5734_v59  ;;  %v990_v59 = vld [vmem:[%s8681_s3 + $0x10] sm:$0xff] }
 0x183   :  { %1026 = vperm.xlu0 %5954, %v990_v59   ;;  %v993_v59 = vld [vmem:[%s8681_s3 + $0x28] sm:$0xff] }
 0x187   :  { %v6217_v61 = vpop.f32.mrf.mxu0 }
 0x18f   :  { %v6222_v63 = vpop.f32.mrf.mxu0 }
 0x192   :  { %4855 = vmatmul.msk.bf16.gmra.mxu0 %vm424_vm1, %v5735_v62  ;;  %v5744_v62 = vld [vmem:[%s8678_s0 + $0x108] sm:$0xff] }
 0x197   :  { %v6225_v0 = vpop.f32.mrf.mxu0 }
 0x19f   :  { %v6230_v2 = vpop.f32.mrf.mxu0 }
 0x1a2   :  { %4856 = vmatmul.msk.bf16.gmra.mxu0 %vm424_vm1, %v5736_v1 }
 0x1a7   :  { %v6233_v3 = vpop.f32.mrf.mxu0 }
 0x1af   :  { %v6238_v5 = vpop.f32.mrf.mxu0 }
 0x1b0   :  { %8709 = vst [vmem:[#allocation17_spill] sm:$0xff] %v6238_v5 }
 0x1b2   :  { %4857 = vmatmul.msk.bf16.gmra.mxu0 %vm424_vm1, %v5737_v4  ;;  %v995_v4 = vld [vmem:[%s8681_s3 + $0x38] sm:$0xff] }
 0x1b3   :  { %1051 = vperm.xlu1 %5955, %v995_v4   ;;  %v5761_v4 = vld [vmem:[%s8678_s0 + $0x190] sm:$0xff] }
 0x1b4   :  { %4881 = vmatmul.msk.bf16.vlgmr.msra.gmra.mxu2 %vm424_vm1, %v5761_v4  ;;  %v5762_v4 = vld [vmem:[%s8678_s0 + $0x198] sm:$0xff] }
 0x1b7   :  { %v6241_v6 = vpop.f32.mrf.mxu0 }
 0x1b8   :  { %8710 = vst [vmem:[#allocation18_spill] sm:$0xff] %v6241_v6 }
 0x1bf   :  { %v6246_v8 = vpop.f32.mrf.mxu0 }
 0x1c0   :  { %8711 = vst [vmem:[#allocation19_spill] sm:$0xff] %v6246_v8 }
 0x1c2   :  { %4858 = vmatmul.msk.bf16.gmra.mxu0 %vm424_vm1, %v5738_v7  ;;  %v994_v7 = vld [vmem:[%s8681_s3 + $0x30] sm:$0xff] }
 0x1c3   :  { %1046 = vperm.xlu0 %5954, %v994_v7   ;;  %v996_v7 = vld [vmem:[%s8681_s3 + $0x40] sm:$0xff] }
 0x1c4   :  { %4882 = vmatmul.msk.bf16.gmra.mxu2 %vm424_vm1, %v5762_v4  ;;  %v1005_v4 = vld [vmem:[%s8681_s3 + $0x88] sm:$0xff] }
 0x1c7   :  { %v6249_v9 = vpop.f32.mrf.mxu0 }
 0x1c8   :  { %8712 = vst [vmem:[#allocation20_spill] sm:$0xff] %v6249_v9 }
 0x1cf   :  { %v6254_v11 = vpop.f32.mrf.mxu0 }
 0x1d0   :  { %8713 = vst [vmem:[#allocation21_spill] sm:$0xff] %v6254_v11 }
 0x1d2   :  { %4859 = vmatmul.msk.bf16.gmra.mxu0 %vm424_vm1, %v5739_v10 }
 0x1d7   :  { %v6257_v12 = vpop.f32.mrf.mxu0 }
 0x1d8   :  { %8714 = vst [vmem:[#allocation22_spill] sm:$0xff] %v6257_v12  ;;  %v2932_v12 = vld [vmem:[%s8684_s6 + $0x40] sm:$0xff] }
 0x1df   :  { %v6262_v14 = vpop.f32.mrf.mxu0 }
 0x1e0   :  { %8715 = vst [vmem:[#allocation23_spill] sm:$0xff] %v6262_v14  ;;  %v6499_v14 = vpop.permute.xlu0 %1021 }
 0x1e2   :  { %4860 = vmatmul.msk.bf16.gmra.mxu0 %vm424_vm1, %v5740_v13  ;;  %v988_v13 = vld [vmem:[%s8681_s3] sm:$0xff] }
 0x1e3   :  { %1016 = vperm.xlu2 %5956, %v988_v13   ;;  %v1004_v13 = vld [vmem:[%s8681_s3 + $0x80] sm:$0xff] }
 0x1e7   :  { %v6265_v17 = vpop.f32.mrf.mxu0 }
 0x1e8   :  { %8716 = vst [vmem:[#allocation24_spill] sm:$0xff] %v6265_v17  ;;  %v2945_v17 = vld [vmem:[%s8684_s6 + $0xa8] sm:$0xff] }
 0x1eb   :  { %1041 = vperm.xlu2 %5956, %v993_v59  }
 0x1ef   :  { %v6270_v23 = vpop.f32.mrf.mxu0 }
 0x1f0   :  { %8717 = vst [vmem:[#allocation25_spill] sm:$0xff] %v6270_v23  ;;  %v2937_v23 = vld [vmem:[%s8684_s6 + $0x68] sm:$0xff] }
 0x1f2   :  { %4861 = vmatmul.msk.bf16.gmra.mxu0 %vm424_vm1, %v5741_v20  ;;  %v998_v20 = vld [vmem:[%s8681_s3 + $0x50] sm:$0xff] }
 0x1f3   :  { %1066 = vperm.xlu1 %5955, %v998_v20   ;;  %v1003_v20 = vld [vmem:[%s8681_s3 + $0x78] sm:$0xff]  ;;  %1056 = vperm.xlu2 %5956, %v996_v7   ;;  %v1002_v7 = vld [vmem:[%s8681_s3 + $0x70] sm:$0xff] }
 0x1f7   :  { %v6273_v26 = vpop.f32.mrf.mxu0 }
 0x1f8   :  { %8718 = vst [vmem:[#allocation26_spill] sm:$0xff] %v6273_v26 }
 0x1fb   :  { %1081 = vperm.xlu1 %5955, %v1001_v50   ;;  %v1006_v50 = vld [vmem:[%s8681_s3 + $0x90] sm:$0xff] }
 0x1ff   :  { %v6278_v32 = vpop.f32.mrf.mxu0 }
 0x202   :  { %4862 = vmatmul.msk.bf16.gmra.mxu0 %vm424_vm1, %v5742_v29  ;;  %v997_v29 = vld [vmem:[%s8681_s3 + $0x48] sm:$0xff] }
 0x203   :  { %1061 = vperm.xlu0 %5954, %v997_v29   ;;  %1096 = vperm.xlu1 %5955, %v1004_v13   ;;  %v5746_v29 = vld [vmem:[%s8678_s0 + $0x118] sm:$0xff]  ;;  %v1010_v13 = vld [vmem:[%s8681_s3 + $0xb0] sm:$0xff] }
 0x207   :  { %v6281_v35 = vpop.f32.mrf.mxu0 }
 0x20b   :  { %1076 = vperm.xlu0 %5954, %v1000_v56   ;;  %v999_v56 = vld [vmem:[%s8681_s3 + $0x58] sm:$0xff]  ;;  %1111 = vperm.xlu1 %5955, %v1007_v47  }
 0x20c   :  { %1071 = vperm.xlu2 %5956, %v999_v56   ;;  %v1012_v56 = vld [vmem:[%s8681_s3 + $0xc0] sm:$0xff] }
 0x20f   :  { %v6286_v41 = vpop.f32.mrf.mxu0 }
 0x212   :  { %4863 = vmatmul.msk.bf16.gmra.mxu0 %vm424_vm1, %v5743_v38  ;;  %v5745_v38 = vld [vmem:[%s8678_s0 + $0x110] sm:$0xff] }
 0x213   :  { %1091 = vperm.xlu0 %5954, %v1003_v20   ;;  %v1009_v20 = vld [vmem:[%s8681_s3 + $0xa8] sm:$0xff]  ;;  %1126 = vperm.xlu1 %5955, %v1010_v13   ;;  %v1008_v13 = vld [vmem:[%s8681_s3 + $0xa0] sm:$0xff] }
 0x214   :  { %1086 = vperm.xlu2 %5956, %v1002_v7  }
 0x217   :  { %v6295_v53 = vpop.f32.mrf.mxu0 }
 0x21b   :  { %1106 = vperm.xlu0 %5954, %v1006_v50   ;;  %v1013_v50 = vld [vmem:[%s8681_s3 + $0xc8] sm:$0xff] }
 0x21c   :  { %1101 = vperm.xlu2 %5956, %v1005_v4   ;;  %1141 = vperm.xlu1 %5955, %v1013_v50   ;;  %v5748_v50 = vld [vmem:[%s8678_s0 + $0x128] sm:$0xff]  ;;  %v2930_v4 = vld [vmem:[%s8684_s6 + $0x30] sm:$0xff] }
 0x21f   :  { %v6306_v1 = vpop.f32.mrf.mxu0 }
 0x222   :  { %4864 = vmatmul.msk.bf16.gmra.mxu0 %vm424_vm1, %v5744_v62 }
 0x223   :  { %1121 = vperm.xlu0 %5954, %v1009_v20   ;;  %v2927_v20 = vld [vmem:[%s8684_s6 + $0x18] sm:$0xff] }
 0x224   :  { %1116 = vperm.xlu2 %5956, %v1008_v13   ;;  %2965 = vperm.xlu1 %5955, %v2927_v20   ;;  %v2940_v20 = vld [vmem:[%s8684_s6 + $0x80] sm:$0xff] }
 0x227   :  { %v6315_v10 = vpop.f32.mrf.mxu0 }
 0x22b   :  { %1136 = vperm.xlu0 %5954, %v1012_v56  }
 0x22c   :  { %2980 = vperm.xlu1 %5955, %v2930_v4   ;;  %v2943_v4 = vld [vmem:[%s8684_s6 + $0x98] sm:$0xff] }
 0x22f   :  { %v6329_v44 = vpop.f32.mrf.mxu0 }
 0x232   :  { %4865 = vmatmul.msk.bf16.gmra.mxu0 %vm424_vm1, %v5745_v38 }
 0x234   :  { %3030 = vperm.xlu1 %5955, %v2940_v20   ;;  %v2942_v20 = vld [vmem:[%s8684_s6 + $0x90] sm:$0xff] }
 0x237   :  { %v6345_v62 = vpop.f32.mrf.mxu0  ;;  %v844_v5 = vpop.f32.mrf.mxu2 }
 0x23c   :  { %3045 = vperm.xlu1 %5955, %v2943_v4  }
 0x23d   :  { %v6511_v37 = vpop.permute.xlu2 %1016 }
 0x23f   :  { %v6363_v38 = vpop.f32.mrf.mxu0 }
 0x242   :  { %4866 = vmatmul.msk.bf16.gmra.mxu0 %vm424_vm1, %v5746_v29  ;;  %v5747_v29 = vld [vmem:[%s8678_s0 + $0x120] sm:$0xff] }
 0x244   :  { %2985 = vperm.xlu1 %5955, %v2931_v42   ;;  %v2933_v42 = vld [vmem:[%s8684_s6 + $0x48] sm:$0xff] }
 0x245   :  { %v6526_v11 = vpop.permute.xlu2 %1041 }
 0x247   :  { %v6375_v59 = vpop.f32.mrf.mxu0 }
 0x24c   :  { %3000 = vperm.xlu1 %5955, %v2934_v40   ;;  %v5751_v40 = vld [vmem:[%s8678_s0 + $0x140] sm:$0xff] }
 0x24d   :  { %v6541_v9 = vpop.permute.xlu2 %1056 }
 0x24e   :  { %8727 = vst [vmem:[#allocation35_spill] sm:$0xff] %v6541_v9 }
 0x24f   :  { %v6393_v47 = vpop.f32.mrf.mxu0 }
 0x252   :  { %4867 = vmatmul.msk.bf16.gmra.mxu0 %vm424_vm1, %v5747_v29  ;;  %v2926_v29 = vld [vmem:[%s8684_s6 + $0x10] sm:$0xff] }
 0x253   :  { %2960 = vperm.xlu0 %5954, %v2926_v29   ;;  %v2939_v29 = vld [vmem:[%s8684_s6 + $0x78] sm:$0xff] }
 0x257   :  { %v6405_v7 = vpop.f32.mrf.mxu0 }
 0x25b   :  { %2975 = vperm.xlu0 %5954, %v2929_v43   ;;  %v1011_v43 = vld [vmem:[%s8681_s3 + $0xb8] sm:$0xff] }
 0x25c   :  { %1131 = vperm.xlu2 %5956, %v1011_v43   ;;  %v5750_v43 = vld [vmem:[%s8678_s0 + $0x138] sm:$0xff] }
 0x25f   :  { %v6419_v56 = vpop.f32.mrf.mxu0 }
 0x262   :  { %4868 = vmatmul.msk.bf16.gmra.mxu0 %vm424_vm1, %v5748_v50  ;;  %v5749_v50 = vld [vmem:[%s8678_s0 + $0x130] sm:$0xff] }
 0x263   :  { %3025 = vperm.xlu0 %5954, %v2939_v29  }
 0x266   :  { %v6549_v8 = vpop.permute.xlu2 %1071 }
 0x267   :  { %v6428_v13 = vpop.f32.mrf.mxu0  ;;  %8731 = vst [vmem:[#allocation39_spill] sm:$0xff] %v6549_v8  ;;  %v5755_v8 = vld [vmem:[%s8678_s0 + $0x160] sm:$0xff] }
 0x26b   :  { %3040 = vperm.xlu0 %5954, %v2942_v20   ;;  %v2928_v20 = vld [vmem:[%s8684_s6 + $0x20] sm:$0xff] }
 0x26e   :  { %v6561_v31 = vpop.permute.xlu2 %1086 }
 0x26f   :  { %v6439_v26 = vpop.f32.mrf.mxu0  ;;  %8735 = vst [vmem:[#allocation43_spill] sm:$0xff] %v6561_v31 }
 0x272   :  { %4869 = vmatmul.msk.bf16.gmra.mxu0 %vm424_vm1, %v5749_v50  ;;  %v2925_v50 = vld [vmem:[%s8684_s6 + $0x8] sm:$0xff] }
 0x273   :  { %2955 = vperm.xlu2 %5956, %v2925_v50   ;;  %3015 = vperm.xlu0 %5954, %v2937_v23   ;;  %v2938_v50 = vld [vmem:[%s8684_s6 + $0x70] sm:$0xff] }
 0x277   :  { %v6451_v29 = vpop.f32.mrf.mxu0 }
 0x278   :  { %8719 = vst [vmem:[#allocation27_spill] sm:$0xff] %v6451_v29  ;;  %v5756_v29 = vld [vmem:[%s8678_s0 + $0x168] sm:$0xff] }
 0x27b   :  { %2970 = vperm.xlu2 %5956, %v2928_v20   ;;  %2995 = vperm.xlu0 %5954, %v2933_v42   ;;  %v2941_v42 = vld [vmem:[%s8684_s6 + $0x88] sm:$0xff] }
 0x27f   :  { %v6465_v4 = vpop.f32.mrf.mxu0 }
 0x280   :  { %8720 = vst [vmem:[#allocation28_spill] sm:$0xff] %v6465_v4 }
 0x282   :  { %4870 = vmatmul.msk.bf16.gmra.mxu0 %vm424_vm1, %v5750_v43  ;;  %v2946_v43 = vld [vmem:[%s8684_s6 + $0xb0] sm:$0xff] }
 0x283   :  { %3020 = vperm.xlu2 %5956, %v2938_v50   ;;  %3060 = vperm.xlu1 %5955, %v2946_v43   ;;  %v5752_v50 = vld [vmem:[%s8678_s0 + $0x148] sm:$0xff] }
 0x284   :  { %3055 = vperm.xlu0 %5954, %v2945_v17   ;;  %v2924_v17 = vld [vmem:[%s8684_s6] sm:$0xff] }
 0x287   :  { %v6477_v23 = vpop.f32.mrf.mxu0 }
 0x288   :  { %8721 = vst [vmem:[#allocation29_spill] sm:$0xff] %v6477_v23 }
 0x28b   :  { %3035 = vperm.xlu2 %5956, %v2941_v42   ;;  %v6513_v42 = vpop.permute.xlu0 %1026 }
 0x28f   :  { %v6491_v20 = vpop.f32.mrf.mxu0 }
 0x290   :  { %8722 = vst [vmem:[#allocation30_spill] sm:$0xff] %v6491_v20 }
 0x292   :  { %4871 = vmatmul.msk.bf16.gmra.mxu0 %vm424_vm1, %v5751_v40  ;;  %v6509_v40 = vpop.permute.xlu1 %1031 }
 0x293   :  { %2950 = vperm.xlu2 %5956, %v2924_v17  }
 0x297   :  { %v6497_v39 = vpop.f32.mrf.mxu0 }
 0x298   :  { %8723 = vst [vmem:[#allocation31_spill] sm:$0xff] %v6497_v39  ;;  %v6528_v39 = vpop.permute.xlu0 %1046 }
 0x29b   :  { %2990 = vperm.xlu2 %5956, %v2932_v12   ;;  %v2947_v12 = vld [vmem:[%s8684_s6 + $0xb8] sm:$0x1] }
 0x29f   :  { %v6507_v43 = vpop.f32.mrf.mxu0 }
 0x2a0   :  { %8724 = vst [vmem:[#allocation32_spill] sm:$0xff] %v6507_v43  ;;  %v6524_v43 = vpop.permute.xlu1 %1036  ;;  %v6543_v20 = vpop.permute.xlu0 %1061 }
 0x2a1   :  { %8728 = vst [vmem:[#allocation36_spill] sm:$0xff] %v6543_v20  ;;  %v6572_v20 = vpop.permute.xlu2 %1101 }
 0x2a2   :  { %4872 = vmatmul.msk.bf16.gmra.mxu0 %vm424_vm1, %v5752_v50  ;;  %v5753_v50 = vld [vmem:[%s8678_s0 + $0x150] sm:$0xff]  ;;  %8738 = vst [vmem:[#allocation46_spill] sm:$0xff] %v6572_v20 }
 0x2a3   :  { %3050 = vperm.xlu2 %5956, %v2944_v36  }
 0x2a7   :  { %v6519_v17 = vpop.f32.mrf.mxu0 }
 0x2a8   :  { %8725 = vst [vmem:[#allocation33_spill] sm:$0xff] %v6519_v17  ;;  %v6539_v17 = vpop.permute.xlu1 %1051  ;;  %v6556_v23 = vpop.permute.xlu0 %1076 }
 0x2a9   :  { %8733 = vst [vmem:[#allocation41_spill] sm:$0xff] %v6556_v23 }
 0x2ab   :  { %3065 = vperm.xlu2 %5956, %v2947_v12  }
 0x2af   :  { %v6533_v34 = vpop.f32.mrf.mxu0 }
 0x2b0   :  { %8726 = vst [vmem:[#allocation34_spill] sm:$0xff] %v6533_v34  ;;  %v6547_v33 = vpop.permute.xlu1 %1066 }
 0x2b1   :  { %8730 = vst [vmem:[#allocation38_spill] sm:$0xff] %v6547_v33  ;;  %v839_v33 = vpop.f32.mrf.mxu1 }
 0x2b2   :  { %4873 = vmatmul.msk.bf16.gmra.mxu0 %vm424_vm1, %v5753_v50  ;;  %v5754_v50 = vld [vmem:[%s8678_s0 + $0x158] sm:$0xff] }
 0x2b7   :  { %v6545_v36 = vpop.f32.mrf.mxu0 }
 0x2b8   :  { %8729 = vst [vmem:[#allocation37_spill] sm:$0xff] %v6545_v36  ;;  %v6563_v6 = vpop.permute.xlu1 %1081  ;;  %v6565_v36 = vpop.permute.xlu0 %1091 }
 0x2b9   :  { %8736 = vst [vmem:[#allocation44_spill] sm:$0xff] %v6563_v6  ;;  %v841_v6 = vpop.f32.mrf.mxu1 }
 0x2ba   :  { %8737 = vst [vmem:[#allocation45_spill] sm:$0xff] %v6565_v36  ;;  %v6582_v36 = vld [vmem:[%s8680_s2] ss:$0 sm:$0xff]  ;;  %s4606_s2 = sshll.u32 %s8689_s11, 4  ;;  %s4607_s2 = int_to_ptr.hbm [resolvable:$true] %s4606_s2 }
 0x2bf   :  { %v6554_v34 = vpop.f32.mrf.mxu0 }
 0x2c0   :  { %8732 = vst [vmem:[#allocation40_spill] sm:$0xff] %v6554_v34  ;;  %v874_v34 = vmax.f32 %v6174_v45, %v6278_v32  ;;  %v6577_v31 = vpop.permute.xlu0 %1106 }
 0x2c1   :  { %8740 = vst [vmem:[#allocation48_spill] sm:$0xff] %v6577_v31 }
 0x2c2   :  { %4874 = vmatmul.msk.bf16.gmra.mxu0 %vm424_vm1, %v5754_v50 }
 0x2c7   :  { %v6559_v12 = vpop.f32.mrf.mxu0 }
 0x2c8   :  { %8734 = vst [vmem:[#allocation42_spill] sm:$0xff] %v6559_v12  ;;  %v6575_v12 = vpop.permute.xlu1 %1096  ;;  %v1122_v20 = vpop.permute.xlu0 %1121 }
 0x2c9   :  { %8739 = vst [vmem:[#allocation47_spill] sm:$0xff] %v6575_v12 }
 0x2cf   :  { %v774_v4 = vpop.f32.mrf.mxu0 }
 0x2d0   :  { %v900_v23 = vmax.f32 %v774_v4, %v839_v33  ;;  %v875_v33 = vmax.f32 %v6177_v46, %v6281_v35  ;;  %v6588_v31 = vpop.permute.xlu1 %1111  ;;  %v876_v46 = vmax.f32 %v6182_v48, %v6286_v41 }
 0x2d1   :  { %8741 = vst [vmem:[#allocation49_spill] sm:$0xff] %v6588_v31 }
 0x2d2   :  { %v926_v50 = vmax.f32 %v874_v34, %v900_v23  ;;  %4875 = vmatmul.msk.bf16.gmra.mxu0 %vm424_vm1, %v5755_v8  ;;  %v1117_v8 = vpop.permute.xlu2 %1116 }
 0x2d4   :  { %v956_v45 = vadd.f32 %v6582_v36, %v926_v50  ;;  %v846_v50 = vpop.f32.mrf.mxu2 }
 0x2d6   :  { %v982_v4 = vmax.f32 %v956_v45, 0.0 }
 0x2d7   :  { %v776_v30 = vpop.f32.mrf.mxu0 }
 0x2d8   :  { %v901_v34 = vmax.f32 %v776_v30, %v841_v6  ;;  %v6595_v35 = vmul.f32 %v1117_v8, %v982_v4 }
 0x2da   :  { %v927_v32 = vmax.f32 %v875_v33, %v901_v34 }
 0x2dc   :  { %v957_v23 = vadd.f32 %v6582_v36, %v927_v32 }
 0x2de   :  { %v983_v12 = vmax.f32 %v957_v23, 0.0 }
 0x2df   :  { %v779_v9 = vpop.f32.mrf.mxu0 }
 0x2e0   :  { %v1165_v30 = vmul.f32 %v1122_v20, %v983_v12  ;;  %v902_v6 = vmax.f32 %v779_v9, %v844_v5  ;;  %v1127_v9 = vpop.permute.xlu1 %1126  ;;  %v877_v20 = vmax.f32 %v6185_v49, %v6295_v53  ;;  %v878_v49 = vmax.f32 %v6190_v51, %v6306_v1 }
 0x2e2   :  { %v6598_v33 = vpack.c.bf16 %v1165_v30, %v6595_v35  ;;  %v928_v45 = vmax.f32 %v876_v46, %v902_v6  ;;  %4876 = vmatmul.msk.bf16.gmra.mxu0 %vm424_vm1, %v5756_v29  ;;  %v849_v6 = vpop.f32.mrf.mxu2 }
 0x2e4   :  { %8742 = vst [vmem:[#allocation50_spill] sm:$0xff] %v6598_v33  ;;  %v958_v34 = vadd.f32 %v6582_v36, %v928_v45  ;;  %v8691_v32 = vshll.u32 %v6598_v33, 16  ;;  %v8690_v23 = vshrl.u32 %v6598_v33, 16 }
 0x2e6   :  { %v984_v31 = vmax.f32 %v958_v34, 0.0  ;;  %v1921_v48 = vrot.slane %v8690_v23, 1  ;;  %v1922_v5 = vrot.slane %v8691_v32, 2  ;;  %v5757_v23 = vld [vmem:[%s8678_s0 + $0x170] sm:$0xff]  ;;  %v1132_v32 = vpop.permute.xlu2 %1131 }
 0x2e7   :  { %v781_v41 = vpop.f32.mrf.mxu0 }
 0x2e8   :  { %v903_v12 = vmax.f32 %v781_v41, %v846_v50  ;;  %v1166_v29 = vmul.f32 %v1127_v9, %v984_v31  ;;  %v6610_v8 = vor.u32 %v1922_v5, %v1921_v48 }
 0x2ea   :  { %v929_v4 = vmax.f32 %v877_v20, %v903_v12  ;;  %v6612_v46 = vpack.c.bf16 %v1166_v29, %v1165_v30  ;;  %v851_v41 = vpop.f32.mrf.mxu2 }
 0x2ec   :  { %v959_v45 = vadd.f32 %v6582_v36, %v929_v4  ;;  %v1532_v20 = vshll.u32 %v6612_v46, 16 }
 0x2ee   :  { %v985_v34 = vmax.f32 %v959_v45, 0.0  ;;  %v5772_v45 = vld [vmem:[%s8682_s4 + $0x38] sm:$0xff] }
 0x2ef   :  { %v784_v33 = vpop.f32.mrf.mxu0  ;;  %1359 = vmatpush.bf16.msrb.mxu1 %v5772_v45  ;;  %v1142_v45 = vpop.permute.xlu1 %1141 }
 0x2f0   :  { %v1167_v53 = vmul.f32 %v1132_v32, %v985_v34  ;;  %v904_v31 = vmax.f32 %v784_v33, %v849_v6  ;;  %v1137_v33 = vpop.permute.xlu0 %1136  ;;  %v6637_v34 = vrot.slane %v1532_v20, 1 }
 0x2f2   :  { %v6620_v50 = vpack.c.bf16 %v1167_v53, %v1166_v29  ;;  %v930_v48 = vmax.f32 %v878_v49, %v904_v31  ;;  %4877 = vmatmul.msk.bf16.gmra.mxu0 %vm424_vm1, %v5757_v23  ;;  %v1536_v23 = vshrl.u32 %v6612_v46, 16  ;;  %v879_v29 = vmax.f32 %v6193_v52, %v6315_v10  ;;  %v5771_v10 = vld [vmem:[%s8682_s4 + $0x30] sm:$0xff] }
 0x2f3   :  { %1360 = vmatpush.bf16.msrb.mxu1 %v5771_v10 }
 0x2f4   :  { %v960_v30 = vadd.f32 %v6582_v36, %v930_v48  ;;  %v8695_v5 = vshll.u32 %v6620_v50, 16  ;;  %v8694_v9 = vshrl.u32 %v6620_v50, 16 }
 0x2f6   :  { %v986_v12 = vmax.f32 %v960_v30, 0.0  ;;  %v1925_v51 = vrot.slane %v8694_v9, 1  ;;  %v1926_v1 = vrot.slane %v8695_v5, 2  ;;  %v1732_v30 = vrot.slane %v1536_v23, 1 }
 0x2f7   :  { %v786_v32 = vpop.f32.mrf.mxu0  ;;  %v1733_v9 = vrot.slane %v1532_v20, 2  ;;  %v8697_v20 = vrot.slane %v6612_v46, 1 }
 0x2f8   :  { %v1168_v4 = vmul.f32 %v1137_v33, %v986_v12  ;;  %v905_v6 = vmax.f32 %v786_v32, %v851_v41  ;;  %v1927_v49 = vor.u32 %v1926_v1, %v1925_v51  ;;  %v1538_v51 = vor.u32 %v1536_v23, %v6637_v34  ;;  %v5758_v33 = vld [vmem:[%s8678_s0 + $0x178] sm:$0xff] }
 0x2fa   :  { %v6639_v31 = vpack.c.bf16 %v1168_v4, %v1167_v53  ;;  %v931_v48 = vmax.f32 %v879_v29, %v905_v6  ;;  %v6643_v5 = vsel %vm1692_vm2, %v6610_v8, %v1927_v49  ;;  %v6661_v53 = vor.u32 %v1733_v9, %v1732_v30 }
 0x2fb   :  { %8744 = vst [vmem:[#allocation52_spill] sm:$0xff] %v6643_v5 }
 0x2fc   :  { %8743 = vst [vmem:[#allocation51_spill] sm:$0xff] %v6639_v31  ;;  %v961_v52 = vadd.f32 %v6582_v36, %v931_v48  ;;  %v1540_v41 = vshll.u32 %v6639_v31, 16  ;;  %v8696_v12 = vshrl.u32 %v6639_v31, 16  ;;  %v8745_v23 = vrot.slane %v6639_v31, 1 }
 0x2fe   :  { %v987_v1 = vmax.f32 %v961_v52, 0.0  ;;  %v6657_v32 = vrot.slane %v1540_v41, 1  ;;  %v1736_v29 = vrot.slane %v8696_v12, 1  ;;  %v1737_v6 = vrot.slane %v1540_v41, 2  ;;  %v5770_v12 = vld [vmem:[%s8682_s4 + $0x28] sm:$0xff]  ;;  %v5780_v41 = vld [vmem:[%s8682_s4 + $0x78] sm:$0xff] }
 0x2ff   :  { %v789_v48 = vpop.f32.mrf.mxu0  ;;  %v6668_v52 = vsel %vm2358_vm3, %v8697_v20, %v8745_v23  ;;  %v854_v23 = vmax.f32 %v6094_v15, %v6198_v54  ;;  %1361 = vmatpush.bf16.msrb.mxu1 %v5770_v12  ;;  %1611 = vmatpush.bf16.msrb.mxu2 %v5780_v41  ;;  %v5769_v15 = vld [vmem:[%s8682_s4 + $0x20] sm:$0xff]  ;;  %v5779_v54 = vld [vmem:[%s8682_s4 + $0x70] sm:$0xff] }
 0x300   :  { %8746 = vst [vmem:[#allocation53_spill] sm:$0xff] %v6668_v52  ;;  %v1169_v5 = vmul.f32 %v1142_v45, %v987_v1  ;;  %v880_v10 = vmax.f32 %v6329_v44, %v789_v48  ;;  %v6679_v9 = vsel %vm1198_vm4, %v1538_v51, %v6657_v32  ;;  %v6681_v30 = vor.u32 %v1737_v6, %v1736_v29  ;;  %v5788_v44 = vld [vmem:[%s8682_s4 + $0xb8] sm:$0xff]  ;;  %v5787_v12 = vld [vmem:[%s8682_s4 + $0xb0] sm:$0xff] }
 0x301   :  { %1804 = vmatpush.bf16.msra.mxu3 %v5788_v44  ;;  %v855_v48 = vmax.f32 %v6097_v16, %v6201_v55 }
 0x302   :  { %v6685_v1 = vpack.c.bf16 %v1169_v5, %v1168_v4  ;;  %4878 = vmatmul.msk.bf16.gmra.mxu0 %vm424_vm1, %v5758_v33  ;;  %v6694_v45 = vsel %vm1692_vm2, %v6661_v53, %v6681_v30  ;;  %v906_v51 = vmax.f32 %v854_v23, %v880_v10  ;;  %v5778_v23 = vld [vmem:[%s8682_s4 + $0x68] sm:$0xff] }
 0x303   :  { %1362 = vmatpush.bf16.msrb.mxu1 %v5769_v15  ;;  %1612 = vmatpush.bf16.msrb.mxu2 %v5779_v54 }
 0x304   :  { %v1930_v5 = vshrl.u32 %v6685_v1, 16  ;;  %v1933_v4 = vshll.u32 %v6685_v1, 16  ;;  %v936_v10 = vadd.f32 %v6582_v36, %v906_v51 }
 0x305   :  { %1805 = vmatpush.bf16.msra.mxu3 %v5787_v12  ;;  %v5785_v12 = vld [vmem:[%s8682_s4 + $0xa0] sm:$0xff] }
 0x306   :  { %v1932_v33 = vrot.slane %v1930_v5, 1  ;;  %v1935_v29 = vrot.slane %v1933_v4, 2  ;;  %v5786_v5 = vld [vmem:[%s8682_s4 + $0xa8] sm:$0xff]  ;;  %v962_v16 = vmax.f32 %v936_v10, 0.0  ;;  %v5759_v4 = vld [vmem:[%s8678_s0 + $0x180] sm:$0xff] }
 0x307   :  { %v791_v6 = vpop.f32.mrf.mxu0  ;;  %1613 = vmatpush.bf16.msrb.mxu2 %v5778_v23 }
 0x308   :  { %v881_v41 = vmax.f32 %v6345_v62, %v791_v6  ;;  %v6714_v44 = vor.u32 %v1935_v29, %v1932_v33  ;;  %v5777_v62 = vld [vmem:[%s8682_s4 + $0x60] sm:$0xff]  ;;  %v856_v33 = vmax.f32 %v6102_v18, %v6206_v57  ;;  %v1144_v29 = vmul.f32 %v6511_v37, %v962_v16 }
 0x309   :  { %1806 = vmatpush.bf16.msra.mxu3 %v5786_v5 }
 0x30a   :  { %v907_v15 = vmax.f32 %v855_v48, %v881_v41  ;;  %v6721_v54 = vsel %vm1692_vm2, %v1927_v49, %v6714_v44 }
 0x30b   :  { %1614 = vmatpush.bf16.msrb.mxu2 %v5777_v62 }
 0x30c   :  { %v937_v55 = vadd.f32 %v6582_v36, %v907_v15 }
 0x30d   :  { %1807 = vmatpush.bf16.msra.mxu3 %v5785_v12 }
 0x30e   :  { %v963_v51 = vmax.f32 %v937_v55, 0.0  ;;  %v857_v55 = vmax.f32 %v6105_v19, %v6209_v58 }
 0x30f   :  { %v794_v49 = vpop.f32.mrf.mxu0 }
 0x310   :  { %v1145_v6 = vmul.f32 %v6499_v14, %v963_v51  ;;  %v882_v48 = vmax.f32 %v6363_v38, %v794_v49 }
 0x312   :  { %v6738_v10 = vpack.c.bf16 %v1145_v6, %v1144_v29  ;;  %v908_v41 = vmax.f32 %v856_v33, %v882_v48  ;;  %4879 = vmatmul.msk.bf16.gmra.mxu0 %vm424_vm1, %v5759_v4  ;;  %v858_v4 = vmax.f32 %v6110_v21, %v6214_v60 }
 0x314   :  { %v938_v23 = vadd.f32 %v6582_v36, %v908_v41  ;;  %v1202_v16 = vshll.u32 %v6738_v10, 16 }
 0x316   :  { %v964_v15 = vmax.f32 %v938_v23, 0.0  ;;  %v1204_v19 = vrot.slane %v1202_v16, 1 }
 0x317   :  { %v796_v5 = vpop.f32.mrf.mxu0 }
 0x318   :  { %v1146_v18 = vmul.f32 %v6513_v42, %v964_v15  ;;  %v883_v37 = vmax.f32 %v6375_v59, %v796_v5  ;;  %v1200_v59 = vshrl.u32 %v6738_v10, 16  ;;  %v859_v5 = vmax.f32 %v6113_v22, %v6217_v61 }
 0x31a   :  { %v1432_v57 = vpack.c.bf16 %v1146_v18, %v1145_v6  ;;  %v909_v14 = vmax.f32 %v857_v55, %v883_v37  ;;  %v1205_v48 = vor.u32 %v1204_v19, %v1200_v59 }
 0x31c   :  { %v939_v38 = vadd.f32 %v6582_v36, %v909_v14  ;;  %v1455_v41 = vshll.u32 %v1432_v57, 16  ;;  %v1453_v15 = vshrl.u32 %v1432_v57, 16 }
 0x31e   :  { %v965_v62 = vmax.f32 %v939_v38, 0.0  ;;  %v1457_v14 = vrot.slane %v1455_v41, 1 }
 0x31f   :  { %v799_v51 = vpop.f32.mrf.mxu0 }
 0x320   :  { %v1147_v12 = vmul.f32 %v6509_v40, %v965_v62  ;;  %v884_v49 = vmax.f32 %v6393_v47, %v799_v51  ;;  %v1693_v51 = vrot.slane %v1453_v15, 1 }
 0x322   :  { %v6752_v58 = vpack.c.bf16 %v1147_v12, %v1146_v18  ;;  %v910_v42 = vmax.f32 %v858_v4, %v884_v49  ;;  %v1694_v4 = vrot.slane %v1455_v41, 2 }
 0x324   :  { %v940_v33 = vadd.f32 %v6582_v36, %v910_v42  ;;  %v1207_v29 = vshll.u32 %v6752_v58, 16  ;;  %v1211_v6 = vshrl.u32 %v6752_v58, 16 }
 0x326   :  { %v966_v21 = vmax.f32 %v940_v33, 0.0  ;;  %v1209_v60 = vrot.slane %v1207_v29, 1  ;;  %v1887_v40 = vrot.slane %v1207_v29, 2  ;;  %v1886_v23 = vrot.slane %v1211_v6, 1 }
 0x327   :  { %v801_v47 = vpop.f32.mrf.mxu0 }
 0x328   :  { %v1148_v55 = vmul.f32 %v6524_v43, %v966_v21  ;;  %v885_v18 = vmax.f32 %v6405_v7, %v801_v47  ;;  %v1210_v37 = vsel %vm1198_vm4, %v1205_v48, %v1209_v60  ;;  %v1888_v38 = vor.u32 %v1887_v40, %v1886_v23 }
 0x329   :  { %4899 = vmatmul.msk.bf16.vlgmr.msrb.gmra.mxu1 %vm1318_vm5, %v1210_v37  ;;  %v1458_v7 = vor.u32 %v1457_v14, %v1453_v15  ;;  %v2547_v43 = vrot.slane %v1432_v57, 1  ;;  %v1695_v21 = vor.u32 %v1694_v4, %v1693_v51  ;;  %v1213_v37 = vor.u32 %v1211_v6, %v1209_v60  ;;  %v5800_v6 = vld [vmem:[%s8682_s4 + $0x118] sm:$0xff] }
 0x32a   :  { %v6764_v16 = vpack.c.bf16 %v1148_v55, %v1147_v12  ;;  %v911_v62 = vmax.f32 %v859_v5, %v885_v18  ;;  %v860_v12 = vmax.f32 %v6118_v24, %v6222_v63  ;;  %v5768_v60 = vld [vmem:[%s8682_s4 + $0x18] sm:$0xff]  ;;  %2175 = vmatpush.bf16.msra.mxu2 %v5800_v6 }
 0x32b   :  { %2292 = vmatpush.bf16.msrb.mxu3 %v5768_v60 }
 0x32c   :  { %v941_v49 = vadd.f32 %v6582_v36, %v911_v62  ;;  %v1460_v19 = vshll.u32 %v6764_v16, 16  ;;  %v1464_v22 = vshrl.u32 %v6764_v16, 16  ;;  %v2548_v61 = vrot.slane %v6764_v16, 1 }
 0x32e   :  { %v967_v42 = vmax.f32 %v941_v49, 0.0  ;;  %v1462_v59 = vrot.slane %v1460_v19, 1  ;;  %v1696_v33 = vrot.slane %v1464_v22, 1  ;;  %v1697_v29 = vrot.slane %v1460_v19, 2 }
 0x32f   :  { %v804_v48 = vpop.f32.mrf.mxu0  ;;  %v6773_v41 = vsel %vm2358_vm3, %v2547_v43, %v2548_v61 }
 0x330   :  { %v1149_v40 = vmul.f32 %v6526_v11, %v967_v42  ;;  %v886_v23 = vmax.f32 %v6419_v56, %v804_v48  ;;  %v1463_v47 = vsel %vm1198_vm4, %v1458_v7, %v1462_v59  ;;  %v1698_v15 = vor.u32 %v1697_v29, %v1696_v33 }
 0x331   :  { %4927 = vmatmul.msk.bf16.vlgmr.msrb.gmra.mxu2 %vm1318_vm5, %v1463_v47  ;;  %v862_v47 = vmax.f32 %v6126_v27, %v6230_v2 }
 0x332   :  { %v6779_v57 = vpack.c.bf16 %v1149_v40, %v1148_v55  ;;  %v912_v5 = vmax.f32 %v860_v12, %v886_v23  ;;  %v1699_v18 = vsel %vm1692_vm2, %v1695_v21, %v1698_v15  ;;  %v861_v55 = vmax.f32 %v6121_v25, %v6225_v0  ;;  %v5796_v25 = vld [vmem:[%s8682_s4 + $0xf8] sm:$0xff] }
 0x333   :  { %4955 = vmatmul.msk.bf16.vlgmr.msra.gmra.mxu3 %vm1318_vm5, %v1699_v18  ;;  %v1466_v12 = vor.u32 %v1464_v22, %v1462_v59  ;;  %2002 = vmatpush.bf16.msra.mxu1 %v5796_v25 }
 0x334   :  { %v942_v24 = vadd.f32 %v6582_v36, %v912_v5  ;;  %v1215_v63 = vshll.u32 %v6779_v57, 16  ;;  %v1219_v11 = vshrl.u32 %v6779_v57, 16 }
 0x336   :  { %v968_v56 = vmax.f32 %v942_v24, 0.0  ;;  %v1217_v14 = vrot.slane %v1215_v63, 1  ;;  %v1890_v16 = vrot.slane %v1215_v63, 2  ;;  %v1889_v62 = vrot.slane %v1219_v11, 1 }
 0x337   :  { %v806_v51 = vpop.f32.mrf.mxu0 }
 0x338   :  { %v1150_v4 = vmul.f32 %v6528_v39, %v968_v56  ;;  %v887_v49 = vmax.f32 %v6428_v13, %v806_v51  ;;  %v1218_v19 = vsel %vm1198_vm4, %v1213_v37, %v1217_v14  ;;  %v1891_v7 = vor.u32 %v1890_v16, %v1889_v62 }
 0x339   :  { %4900 = vmatmul.msk.bf16.gmra.mxu1 %vm1318_vm5, %v1218_v19 }
 0x33a   :  { %v1434_v43 = vpack.c.bf16 %v1150_v4, %v1149_v40  ;;  %v913_v42 = vmax.f32 %v861_v55, %v887_v49  ;;  %v6802_v39 = vsel %vm1692_vm2, %v1888_v38, %v1891_v7  ;;  %v8747_v49 = vld [vmem:[#allocation35_spill] sm:$0xff] }
 0x33c   :  { %v943_v0 = vadd.f32 %v6582_v36, %v913_v42  ;;  %v1468_v13 = vshll.u32 %v1434_v43, 16  ;;  %v1472_v33 = vshrl.u32 %v1434_v43, 16  ;;  %v2550_v29 = vrot.slane %v1434_v43, 1 }
 0x33e   :  { %v969_v48 = vmax.f32 %v943_v0, 0.0  ;;  %v1470_v21 = vrot.slane %v1468_v13, 1  ;;  %v1700_v40 = vrot.slane %v1472_v33, 1  ;;  %v1701_v23 = vrot.slane %v1468_v13, 2 }
 0x33f   :  { %v809_v5 = vpop.f32.mrf.mxu0  ;;  %v6808_v38 = vsel %vm2358_vm3, %v2548_v61, %v2550_v29  ;;  %v1221_v61 = vor.u32 %v1219_v11, %v1217_v14 }
 0x340   :  { %v1151_v18 = vmul.f32 %v6539_v17, %v969_v48  ;;  %v888_v24 = vmax.f32 %v6439_v26, %v809_v5  ;;  %v1471_v63 = vsel %vm1198_vm4, %v1466_v12, %v1470_v21  ;;  %v1702_v37 = vor.u32 %v1701_v23, %v1700_v40  ;;  %v8750_v5 = vld [vmem:[#allocation7_spill] sm:$0xff] }
 0x341   :  { %4928 = vmatmul.msk.bf16.gmra.mxu2 %vm1318_vm5, %v1471_v63 }
 0x342   :  { %v6814_v22 = vpack.c.bf16 %v1151_v18, %v1150_v4  ;;  %v914_v59 = vmax.f32 %v862_v47, %v888_v24  ;;  %v1703_v56 = vsel %vm1692_vm2, %v1698_v15, %v1702_v37  ;;  %v863_v4 = vmax.f32 %v6129_v28, %v6233_v3  ;;  %v8748_v15 = vld [vmem:[#allocation27_spill] sm:$0xff]  ;;  %v8749_v47 = vld [vmem:[#allocation17_spill] sm:$0xff] }
 0x343   :  { %4956 = vmatmul.msk.bf16.gmra.mxu3 %vm1318_vm5, %v1703_v56  ;;  %v1474_v28 = vor.u32 %v1472_v33, %v1470_v21  ;;  %v864_v24 = vmax.f32 %v8750_v5, %v8749_v47  ;;  %v8752_v56 = vld [vmem:[#allocation28_spill] sm:$0xff] }
 0x344   :  { %v944_v27 = vadd.f32 %v6582_v36, %v914_v59  ;;  %v1223_v2 = vshll.u32 %v6814_v22, 16  ;;  %v1227_v17 = vshrl.u32 %v6814_v22, 16  ;;  %v8751_v59 = vld [vmem:[#allocation36_spill] sm:$0xff] }
 0x346   :  { %v970_v26 = vmax.f32 %v944_v27, 0.0  ;;  %v1225_v16 = vrot.slane %v1223_v2, 1  ;;  %v1893_v62 = vrot.slane %v1227_v17, 1  ;;  %v1894_v51 = vrot.slane %v1223_v2, 2 }
 0x347   :  { %v811_v55 = vpop.f32.mrf.mxu0 }
 0x348   :  { %v1152_v19 = vmul.f32 %v8747_v49, %v970_v26  ;;  %v889_v43 = vmax.f32 %v8748_v15, %v811_v55  ;;  %v1226_v42 = vsel %vm1198_vm4, %v1221_v61, %v1225_v16  ;;  %v1895_v6 = vor.u32 %v1894_v51, %v1893_v62 }
 0x349   :  { %4901 = vmatmul.msk.bf16.gmra.mxu1 %vm1318_vm5, %v1226_v42  ;;  %v1229_v55 = vor.u32 %v1227_v17, %v1225_v16 }
 0x34a   :  { %v1435_v60 = vpack.c.bf16 %v1152_v19, %v1151_v18  ;;  %v915_v25 = vmax.f32 %v863_v4, %v889_v43  ;;  %v6828_v11 = vsel %vm1692_vm2, %v1891_v7, %v1895_v6 }
 0x34c   :  { %v945_v14 = vadd.f32 %v6582_v36, %v915_v25  ;;  %v1476_v0 = vshll.u32 %v1435_v60, 16  ;;  %v1480_v13 = vshrl.u32 %v1435_v60, 16  ;;  %v2552_v12 = vrot.slane %v1435_v60, 1  ;;  %v8753_v60 = vld [vmem:[#allocation18_spill] sm:$0xff] }
 0x34e   :  { %v971_v3 = vmax.f32 %v945_v14, 0.0  ;;  %v1478_v48 = vrot.slane %v1476_v0, 1  ;;  %v1704_v40 = vrot.slane %v1480_v13, 1  ;;  %v1705_v23 = vrot.slane %v1476_v0, 2  ;;  %v8755_v14 = vld [vmem:[#allocation38_spill] sm:$0xff] }
 0x34f   :  { %v814_v63 = vpop.f32.mrf.mxu0  ;;  %v6834_v18 = vsel %vm2358_vm3, %v2550_v29, %v2552_v12 }
 0x350   :  { %v1153_v7 = vmul.f32 %v8751_v59, %v971_v3  ;;  %v890_v27 = vmax.f32 %v8752_v56, %v814_v63  ;;  %v1479_v2 = vsel %vm1198_vm4, %v1474_v28, %v1478_v48  ;;  %v1706_v61 = vor.u32 %v1705_v23, %v1704_v40 }
 0x351   :  { %4929 = vmatmul.msk.bf16.gmra.mxu2 %vm1318_vm5, %v1479_v2  ;;  %v1482_v59 = vor.u32 %v1480_v13, %v1478_v48 }
 0x352   :  { %v6840_v33 = vpack.c.bf16 %v1153_v7, %v1152_v19  ;;  %v916_v21 = vmax.f32 %v864_v24, %v890_v27  ;;  %v1707_v26 = vsel %vm1692_vm2, %v1702_v37, %v1706_v61  ;;  %v8754_v19 = vld [vmem:[#allocation8_spill] sm:$0xff]  ;;  %v8756_v37 = vld [vmem:[#allocation29_spill] sm:$0xff] }
 0x353   :  { %4957 = vmatmul.msk.bf16.gmra.mxu3 %vm1318_vm5, %v1707_v26  ;;  %v865_v25 = vmax.f32 %v8754_v19, %v8753_v60  ;;  %v8757_v26 = vld [vmem:[#allocation19_spill] sm:$0xff] }
 0x354   :  { %v946_v62 = vadd.f32 %v6582_v36, %v916_v21  ;;  %v1231_v29 = vshll.u32 %v6840_v33, 16  ;;  %v1235_v51 = vshrl.u32 %v6840_v33, 16 }
 0x356   :  { %v972_v4 = vmax.f32 %v946_v62, 0.0  ;;  %v1233_v49 = vrot.slane %v1231_v29, 1  ;;  %v1897_v15 = vrot.slane %v1235_v51, 1  ;;  %v1898_v43 = vrot.slane %v1231_v29, 2  ;;  %v8758_v62 = vld [vmem:[#allocation9_spill] sm:$0xff] }
 0x357   :  { %v816_v42 = vpop.f32.mrf.mxu0  ;;  %v866_v29 = vmax.f32 %v8758_v62, %v8757_v26 }
 0x358   :  { %v1154_v0 = vmul.f32 %v8755_v14, %v972_v4  ;;  %v891_v28 = vmax.f32 %v8756_v37, %v816_v42  ;;  %v1234_v3 = vsel %vm1198_vm4, %v1229_v55, %v1233_v49  ;;  %v1899_v40 = vor.u32 %v1898_v43, %v1897_v15  ;;  %v8759_v4 = vld [vmem:[#allocation39_spill] sm:$0xff]  ;;  %v8760_v15 = vld [vmem:[#allocation30_spill] sm:$0xff] }
 0x359   :  { %4902 = vmatmul.msk.bf16.gmra.mxu1 %vm1318_vm5, %v1234_v3  ;;  %v1237_v37 = vor.u32 %v1235_v51, %v1233_v49  ;;  %v5799_v51 = vld [vmem:[%s8682_s4 + $0x110] sm:$0xff] }
 0x35a   :  { %v1436_v23 = vpack.c.bf16 %v1154_v0, %v1153_v7  ;;  %v917_v47 = vmax.f32 %v865_v25, %v891_v28  ;;  %v6854_v17 = vsel %vm1692_vm2, %v1895_v6, %v1899_v40  ;;  %v5767_v49 = vld [vmem:[%s8682_s4 + $0x10] sm:$0xff]  ;;  %2176 = vmatpush.bf16.msra.mxu2 %v5799_v51 }
 0x35b   :  { %2293 = vmatpush.bf16.msrb.mxu3 %v5767_v49 }
 0x35c   :  { %v947_v16 = vadd.f32 %v6582_v36, %v917_v47  ;;  %v1484_v5 = vshll.u32 %v1436_v23, 16  ;;  %v1488_v24 = vshrl.u32 %v1436_v23, 16  ;;  %v2554_v63 = vrot.slane %v1436_v23, 1 }
 0x35e   :  { %v973_v56 = vmax.f32 %v947_v16, 0.0  ;;  %v1486_v27 = vrot.slane %v1484_v5, 1  ;;  %v1708_v2 = vrot.slane %v1488_v24, 1  ;;  %v1709_v21 = vrot.slane %v1484_v5, 2  ;;  %v8761_v5 = vld [vmem:[#allocation20_spill] sm:$0xff] }
 0x35f   :  { %v819_v55 = vpop.f32.mrf.mxu0  ;;  %v6860_v7 = vsel %vm2358_vm3, %v2552_v12, %v2554_v63 }
 0x360   :  { %v1155_v6 = vmul.f32 %v8759_v4, %v973_v56  ;;  %v892_v43 = vmax.f32 %v8760_v15, %v819_v55  ;;  %v1487_v42 = vsel %vm1198_vm4, %v1482_v59, %v1486_v27  ;;  %v1710_v60 = vor.u32 %v1709_v21, %v1708_v2  ;;  %v8763_v56 = vld [vmem:[#allocation41_spill] sm:$0xff]  ;;  %v5795_v4 = vld [vmem:[%s8682_s4 + $0xf0] sm:$0xff] }
 0x361   :  { %4930 = vmatmul.msk.bf16.gmra.mxu2 %vm1318_vm5, %v1487_v42  ;;  %2003 = vmatpush.bf16.msra.mxu1 %v5795_v4 }
 0x362   :  { %v6866_v13 = vpack.c.bf16 %v1155_v6, %v1154_v0  ;;  %v918_v48 = vmax.f32 %v866_v29, %v892_v43  ;;  %v1711_v19 = vsel %vm1692_vm2, %v1706_v61, %v1710_v60  ;;  %v8762_v0 = vld [vmem:[#allocation10_spill] sm:$0xff]  ;;  %v8764_v61 = vld [vmem:[#allocation31_spill] sm:$0xff] }
 0x363   :  { %4958 = vmatmul.msk.bf16.gmra.mxu3 %vm1318_vm5, %v1711_v19  ;;  %v867_v59 = vmax.f32 %v8762_v0, %v8761_v5  ;;  %v1490_v19 = vor.u32 %v1488_v24, %v1486_v27  ;;  %v8767_v0 = vld [vmem:[#allocation44_spill] sm:$0xff] }
 0x364   :  { %v948_v25 = vadd.f32 %v6582_v36, %v918_v48  ;;  %v1239_v12 = vshll.u32 %v6866_v13, 16  ;;  %v1243_v14 = vshrl.u32 %v6866_v13, 16 }
 0x366   :  { %v974_v28 = vmax.f32 %v948_v25, 0.0  ;;  %v1241_v3 = vrot.slane %v1239_v12, 1  ;;  %v1901_v23 = vrot.slane %v1243_v14, 1  ;;  %v1902_v47 = vrot.slane %v1239_v12, 2 }
 0x367   :  { %v821_v16 = vpop.f32.mrf.mxu0 }
 0x368   :  { %v1156_v2 = vmul.f32 %v8763_v56, %v974_v28  ;;  %v893_v21 = vmax.f32 %v8764_v61, %v821_v16  ;;  %v1242_v26 = vsel %vm1198_vm4, %v1237_v37, %v1241_v3  ;;  %v1903_v62 = vor.u32 %v1902_v47, %v1901_v23  ;;  %v8765_v23 = vld [vmem:[#allocation21_spill] sm:$0xff]  ;;  %v8766_v47 = vld [vmem:[#allocation11_spill] sm:$0xff]  ;;  %v8768_v56 = vld [vmem:[#allocation32_spill] sm:$0xff] }
 0x369   :  { %4903 = vmatmul.msk.bf16.gmra.mxu1 %vm1318_vm5, %v1242_v26  ;;  %v868_v16 = vmax.f32 %v8766_v47, %v8765_v23  ;;  %v1245_v49 = vor.u32 %v1243_v14, %v1241_v3  ;;  %v8771_v23 = vld [vmem:[#allocation43_spill] sm:$0xff] }
 0x36a   :  { %v1437_v29 = vpack.c.bf16 %v1156_v2, %v1155_v6  ;;  %v919_v55 = vmax.f32 %v867_v59, %v893_v21  ;;  %v6889_v15 = vsel %vm1692_vm2, %v1899_v40, %v1903_v62 }
 0x36c   :  { %v949_v43 = vadd.f32 %v6582_v36, %v919_v55  ;;  %v1492_v42 = vshll.u32 %v1437_v29, 16  ;;  %v1496_v6 = vshrl.u32 %v1437_v29, 16  ;;  %v2556_v48 = vrot.slane %v1437_v29, 1 }
 0x36e   :  { %v975_v25 = vmax.f32 %v949_v43, 0.0  ;;  %v1494_v12 = vrot.slane %v1492_v42, 1  ;;  %v1712_v37 = vrot.slane %v1496_v6, 1  ;;  %v1713_v28 = vrot.slane %v1492_v42, 2 }
 0x36f   :  { %v824_v5 = vpop.f32.mrf.mxu0  ;;  %v6895_v40 = vsel %vm2358_vm3, %v2554_v63, %v2556_v48 }
 0x370   :  { %v1157_v59 = vmul.f32 %v8767_v0, %v975_v25  ;;  %v894_v61 = vmax.f32 %v8768_v56, %v824_v5  ;;  %v1495_v21 = vsel %vm1198_vm4, %v1490_v19, %v1494_v12  ;;  %v1714_v26 = vor.u32 %v1713_v28, %v1712_v37  ;;  %v8769_v37 = vld [vmem:[#allocation22_spill] sm:$0xff] }
 0x371   :  { %4931 = vmatmul.msk.bf16.gmra.mxu2 %vm1318_vm5, %v1495_v21 }
 0x372   :  { %v6901_v24 = vpack.c.bf16 %v1157_v59, %v1156_v2  ;;  %v920_v27 = vmax.f32 %v868_v16, %v894_v61  ;;  %v1715_v29 = vsel %vm1692_vm2, %v1710_v60, %v1714_v26  ;;  %v8770_v2 = vld [vmem:[#allocation12_spill] sm:$0xff]  ;;  %v8772_v60 = vld [vmem:[#allocation33_spill] sm:$0xff] }
 0x373   :  { %4959 = vmatmul.msk.bf16.gmra.mxu3 %vm1318_vm5, %v1715_v29  ;;  %v869_v28 = vmax.f32 %v8770_v2, %v8769_v37  ;;  %v8773_v2 = vld [vmem:[#allocation23_spill] sm:$0xff] }
 0x374   :  { %v950_v55 = vadd.f32 %v6582_v36, %v920_v27  ;;  %v1247_v63 = vshll.u32 %v6901_v24, 16  ;;  %v1251_v51 = vshrl.u32 %v6901_v24, 16 }
 0x376   :  { %v976_v4 = vmax.f32 %v950_v55, 0.0  ;;  %v1249_v43 = vrot.slane %v1247_v63, 1  ;;  %v1905_v42 = vrot.slane %v1251_v51, 1  ;;  %v1906_v19 = vrot.slane %v1247_v63, 2 }
 0x377   :  { %v826_v25 = vpop.f32.mrf.mxu0  ;;  %v1498_v55 = vor.u32 %v1496_v6, %v1494_v12 }
 0x378   :  { %v1158_v47 = vmul.f32 %v8771_v23, %v976_v4  ;;  %v895_v16 = vmax.f32 %v8772_v60, %v826_v25  ;;  %v1250_v5 = vsel %vm1198_vm4, %v1245_v49, %v1249_v43  ;;  %v1907_v0 = vor.u32 %v1906_v19, %v1905_v42  ;;  %v8774_v49 = vld [vmem:[#allocation13_spill] sm:$0xff]  ;;  %v8777_v19 = vld [vmem:[#allocation34_spill] sm:$0xff] }
 0x379   :  { %4904 = vmatmul.msk.bf16.gmra.mxu1 %vm1318_vm5, %v1250_v5  ;;  %v870_v23 = vmax.f32 %v8774_v49, %v8773_v2  ;;  %v8776_v42 = vld [vmem:[#allocation45_spill] sm:$0xff]  ;;  %v8778_v49 = vld [vmem:[#allocation24_spill] sm:$0xff] }
 0x37a   :  { %v1438_v56 = vpack.c.bf16 %v1158_v47, %v1157_v59  ;;  %v921_v61 = vmax.f32 %v869_v28, %v895_v16  ;;  %v6915_v14 = vsel %vm1692_vm2, %v1903_v62, %v1907_v0 }
 0x37c   :  { %v951_v3 = vadd.f32 %v6582_v36, %v921_v61  ;;  %v1500_v21 = vshll.u32 %v1438_v56, 16  ;;  %v1504_v27 = vshrl.u32 %v1438_v56, 16  ;;  %v2558_v29 = vrot.slane %v1438_v56, 1 }
 0x37e   :  { %v977_v63 = vmax.f32 %v951_v3, 0.0  ;;  %v1502_v4 = vrot.slane %v1500_v21, 1  ;;  %v1716_v37 = vrot.slane %v1504_v27, 1  ;;  %v1717_v25 = vrot.slane %v1500_v21, 2 }
 0x37f   :  { %v829_v60 = vpop.f32.mrf.mxu0  ;;  %v6921_v59 = vsel %vm2358_vm3, %v2556_v48, %v2558_v29  ;;  %v1253_v21 = vor.u32 %v1251_v51, %v1249_v43 }
 0x380   :  { %8775 = vst [vmem:[#allocation35_spill] sm:$0xff] %v6921_v59  ;;  %v1159_v62 = vmul.f32 %v8776_v42, %v977_v63  ;;  %v896_v28 = vmax.f32 %v8777_v19, %v829_v60  ;;  %v1503_v16 = vsel %vm1198_vm4, %v1498_v55, %v1502_v4  ;;  %v1718_v5 = vor.u32 %v1717_v25, %v1716_v37 }
 0x381   :  { %4932 = vmatmul.msk.bf16.gmra.mxu2 %vm1318_vm5, %v1503_v16 }
 0x382   :  { %v6927_v6 = vpack.c.bf16 %v1159_v62, %v1158_v47  ;;  %v922_v12 = vmax.f32 %v870_v23, %v896_v28  ;;  %v1719_v56 = vsel %vm1692_vm2, %v1714_v26, %v1718_v5  ;;  %v8779_v47 = vld [vmem:[#allocation14_spill] sm:$0xff]  ;;  %v8780_v23 = vld [vmem:[#allocation47_spill] sm:$0xff]  ;;  %v8781_v26 = vld [vmem:[#allocation37_spill] sm:$0xff] }
 0x383   :  { %4960 = vmatmul.msk.bf16.gmra.mxu3 %vm1318_vm5, %v1719_v56  ;;  %v871_v60 = vmax.f32 %v8779_v47, %v8778_v49  ;;  %v1506_v49 = vor.u32 %v1504_v27, %v1502_v4  ;;  %v8785_v27 = vld [vmem:[#allocation46_spill] sm:$0xff] }
 0x384   :  { %v952_v61 = vadd.f32 %v6582_v36, %v922_v12  ;;  %v1255_v48 = vshll.u32 %v6927_v6, 16  ;;  %v1259_v3 = vshrl.u32 %v6927_v6, 16 }
 0x386   :  { %v978_v63 = vmax.f32 %v952_v61, 0.0  ;;  %v1257_v2 = vrot.slane %v1255_v48, 1  ;;  %v1909_v55 = vrot.slane %v1259_v3, 1  ;;  %v1910_v37 = vrot.slane %v1255_v48, 2 }
 0x387   :  { %v831_v25 = vpop.f32.mrf.mxu0 }
 0x388   :  { %v1160_v42 = vmul.f32 %v8780_v23, %v978_v63  ;;  %v897_v19 = vmax.f32 %v8781_v26, %v831_v25  ;;  %v1258_v28 = vsel %vm1198_vm4, %v1253_v21, %v1257_v2  ;;  %v1911_v16 = vor.u32 %v1910_v37, %v1909_v55  ;;  %v5798_v21 = vld [vmem:[%s8682_s4 + $0x108] sm:$0xff] }
 0x389   :  { %4905 = vmatmul.msk.bf16.gmra.mxu1 %vm1318_vm5, %v1258_v28  ;;  %v8783_v55 = vld [vmem:[#allocation15_spill] sm:$0xff]  ;;  %2177 = vmatpush.bf16.msra.mxu2 %v5798_v21 }
 0x38a   :  { %v1439_v12 = vpack.c.bf16 %v1160_v42, %v1159_v62  ;;  %v923_v56 = vmax.f32 %v871_v60, %v897_v19  ;;  %v6941_v51 = vsel %vm1692_vm2, %v1907_v0, %v1911_v16  ;;  %v5766_v62 = vld [vmem:[%s8682_s4 + $0x8] sm:$0xff]  ;;  %v8782_v0 = vld [vmem:[#allocation25_spill] sm:$0xff]  ;;  %v8786_v19 = vld [vmem:[#allocation40_spill] sm:$0xff] }
 0x38b   :  { %v872_v37 = vmax.f32 %v8783_v55, %v8782_v0  ;;  %2294 = vmatpush.bf16.msrb.mxu3 %v5766_v62 }
 0x38c   :  { %v953_v43 = vadd.f32 %v6582_v36, %v923_v56  ;;  %v1508_v61 = vshll.u32 %v1439_v12, 16  ;;  %v1512_v48 = vshrl.u32 %v1439_v12, 16  ;;  %v2560_v20 = vrot.slane %v1439_v12, 1 }
 0x38e   :  { %v979_v47 = vmax.f32 %v953_v43, 0.0  ;;  %v1510_v63 = vrot.slane %v1508_v61, 1  ;;  %v1720_v23 = vrot.slane %v1512_v48, 1  ;;  %v1721_v25 = vrot.slane %v1508_v61, 2 }
 0x38f   :  { %v834_v60 = vpop.f32.mrf.mxu0  ;;  %v6953_v26 = vsel %vm2358_vm3, %v2558_v29, %v2560_v20 }
 0x390   :  { %8784 = vst [vmem:[#allocation27_spill] sm:$0xff] %v6953_v26  ;;  %v1161_v4 = vmul.f32 %v8785_v27, %v979_v47  ;;  %v898_v28 = vmax.f32 %v8786_v19, %v834_v60  ;;  %v1511_v12 = vsel %vm1198_vm4, %v1506_v49, %v1510_v63  ;;  %v1722_v56 = vor.u32 %v1721_v25, %v1720_v23  ;;  %v5794_v49 = vld [vmem:[%s8682_s4 + $0xe8] sm:$0xff]  ;;  %v8788_v60 = vld [vmem:[#allocation16_spill] sm:$0xff] }
 0x391   :  { %4933 = vmatmul.msk.bf16.gmra.mxu2 %vm1318_vm5, %v1511_v12  ;;  %v1261_v23 = vor.u32 %v1259_v3, %v1257_v2  ;;  %2004 = vmatpush.bf16.msra.mxu1 %v5794_v49  ;;  %v8789_v19 = vld [vmem:[#allocation48_spill] sm:$0xff]  ;;  %v8790_v12 = vld [vmem:[#allocation42_spill] sm:$0xff] }
 0x392   :  { %v6959_v43 = vpack.c.bf16 %v1161_v4, %v1160_v42  ;;  %v924_v61 = vmax.f32 %v872_v37, %v898_v28  ;;  %v1723_v0 = vsel %vm1692_vm2, %v1718_v5, %v1722_v56  ;;  %v8787_v5 = vld [vmem:[#allocation26_spill] sm:$0xff] }
 0x393   :  { %4961 = vmatmul.msk.bf16.gmra.mxu3 %vm1318_vm5, %v1723_v0  ;;  %v873_v27 = vmax.f32 %v8788_v60, %v8787_v5  ;;  %v1514_v5 = vor.u32 %v1512_v48, %v1510_v63 }
 0x394   :  { %v954_v29 = vadd.f32 %v6582_v36, %v924_v61  ;;  %v1263_v47 = vshll.u32 %v6959_v43, 16  ;;  %v1267_v55 = vshrl.u32 %v6959_v43, 16 }
 0x396   :  { %v980_v25 = vmax.f32 %v954_v29, 0.0  ;;  %v1265_v21 = vrot.slane %v1263_v47, 1  ;;  %v1913_v42 = vrot.slane %v1267_v55, 1  ;;  %v1914_v62 = vrot.slane %v1263_v47, 2 }
 0x397   :  { %v836_v37 = vpop.f32.mrf.mxu0 }
 0x398   :  { %v1162_v28 = vmul.f32 %v8789_v19, %v980_v25  ;;  %v899_v61 = vmax.f32 %v8790_v12, %v836_v37  ;;  %v1266_v0 = vsel %vm1198_vm4, %v1261_v23, %v1265_v21  ;;  %v1915_v52 = vor.u32 %v1914_v62, %v1913_v42  ;;  %v8791_v12 = vld [vmem:[#allocation49_spill] sm:$0xff] }
 0x399   :  { %4906 = vmatmul.msk.bf16.gmra.mxu1 %vm1318_vm5, %v1266_v0 }
 0x39a   :  { %v1440_v26 = vpack.c.bf16 %v1162_v28, %v1161_v4  ;;  %v925_v3 = vmax.f32 %v873_v27, %v899_v61  ;;  %v6976_v2 = vsel %vm1692_vm2, %v1911_v16, %v1915_v52  ;;  %v1269_v61 = vor.u32 %v1267_v55, %v1265_v21 }
 0x39c   :  { %v955_v29 = vadd.f32 %v6582_v36, %v925_v3  ;;  %v1516_v47 = vshll.u32 %v1440_v26, 16  ;;  %v1520_v49 = vshrl.u32 %v1440_v26, 16  ;;  %v2562_v59 = vrot.slane %v1440_v26, 1 }
 0x39e   :  { %v981_v60 = vmax.f32 %v955_v29, 0.0  ;;  %v1518_v25 = vrot.slane %v1516_v47, 1  ;;  %v1724_v19 = vrot.slane %v1520_v49, 1  ;;  %v1725_v37 = vrot.slane %v1516_v47, 2 }
 0x39f   :  { %v6980_v23 = vsel %vm2358_vm3, %v2560_v20, %v2562_v59 }
 0x3a0   :  { %v1163_v42 = vmul.f32 %v8791_v12, %v981_v60  ;;  %v1519_v4 = vsel %vm1198_vm4, %v1514_v5, %v1518_v25  ;;  %v1726_v62 = vor.u32 %v1725_v37, %v1724_v19  ;;  %v1522_v0 = vor.u32 %v1520_v49, %v1518_v25 }
 0x3a1   :  { %4934 = vmatmul.msk.bf16.gmra.mxu2 %vm1318_vm5, %v1519_v4 }
 0x3a2   :  { %v6985_v16 = vpack.c.bf16 %v1163_v42, %v1162_v28  ;;  %v1441_v36 = vpack.c.bf16 %v6595_v35, %v1163_v42  ;;  %v1727_v48 = vsel %vm1692_vm2, %v1722_v56, %v1726_v62 }
 0x3a3   :  { %4962 = vmatmul.msk.bf16.gmra.mxu3 %vm1318_vm5, %v1727_v48 }
 0x3a4   :  { %v1271_v63 = vshll.u32 %v6985_v16, 16  ;;  %v1524_v26 = vshll.u32 %v1441_v36, 16  ;;  %v1528_v20 = vshrl.u32 %v1441_v36, 16  ;;  %v1275_v27 = vshrl.u32 %v6985_v16, 16 }
 0x3a5   :  { %v2564_v3 = vrot.slane %v1441_v36, 1 }
 0x3a6   :  { %v6992_v29 = vpop.f32.mrf.mxu1  ;;  %v1273_v47 = vrot.slane %v1271_v63, 1  ;;  %v1526_v28 = vrot.slane %v1524_v26, 1  ;;  %v1728_v5 = vrot.slane %v1528_v20, 1  ;;  %v1729_v60 = vrot.slane %v1524_v26, 2 }
 0x3a7   :  { %v1917_v35 = vrot.slane %v1275_v27, 1  ;;  %v1918_v19 = vrot.slane %v1271_v63, 2  ;;  %v6998_v55 = vsel %vm2358_vm3, %v2562_v59, %v2564_v3  ;;  %v8792_v63 = vrot.slane %v6612_v46, 1 }
 0x3a8   :  { %v1274_v56 = vsel %vm1198_vm4, %v1269_v61, %v1273_v47  ;;  %v1527_v37 = vsel %vm1198_vm4, %v1522_v0, %v1526_v28  ;;  %v1730_v12 = vor.u32 %v1729_v60, %v1728_v5  ;;  %v1530_v42 = vor.u32 %v1528_v20, %v1526_v28 }
 0x3a9   :  { %4907 = vmatmul.msk.bf16.gmra.mxu1 %vm1318_vm5, %v1274_v56  ;;  %v1919_v4 = vor.u32 %v1918_v19, %v1917_v35  ;;  %v7015_v59 = vsel %vm2358_vm3, %v2564_v3, %v8792_v63  ;;  %v8795_v60 = vshll.u32 %v6620_v50, 16  ;;  %v5793_v19 = vld [vmem:[%s8682_s4 + $0xe0] sm:$0xff] }
 0x3aa   :  { %v1731_v21 = vsel %vm1692_vm2, %v1726_v62, %v1730_v12  ;;  %v1735_v49 = vsel %vm1692_vm2, %v1730_v12, %v6661_v53  ;;  %v1535_v25 = vsel %vm1198_vm4, %v1530_v42, %v6637_v34  ;;  %v1277_v34 = vor.u32 %v1275_v27, %v1273_v47  ;;  %v5797_v27 = vld [vmem:[%s8682_s4 + $0x100] sm:$0xff]  ;;  %2005 = vmatpush.bf16.msra.mxu1 %v5793_v19 }
 0x3ab   :  { %v7006_v36 = vsel %vm1692_vm2, %v1915_v52, %v1919_v4  ;;  %v7010_v48 = vsel %vm1692_vm2, %v1919_v4, %v6610_v8  ;;  %v8793_v8 = vld [vmem:[#allocation50_spill] sm:$0xff]  ;;  %2178 = vmatpush.bf16.msra.mxu2 %v5797_v27  ;;  %v1289_v35 = vrot.slane %v8795_v60, 1 }
 0x3ac   :  { %v8794_v20 = vshll.u32 %v8793_v8, 16  ;;  %v5765_v47 = vld [vmem:[%s8682_s4] sm:$0xff]  ;;  %v8796_v12 = vshrl.u32 %v8793_v8, 16 }
 0x3ad   :  { %2295 = vmatpush.bf16.msrb.mxu3 %v5765_v47 }
 0x3ae   :  { %v7017_v26 = vpop.f32.mrf.mxu1  ;;  %v1281_v61 = vrot.slane %v8794_v20, 1 }
 0x3b0   :  { %v1282_v46 = vsel %vm1198_vm4, %v1277_v34, %v1281_v61  ;;  %v1285_v42 = vor.u32 %v8796_v12, %v1281_v61  ;;  %v8798_v61 = vshrl.u32 %v6620_v50, 16 }
 0x3b1   :  { %4935 = vmatmul.msk.bf16.gmra.mxu2 %vm1318_vm5, %v1527_v37 }
 0x3b2   :  { %v1290_v4 = vsel %vm1198_vm4, %v1285_v42, %v1289_v35 }
 0x3b3   :  { %4963 = vmatmul.msk.bf16.gmra.mxu3 %vm1318_vm5, %v1731_v21 }
 0x3b4   :  { %v7021_v53 = vpop.f32.mrf.mxu2 }
 0x3b6   :  { %v7023_v52 = vpop.f32.mrf.mxu1  ;;  %v7025_v62 = vpop.f32.mrf.mxu3 }
 0x3b9   :  { %4908 = vmatmul.msk.bf16.gmra.mxu1 %vm1318_vm5, %v1282_v46  ;;  %v1293_v46 = vor.u32 %v8798_v61, %v1289_v35 }
 0x3bc   :  { %v7031_v0 = vpop.f32.mrf.mxu2 }
 0x3be   :  { %v7033_v3 = vpop.f32.mrf.mxu1  ;;  %v7035_v28 = vpop.f32.mrf.mxu3 }
 0x3c1   :  { %4936 = vmatmul.msk.bf16.gmra.mxu2 %vm1318_vm5, %v1535_v25 }
 0x3c3   :  { %4964 = vmatmul.msk.bf16.gmra.mxu3 %vm1318_vm5, %v1735_v49 }
 0x3c4   :  { %v7045_v5 = vpop.f32.mrf.mxu2 }
 0x3c6   :  { %v7052_v56 = vpop.f32.mrf.mxu1  ;;  %v7054_v37 = vpop.f32.mrf.mxu3 }
 0x3c9   :  { %4909 = vmatmul.msk.bf16.gmra.mxu1 %vm1318_vm5, %v1290_v4  ;;  %v2089_v4 = vrot.slane %v6779_v57, 2 }
 0x3cc   :  { %v7060_v21 = vpop.f32.mrf.mxu2 }
 0x3ce   :  { %v7062_v49 = vpop.f32.mrf.mxu1  ;;  %v7064_v25 = vpop.f32.mrf.mxu3 }
 0x3d1   :  { %4937 = vmatmul.msk.bf16.gmra.mxu2 %vm1318_vm5, %v6679_v9  ;;  %v8800_v9 = vshrl.u32 %v6639_v31, 16 }
 0x3d3   :  { %4965 = vmatmul.msk.bf16.gmra.mxu3 %vm1318_vm5, %v6694_v45  ;;  %v1546_v45 = vor.u32 %v8800_v9, %v6657_v32  ;;  %v5792_v9 = vld [vmem:[%s8682_s4 + $0xd8] sm:$0xff] }
 0x3d4   :  { %v7070_v63 = vpop.f32.mrf.mxu2  ;;  %2735 = vmatpush.bf16.msra.mxu3 %v5792_v9 }
 0x3d6   :  { %v7072_v34 = vpop.f32.mrf.mxu1  ;;  %v7074_v20 = vpop.f32.mrf.mxu3 }
 0x3d7   :  { %8797 = vst [vmem:[#allocation17_spill] sm:$0xff] %v7072_v34 }
 0x3d9   :  { %4910 = vmatmul.msk.bf16.gmra.mxu1 %vm1318_vm5, %v1293_v46  ;;  %v2088_v46 = vrot.slane %v6752_v58, 2 }
 0x3dc   :  { %v7079_v27 = vpop.f32.mrf.mxu2 }
 0x3de   :  { %v7081_v47 = vpop.f32.mrf.mxu1  ;;  %v7083_v60 = vpop.f32.mrf.mxu3 }
 0x3df   :  { %8799 = vst [vmem:[#allocation7_spill] sm:$0xff] %v7081_v47 }
 0x3e1   :  { %4938 = vmatmul.msk.bf16.gmra.mxu2 %vm1318_vm5, %v1546_v45 }
 0x3e3   :  { %4966 = vmatmul.msk.bf16.gmra.mxu3 %vm1318_vm5, %v6681_v30  ;;  %v5784_v30 = vld [vmem:[%s8682_s4 + $0x98] sm:$0xff] }
 0x3e4   :  { %v7091_v19 = vpop.f32.mrf.mxu2  ;;  %2634 = vmatpush.bf16.msrb.mxu2 %v5784_v30  ;;  %v2091_v30 = vrot.slane %v6814_v22, 2 }
 0x3e5   :  { %8801 = vst [vmem:[#allocation36_spill] sm:$0xff] %v7091_v19 }
 0x3e6   :  { %v7093_v35 = vpop.f32.mrf.mxu1  ;;  %v7095_v12 = vpop.f32.mrf.mxu3 }
 0x3e7   :  { %8802 = vst [vmem:[#allocation28_spill] sm:$0xff] %v7093_v35 }
 0x3e8   :  { %8803 = vst [vmem:[#allocation18_spill] sm:$0xff] %v7095_v12 }
 0x3e9   :  { %4983 = vmatmul.msk.bf16.vlgmr.msra.gmra.mxu1 %vm1318_vm5, %v6802_v39  ;;  %v2090_v39 = vsel %vm2087_vm6, %v2088_v46, %v2089_v4 }
 0x3ec   :  { %v7099_v42 = vpop.f32.mrf.mxu2 }
 0x3ed   :  { %8804 = vst [vmem:[#allocation8_spill] sm:$0xff] %v7099_v42 }
 0x3ee   :  { %v7102_v61 = vpop.f32.mrf.mxu1  ;;  %v7104_v32 = vpop.f32.mrf.mxu3 }
 0x3ef   :  { %8805 = vst [vmem:[#allocation38_spill] sm:$0xff] %v7102_v61  ;;  %v5776_v61 = vld [vmem:[%s8682_s4 + $0x58] sm:$0xff] }
 0x3f0   :  { %8806 = vst [vmem:[#allocation29_spill] sm:$0xff] %v7104_v32  ;;  %2446 = vmatpush.bf16.msrb.mxu1 %v5776_v61 }
 0x3f1   :  { %5011 = vmatmul.msk.bf16.vlgmr.msra.gmra.mxu2 %vm1318_vm5, %v2090_v39 }
 0x3f3   :  { %5039 = vmatmul.msk.bf16.vlgmr.msrb.gmra.mxu3 %vm1318_vm5, %v6738_v10 }
 0x3f4   :  { %v7117_v45 = vpop.f32.mrf.mxu2 }
 0x3f5   :  { %8807 = vst [vmem:[#allocation19_spill] sm:$0xff] %v7117_v45  ;;  %v2092_v45 = vsel %vm2087_vm6, %v2089_v4, %v2091_v30 }
 0x3f6   :  { %v7122_v35 = vpop.f32.mrf.mxu1  ;;  %v7124_v32 = vpop.f32.mrf.mxu3 }
 0x3f7   :  { %8808 = vst [vmem:[#allocation9_spill] sm:$0xff] %v7122_v35 }
 0x3f8   :  { %8809 = vst [vmem:[#allocation39_spill] sm:$0xff] %v7124_v32 }
 0x3f9   :  { %4984 = vmatmul.msk.bf16.gmra.mxu1 %vm1318_vm5, %v6828_v11 }
 0x3fc   :  { %v7128_v46 = vpop.f32.mrf.mxu2 }
 0x3fd   :  { %8810 = vst [vmem:[#allocation30_spill] sm:$0xff] %v7128_v46 }
 0x3fe   :  { %v1391_v9 = vpop.f32.mrf.mxu1  ;;  %v7131_v39 = vpop.f32.mrf.mxu3 }
 0x3ff   :  { %8811 = vst [vmem:[#allocation20_spill] sm:$0xff] %v7131_v39  ;;  %v2093_v9 = vrot.slane %v6840_v33, 2 }
 0x401   :  { %5012 = vmatmul.msk.bf16.gmra.mxu2 %vm1318_vm5, %v2092_v45  ;;  %v2094_v4 = vsel %vm2087_vm6, %v2091_v30, %v2093_v9  ;;  %v5783_v30 = vld [vmem:[%s8682_s4 + $0x90] sm:$0xff] }
 0x402   :  { %2635 = vmatpush.bf16.msrb.mxu2 %v5783_v30  ;;  %v2097_v30 = vrot.slane %v6901_v24, 2 }
 0x403   :  { %5040 = vmatmul.msk.bf16.gmra.mxu3 %vm1318_vm5, %v6752_v58 }
 0x404   :  { %v7137_v35 = vpop.f32.mrf.mxu2 }
 0x405   :  { %8812 = vst [vmem:[#allocation10_spill] sm:$0xff] %v7137_v35 }
 0x406   :  { %v1394_v61 = vpop.f32.mrf.mxu1  ;;  %v7139_v32 = vpop.f32.mrf.mxu3 }
 0x407   :  { %8813 = vst [vmem:[#allocation41_spill] sm:$0xff] %v7139_v32 }
 0x409   :  { %4985 = vmatmul.msk.bf16.gmra.mxu1 %vm1318_vm5, %v6854_v17 }
 0x40c   :  { %v1643_v11 = vpop.f32.mrf.mxu2 }
 0x40d   :  { %v2095_v11 = vrot.slane %v6866_v13, 2 }
 0x40e   :  { %v7144_v46 = vpop.f32.mrf.mxu1  ;;  %v1836_v39 = vpop.f32.mrf.mxu3 }
 0x40f   :  { %8814 = vst [vmem:[#allocation31_spill] sm:$0xff] %v7144_v46 }
 0x411   :  { %5013 = vmatmul.msk.bf16.gmra.mxu2 %vm1318_vm5, %v2094_v4  ;;  %v5791_v4 = vld [vmem:[%s8682_s4 + $0xd0] sm:$0xff] }
 0x412   :  { %2736 = vmatpush.bf16.msra.mxu3 %v5791_v4 }
 0x413   :  { %5041 = vmatmul.msk.bf16.gmra.mxu3 %vm1318_vm5, %v6779_v57 }
 0x414   :  { %v1646_v45 = vpop.f32.mrf.mxu2 }
 0x415   :  { %v5775_v45 = vld [vmem:[%s8682_s4 + $0x50] sm:$0xff] }
 0x416   :  { %v7150_v61 = vpop.f32.mrf.mxu1  ;;  %v1839_v32 = vpop.f32.mrf.mxu3  ;;  %2447 = vmatpush.bf16.msrb.mxu1 %v5775_v45 }
 0x417   :  { %8815 = vst [vmem:[#allocation21_spill] sm:$0xff] %v7150_v61  ;;  %v2096_v32 = vsel %vm2087_vm6, %v2093_v9, %v2095_v11 }
 0x419   :  { %4986 = vmatmul.msk.bf16.gmra.mxu1 %vm1318_vm5, %v6889_v15 }
 0x41c   :  { %v7154_v17 = vpop.f32.mrf.mxu2 }
 0x41d   :  { %8816 = vst [vmem:[#allocation11_spill] sm:$0xff] %v7154_v17 }
 0x41e   :  { %v7157_v46 = vpop.f32.mrf.mxu1  ;;  %v7159_v39 = vpop.f32.mrf.mxu3 }
 0x41f   :  { %8817 = vst [vmem:[#allocation44_spill] sm:$0xff] %v7157_v46 }
 0x420   :  { %8818 = vst [vmem:[#allocation32_spill] sm:$0xff] %v7159_v39  ;;  %v5773_v39 = vld [vmem:[%s8682_s4 + $0x40] sm:$0xff] }
 0x421   :  { %5014 = vmatmul.msk.bf16.gmra.mxu2 %vm1318_vm5, %v2096_v32 }
 0x423   :  { %5042 = vmatmul.msk.bf16.gmra.mxu3 %vm1318_vm5, %v6814_v22 }
 0x424   :  { %v7171_v15 = vpop.f32.mrf.mxu2 }
 0x425   :  { %8819 = vst [vmem:[#allocation22_spill] sm:$0xff] %v7171_v15  ;;  %v2098_v15 = vsel %vm2087_vm6, %v2095_v11, %v2097_v30 }
 0x426   :  { %v7176_v46 = vpop.f32.mrf.mxu1  ;;  %v7178_v61 = vpop.f32.mrf.mxu3 }
 0x427   :  { %8820 = vst [vmem:[#allocation12_spill] sm:$0xff] %v7176_v46 }
 0x428   :  { %8821 = vst [vmem:[#allocation43_spill] sm:$0xff] %v7178_v61 }
 0x429   :  { %4987 = vmatmul.msk.bf16.gmra.mxu1 %vm1318_vm5, %v6915_v14 }
 0x42c   :  { %v7182_v9 = vpop.f32.mrf.mxu2 }
 0x42d   :  { %8822 = vst [vmem:[#allocation33_spill] sm:$0xff] %v7182_v9 }
 0x42e   :  { %v7185_v4 = vpop.f32.mrf.mxu1  ;;  %v7187_v32 = vpop.f32.mrf.mxu3 }
 0x42f   :  { %8823 = vst [vmem:[#allocation23_spill] sm:$0xff] %v7185_v4  ;;  %v2099_v4 = vrot.slane %v6927_v6, 2 }
 0x430   :  { %8824 = vst [vmem:[#allocation13_spill] sm:$0xff] %v7187_v32 }
 0x431   :  { %5015 = vmatmul.msk.bf16.gmra.mxu2 %vm1318_vm5, %v2098_v15  ;;  %v2100_v15 = vsel %vm2087_vm6, %v2097_v30, %v2099_v4 }
 0x433   :  { %5043 = vmatmul.msk.bf16.gmra.mxu3 %vm1318_vm5, %v6840_v33 }
 0x434   :  { %v7193_v46 = vpop.f32.mrf.mxu2 }
 0x435   :  { %8825 = vst [vmem:[#allocation45_spill] sm:$0xff] %v7193_v46  ;;  %v5789_v46 = vld [vmem:[%s8682_s4 + $0xc0] sm:$0xff] }
 0x436   :  { %v7195_v45 = vpop.f32.mrf.mxu1  ;;  %v7197_v14 = vpop.f32.mrf.mxu3 }
 0x437   :  { %8826 = vst [vmem:[#allocation34_spill] sm:$0xff] %v7195_v45 }
 0x438   :  { %8827 = vst [vmem:[#allocation24_spill] sm:$0xff] %v7197_v14 }
 0x439   :  { %4988 = vmatmul.msk.bf16.gmra.mxu1 %vm1318_vm5, %v6941_v51 }
 0x43c   :  { %v7201_v9 = vpop.f32.mrf.mxu2 }
 0x43d   :  { %8828 = vst [vmem:[#allocation14_spill] sm:$0xff] %v7201_v9 }
 0x43e   :  { %v7204_v32 = vpop.f32.mrf.mxu1  ;;  %v7206_v11 = vpop.f32.mrf.mxu3 }
 0x43f   :  { %8829 = vst [vmem:[#allocation47_spill] sm:$0xff] %v7204_v32  ;;  %v2101_v32 = vrot.slane %v6959_v43, 2 }
 0x440   :  { %8830 = vst [vmem:[#allocation37_spill] sm:$0xff] %v7206_v11 }
 0x441   :  { %5016 = vmatmul.msk.bf16.gmra.mxu2 %vm1318_vm5, %v2100_v15  ;;  %v5782_v15 = vld [vmem:[%s8682_s4 + $0x88] sm:$0xff] }
 0x442   :  { %2636 = vmatpush.bf16.msrb.mxu2 %v5782_v15 }
 0x443   :  { %5044 = vmatmul.msk.bf16.gmra.mxu3 %vm1318_vm5, %v6866_v13 }
 0x444   :  { %v7212_v45 = vpop.f32.mrf.mxu2 }
 0x445   :  { %8831 = vst [vmem:[#allocation25_spill] sm:$0xff] %v7212_v45 }
 0x446   :  { %v7214_v14 = vpop.f32.mrf.mxu1  ;;  %v7216_v51 = vpop.f32.mrf.mxu3 }
 0x447   :  { %8832 = vst [vmem:[#allocation15_spill] sm:$0xff] %v7214_v14  ;;  %v5790_v14 = vld [vmem:[%s8682_s4 + $0xc8] sm:$0xff] }
 0x448   :  { %8833 = vst [vmem:[#allocation46_spill] sm:$0xff] %v7216_v51  ;;  %v2102_v51 = vsel %vm2087_vm6, %v2099_v4, %v2101_v32  ;;  %2737 = vmatpush.bf16.msra.mxu3 %v5790_v14  ;;  %v2103_v14 = vrot.slane %v6985_v16, 2 }
 0x449   :  { %4989 = vmatmul.msk.bf16.gmra.mxu1 %vm1318_vm5, %v6976_v2 }
 0x44c   :  { %v7220_v9 = vpop.f32.mrf.mxu2  ;;  %2738 = vmatpush.bf16.msra.mxu3 %v5789_v46  ;;  %v2109_v46 = vrot.slane %v6685_v1, 2 }
 0x44d   :  { %8834 = vst [vmem:[#allocation40_spill] sm:$0xff] %v7220_v9 }
 0x44e   :  { %v7223_v11 = vpop.f32.mrf.mxu1  ;;  %v7225_v30 = vpop.f32.mrf.mxu3 }
 0x44f   :  { %8835 = vst [vmem:[#allocation26_spill] sm:$0xff] %v7223_v11  ;;  %v5774_v11 = vld [vmem:[%s8682_s4 + $0x48] sm:$0xff] }
 0x450   :  { %8836 = vst [vmem:[#allocation16_spill] sm:$0xff] %v7225_v30  ;;  %2448 = vmatpush.bf16.msrb.mxu1 %v5774_v11 }
 0x451   :  { %5017 = vmatmul.msk.bf16.gmra.mxu2 %vm1318_vm5, %v2102_v51 }
 0x453   :  { %5045 = vmatmul.msk.bf16.gmra.mxu3 %vm1318_vm5, %v6901_v24 }
 0x454   :  { %v7237_v2 = vpop.f32.mrf.mxu2  ;;  %2449 = vmatpush.bf16.msrb.mxu1 %v5773_v39 }
 0x455   :  { %8837 = vst [vmem:[#allocation48_spill] sm:$0xff] %v7237_v2  ;;  %v2104_v2 = vsel %vm2087_vm6, %v2101_v32, %v2103_v14  ;;  %v2105_v32 = vrot.slane %v8793_v8, 2 }
 0x456   :  { %v7242_v30 = vpop.f32.mrf.mxu1  ;;  %v7244_v9 = vpop.f32.mrf.mxu3 }
 0x457   :  { %8838 = vst [vmem:[#allocation42_spill] sm:$0xff] %v7242_v30 }
 0x458   :  { %8839 = vst [vmem:[#allocation49_spill] sm:$0xff] %v7244_v9  ;;  %v2107_v9 = vrot.slane %v6620_v50, 2 }
 0x459   :  { %4990 = vmatmul.msk.bf16.gmra.mxu1 %vm1318_vm5, %v7006_v36 }
 0x45a   :  { %v2108_v61 = vsel %vm2087_vm6, %v2105_v32, %v2107_v9  ;;  %v2110_v47 = vsel %vm2087_vm6, %v2107_v9, %v2109_v46  ;;  %v2360_v9 = vrot.slane %v6752_v58, 1 }
 0x45c   :  { %v7248_v4 = vpop.f32.mrf.mxu2 }
 0x45d   :  { %8840 = vst [vmem:[#allocation50_spill] sm:$0xff] %v7248_v4 }
 0x45e   :  { %v7251_v51 = vpop.f32.mrf.mxu1  ;;  %v7253_v15 = vpop.f32.mrf.mxu3 }
 0x45f   :  { %8841 = vst [vmem:[#allocation54_spill] sm:$0xff] %v7251_v51 }
 0x460   :  { %8842 = vst [vmem:[#allocation55_spill] sm:$0xff] %v7253_v15 }
 0x461   :  { %5018 = vmatmul.msk.bf16.gmra.mxu2 %vm1318_vm5, %v2104_v2  ;;  %v2106_v2 = vsel %vm2087_vm6, %v2103_v14, %v2105_v32 }
 0x463   :  { %5046 = vmatmul.msk.bf16.gmra.mxu3 %vm1318_vm5, %v6927_v6 }
 0x464   :  { %v7259_v30 = vpop.f32.mrf.mxu2 }
 0x465   :  { %8843 = vst [vmem:[#allocation56_spill] sm:$0xff] %v7259_v30 }
 0x466   :  { %v7261_v11 = vpop.f32.mrf.mxu3  ;;  %v7263_v36 = vpop.f32.mrf.mxu1 }
 0x467   :  { %8844 = vst [vmem:[#allocation57_spill] sm:$0xff] %v7261_v11 }
 0x469   :  { %4991 = vmatmul.msk.bf16.gmra.mxu1 %vm1318_vm5, %v7010_v48 }
 0x46c   :  { %v7267_v4 = vpop.f32.mrf.mxu2 }
 0x46d   :  { %8845 = vst [vmem:[#allocation58_spill] sm:$0xff] %v7267_v4  ;;  %v8847_v4 = vld [vmem:[#allocation52_spill] sm:$0xff] }
 0x46e   :  { %v7269_v51 = vpop.f32.mrf.mxu3  ;;  %v7271_v15 = vpop.f32.mrf.mxu1 }
 0x46f   :  { %8846 = vst [vmem:[#allocation59_spill] sm:$0xff] %v7269_v51 }
 0x471   :  { %5019 = vmatmul.msk.bf16.gmra.mxu2 %vm1318_vm5, %v2106_v2  ;;  %v5781_v2 = vld [vmem:[%s8682_s4 + $0x80] sm:$0xff] }
 0x472   :  { %2637 = vmatpush.bf16.msrb.mxu2 %v5781_v2 }
 0x473   :  { %5047 = vmatmul.msk.bf16.gmra.mxu3 %vm1318_vm5, %v6959_v43 }
 0x474   :  { %v7278_v11 = vpop.f32.mrf.mxu2 }
 0x476   :  { %v7280_v30 = vpop.f32.mrf.mxu1  ;;  %v7282_v48 = vpop.f32.mrf.mxu3 }
 0x479   :  { %4992 = vmatmul.msk.bf16.gmra.mxu1 %vm1318_vm5, %v8847_v4 }
 0x47c   :  { %v7286_v51 = vpop.f32.mrf.mxu2 }
 0x47e   :  { %v7289_v45 = vpop.f32.mrf.mxu1  ;;  %v7291_v14 = vpop.f32.mrf.mxu3 }
 0x481   :  { %5020 = vmatmul.msk.bf16.gmra.mxu2 %vm1318_vm5, %v2108_v61 }
 0x483   :  { %5048 = vmatmul.msk.bf16.gmra.mxu3 %vm1318_vm5, %v6985_v16 }
 0x484   :  { %v7303_v4 = vpop.f32.mrf.mxu2 }
 0x486   :  { %v7308_v17 = vpop.f32.mrf.mxu1  ;;  %v7310_v35 = vpop.f32.mrf.mxu3 }
 0x489   :  { %4993 = vmatmul.msk.bf16.gmra.mxu1 %vm1318_vm5, %v6721_v54 }
 0x48c   :  { %v7314_v61 = vpop.f32.mrf.mxu2 }
 0x48e   :  { %v7317_v32 = vpop.f32.mrf.mxu1  ;;  %v7319_v2 = vpop.f32.mrf.mxu3 }
 0x48f   :  { %8848 = vst [vmem:[#allocation52_spill] sm:$0xff] %v7317_v32 }
 0x491   :  { %5021 = vmatmul.msk.bf16.gmra.mxu2 %vm1318_vm5, %v2110_v47 }
 0x493   :  { %5049 = vmatmul.msk.bf16.gmra.mxu3 %vm1318_vm5, %v8793_v8 }
 0x494   :  { %v7325_v42 = vpop.f32.mrf.mxu2 }
 0x496   :  { %v7327_v39 = vpop.f32.mrf.mxu1  ;;  %v7329_v54 = vpop.f32.mrf.mxu3 }
 0x497   :  { %8849 = vst [vmem:[#allocation60_spill] sm:$0xff] %v7327_v39 }
 0x499   :  { %4994 = vmatmul.msk.bf16.gmra.mxu1 %vm1318_vm5, %v6714_v44  ;;  %v2359_v44 = vrot.slane %v6738_v10, 1 }
 0x49c   :  { %v7333_v12 = vpop.f32.mrf.mxu2 }
 0x49d   :  { %8850 = vst [vmem:[#allocation61_spill] sm:$0xff] %v7333_v12  ;;  %v2361_v12 = vsel %vm2358_vm3, %v2359_v44, %v2360_v9 }
 0x49e   :  { %v7335_v34 = vpop.f32.mrf.mxu1  ;;  %v7337_v19 = vpop.f32.mrf.mxu3 }
 0x49f   :  { %8851 = vst [vmem:[#allocation62_spill] sm:$0xff] %v7335_v34 }
 0x4a1   :  { %5022 = vmatmul.msk.bf16.gmra.mxu2 %vm1318_vm5, %v2109_v46 }
 0x4a3   :  { %5050 = vmatmul.msk.bf16.gmra.mxu3 %vm1318_vm5, %v6620_v50 }
 0x4a4   :  { %v7342_v47 = vpop.f32.mrf.mxu2 }
 0x4a5   :  { %8852 = vst [vmem:[#allocation63_spill] sm:$0xff] %v7342_v47  ;;  %v2362_v47 = vrot.slane %v6779_v57, 1  ;;  %v2364_v57 = vrot.slane %v6814_v22, 1  ;;  %v2366_v22 = vrot.slane %v6840_v33, 1  ;;  %v2368_v33 = vrot.slane %v6866_v13, 1 }
 0x4a6   :  { %v7345_v39 = vpop.f32.mrf.mxu1  ;;  %v7347_v31 = vpop.f32.mrf.mxu3 }
 0x4a7   :  { %8853 = vst [vmem:[#allocation64_spill] sm:$0xff] %v7345_v39  ;;  %v2363_v58 = vsel %vm2358_vm3, %v2360_v9, %v2362_v47 }
 0x4a9   :  { %5067 = vmatmul.msk.bf16.vlgmr.msrb.gmra.mxu1 %vm1318_vm5, %v2361_v12 }
 0x4ac   :  { %v7352_v34 = vpop.f32.mrf.mxu2 }
 0x4ad   :  { %8854 = vst [vmem:[#allocation65_spill] sm:$0xff] %v7352_v34 }
 0x4ae   :  { %v7354_v46 = vpop.f32.mrf.mxu1  ;;  %v7356_v32 = vpop.f32.mrf.mxu3 }
 0x4af   :  { %8855 = vst [vmem:[#allocation66_spill] sm:$0xff] %v7354_v46 }
 0x4b1   :  { %5095 = vmatmul.msk.bf16.vlgmr.msrb.gmra.mxu2 %vm1318_vm5, %v6773_v41  ;;  %v2365_v41 = vsel %vm2358_vm3, %v2362_v47, %v2364_v57 }
 0x4b3   :  { %5123 = vmatmul.msk.bf16.vlgmr.msra.gmra.mxu3 %vm1318_vm5, %v2363_v58 }
 0x4b4   :  { %v7363_v10 = vpop.f32.mrf.mxu2 }
 0x4b5   :  { %8856 = vst [vmem:[#allocation67_spill] sm:$0xff] %v7363_v10 }
 0x4b6   :  { %v7365_v44 = vpop.f32.mrf.mxu1  ;;  %v7367_v12 = vpop.f32.mrf.mxu3 }
 0x4b7   :  { %8857 = vst [vmem:[#allocation68_spill] sm:$0xff] %v7365_v44 }
 0x4b9   :  { %5068 = vmatmul.msk.bf16.gmra.mxu1 %vm1318_vm5, %v2363_v58 }
 0x4bc   :  { %v7370_v46 = vpop.f32.mrf.mxu2 }
 0x4bd   :  { %8858 = vst [vmem:[#allocation69_spill] sm:$0xff] %v7370_v46 }
 0x4be   :  { %v2034_v39 = vpop.f32.mrf.mxu1  ;;  %v7372_v34 = vpop.f32.mrf.mxu3 }
 0x4c1   :  { %5096 = vmatmul.msk.bf16.gmra.mxu2 %vm1318_vm5, %v6808_v38  ;;  %v2367_v38 = vsel %vm2358_vm3, %v2364_v57, %v2366_v22 }
 0x4c3   :  { %5124 = vmatmul.msk.bf16.gmra.mxu3 %vm1318_vm5, %v2365_v41 }
 0x4c4   :  { %v7379_v9 = vpop.f32.mrf.mxu2 }
 0x4c5   :  { %8859 = vst [vmem:[#allocation70_spill] sm:$0xff] %v7379_v9 }
 0x4c6   :  { %v2037_v44 = vpop.f32.mrf.mxu1  ;;  %v7381_v10 = vpop.f32.mrf.mxu3 }
 0x4c9   :  { %5069 = vmatmul.msk.bf16.gmra.mxu1 %vm1318_vm5, %v2365_v41 }
 0x4cc   :  { %v2207_v58 = vpop.f32.mrf.mxu2 }
 0x4ce   :  { %v7384_v39 = vpop.f32.mrf.mxu1  ;;  %v2324_v46 = vpop.f32.mrf.mxu3 }
 0x4d1   :  { %5097 = vmatmul.msk.bf16.gmra.mxu2 %vm1318_vm5, %v6834_v18  ;;  %v2369_v18 = vsel %vm2358_vm3, %v2366_v22, %v2368_v33 }
 0x4d3   :  { %5125 = vmatmul.msk.bf16.gmra.mxu3 %vm1318_vm5, %v2367_v38 }
 0x4d4   :  { %v2210_v47 = vpop.f32.mrf.mxu2 }
 0x4d6   :  { %v7391_v9 = vpop.f32.mrf.mxu1  ;;  %v2327_v44 = vpop.f32.mrf.mxu3 }
 0x4d7   :  { %8860 = vst [vmem:[#allocation71_spill] sm:$0xff] %v7391_v9 }
 0x4d9   :  { %5070 = vmatmul.msk.bf16.gmra.mxu1 %vm1318_vm5, %v2367_v38 }
 0x4dc   :  { %v7394_v41 = vpop.f32.mrf.mxu2 }
 0x4de   :  { %v7396_v58 = vpop.f32.mrf.mxu1  ;;  %v7398_v46 = vpop.f32.mrf.mxu3 }
 0x4df   :  { %8861 = vst [vmem:[#allocation72_spill] sm:$0xff] %v7396_v58 }
 0x4e1   :  { %5098 = vmatmul.msk.bf16.gmra.mxu2 %vm1318_vm5, %v6860_v7  ;;  %v2370_v7 = vrot.slane %v6901_v24, 1 }
 0x4e3   :  { %5126 = vmatmul.msk.bf16.gmra.mxu3 %vm1318_vm5, %v2369_v18  ;;  %v2371_v22 = vsel %vm2358_vm3, %v2368_v33, %v2370_v7 }
 0x4e4   :  { %v7405_v57 = vpop.f32.mrf.mxu2 }
 0x4e5   :  { %8862 = vst [vmem:[#allocation73_spill] sm:$0xff] %v7405_v57 }
 0x4e6   :  { %v7407_v47 = vpop.f32.mrf.mxu1  ;;  %v7409_v38 = vpop.f32.mrf.mxu3 }
 0x4e7   :  { %8863 = vst [vmem:[#allocation74_spill] sm:$0xff] %v7407_v47 }
 0x4e8   :  { %8864 = vst [vmem:[#allocation75_spill] sm:$0xff] %v7409_v38 }
 0x4e9   :  { %5071 = vmatmul.msk.bf16.gmra.mxu1 %vm1318_vm5, %v2369_v18 }
 0x4ec   :  { %v7412_v44 = vpop.f32.mrf.mxu2 }
 0x4ed   :  { %8865 = vst [vmem:[#allocation76_spill] sm:$0xff] %v7412_v44 }
 0x4ee   :  { %v7414_v58 = vpop.f32.mrf.mxu1  ;;  %v7416_v13 = vpop.f32.mrf.mxu3 }
 0x4ef   :  { %8866 = vst [vmem:[#allocation77_spill] sm:$0xff] %v7414_v58 }
 0x4f0   :  { %8867 = vst [vmem:[#allocation78_spill] sm:$0xff] %v7416_v13  ;;  %v8874_v13 = vld [vmem:[#allocation35_spill] sm:$0xff] }
 0x4f1   :  { %5099 = vmatmul.msk.bf16.gmra.mxu2 %vm1318_vm5, %v6895_v40  ;;  %v2372_v40 = vrot.slane %v6927_v6, 1 }
 0x4f3   :  { %5127 = vmatmul.msk.bf16.gmra.mxu3 %vm1318_vm5, %v2371_v22  ;;  %v2373_v33 = vsel %vm2358_vm3, %v2370_v7, %v2372_v40 }
 0x4f4   :  { %v7423_v47 = vpop.f32.mrf.mxu2 }
 0x4f5   :  { %8868 = vst [vmem:[#allocation79_spill] sm:$0xff] %v7423_v47 }
 0x4f6   :  { %v7425_v57 = vpop.f32.mrf.mxu1  ;;  %v7427_v18 = vpop.f32.mrf.mxu3 }
 0x4f7   :  { %8869 = vst [vmem:[#allocation80_spill] sm:$0xff] %v7425_v57 }
 0x4f8   :  { %8870 = vst [vmem:[#allocation81_spill] sm:$0xff] %v7427_v18 }
 0x4f9   :  { %5072 = vmatmul.msk.bf16.gmra.mxu1 %vm1318_vm5, %v2371_v22 }
 0x4fc   :  { %v7430_v58 = vpop.f32.mrf.mxu2 }
 0x4fd   :  { %8871 = vst [vmem:[#allocation82_spill] sm:$0xff] %v7430_v58 }
 0x4fe   :  { %v7432_v44 = vpop.f32.mrf.mxu1  ;;  %v7434_v24 = vpop.f32.mrf.mxu3 }
 0x4ff   :  { %8872 = vst [vmem:[#allocation83_spill] sm:$0xff] %v7432_v44 }
 0x500   :  { %8873 = vst [vmem:[#allocation84_spill] sm:$0xff] %v7434_v24  ;;  %v8881_v24 = vld [vmem:[#allocation27_spill] sm:$0xff] }
 0x501   :  { %5100 = vmatmul.msk.bf16.gmra.mxu2 %vm1318_vm5, %v8874_v13  ;;  %v2374_v13 = vrot.slane %v6959_v43, 1 }
 0x503   :  { %5128 = vmatmul.msk.bf16.gmra.mxu3 %vm1318_vm5, %v2373_v33  ;;  %v2375_v7 = vsel %vm2358_vm3, %v2372_v40, %v2374_v13 }
 0x504   :  { %v7441_v57 = vpop.f32.mrf.mxu2 }
 0x505   :  { %8875 = vst [vmem:[#allocation35_spill] sm:$0xff] %v7441_v57 }
 0x506   :  { %v7443_v47 = vpop.f32.mrf.mxu1  ;;  %v7445_v22 = vpop.f32.mrf.mxu3 }
 0x507   :  { %8876 = vst [vmem:[#allocation85_spill] sm:$0xff] %v7443_v47 }
 0x508   :  { %8877 = vst [vmem:[#allocation86_spill] sm:$0xff] %v7445_v22 }
 0x509   :  { %5073 = vmatmul.msk.bf16.gmra.mxu1 %vm1318_vm5, %v2373_v33 }
 0x50c   :  { %v7448_v44 = vpop.f32.mrf.mxu2 }
 0x50d   :  { %8878 = vst [vmem:[#allocation87_spill] sm:$0xff] %v7448_v44 }
 0x50e   :  { %v7450_v58 = vpop.f32.mrf.mxu1  ;;  %v7452_v6 = vpop.f32.mrf.mxu3 }
 0x50f   :  { %8879 = vst [vmem:[#allocation88_spill] sm:$0xff] %v7450_v58 }
 0x510   :  { %8880 = vst [vmem:[#allocation89_spill] sm:$0xff] %v7452_v6  ;;  %v2956_v6 = vpop.permute.xlu2 %2955 }
 0x511   :  { %5101 = vmatmul.msk.bf16.gmra.mxu2 %vm1318_vm5, %v8881_v24  ;;  %v2376_v24 = vrot.slane %v6985_v16, 1 }
 0x513   :  { %5129 = vmatmul.msk.bf16.gmra.mxu3 %vm1318_vm5, %v2375_v7  ;;  %v2377_v40 = vsel %vm2358_vm3, %v2374_v13, %v2376_v24 }
 0x514   :  { %v7459_v47 = vpop.f32.mrf.mxu2 }
 0x515   :  { %8882 = vst [vmem:[#allocation27_spill] sm:$0xff] %v7459_v47 }
 0x516   :  { %v7461_v57 = vpop.f32.mrf.mxu1  ;;  %v7463_v33 = vpop.f32.mrf.mxu3 }
 0x517   :  { %8883 = vst [vmem:[#allocation90_spill] sm:$0xff] %v7461_v57 }
 0x518   :  { %8884 = vst [vmem:[#allocation91_spill] sm:$0xff] %v7463_v33 }
 0x519   :  { %5074 = vmatmul.msk.bf16.gmra.mxu1 %vm1318_vm5, %v2375_v7 }
 0x51c   :  { %v7466_v58 = vpop.f32.mrf.mxu2 }
 0x51d   :  { %8885 = vst [vmem:[#allocation92_spill] sm:$0xff] %v7466_v58  ;;  %v7481_v58 = vpop.permute.xlu2 %2970 }
 0x51e   :  { %v7468_v44 = vpop.f32.mrf.mxu1  ;;  %v7470_v43 = vpop.f32.mrf.mxu3 }
 0x51f   :  { %8886 = vst [vmem:[#allocation93_spill] sm:$0xff] %v7468_v44 }
 0x520   :  { %8887 = vst [vmem:[#allocation94_spill] sm:$0xff] %v7470_v43 }
 0x521   :  { %5102 = vmatmul.msk.bf16.gmra.mxu2 %vm1318_vm5, %v6980_v23  ;;  %v2378_v23 = vrot.slane %v8793_v8, 1 }
 0x523   :  { %5130 = vmatmul.msk.bf16.gmra.mxu3 %vm1318_vm5, %v2377_v40  ;;  %v2379_v13 = vsel %vm2358_vm3, %v2376_v24, %v2378_v23 }
 0x524   :  { %v7477_v57 = vpop.f32.mrf.mxu2 }
 0x525   :  { %8888 = vst [vmem:[#allocation95_spill] sm:$0xff] %v7477_v57  ;;  %v7492_v57 = vpop.permute.xlu2 %3020 }
 0x526   :  { %v7479_v47 = vpop.f32.mrf.mxu3  ;;  %v2451_v7 = vpop.f32.mrf.mxu1  ;;  %8892 = vst [vmem:[#allocation99_spill] sm:$0xff] %v7492_v57 }
 0x527   :  { %8889 = vst [vmem:[#allocation96_spill] sm:$0xff] %v7479_v47  ;;  %v2452_v33 = vadd.f32 %v2451_v7, %v7021_v53 }
 0x529   :  { %5075 = vmatmul.msk.bf16.gmra.mxu1 %vm1318_vm5, %v2377_v40 }
 0x52c   :  { %v7484_v44 = vpop.f32.mrf.mxu2 }
 0x52d   :  { %8890 = vst [vmem:[#allocation97_spill] sm:$0xff] %v7484_v44  ;;  %v2298_v44 = vadd.f32 %v7282_v48, %v6992_v29  ;;  %v7501_v9 = vpop.permute.xlu2 %3035  ;;  %v7508_v29 = vld [vmem:[%s8683_s5] ss:$0 sm:$0xff] }
 0x52e   :  { %v7486_v16 = vpop.f32.mrf.mxu3  ;;  %v2453_v43 = vpop.f32.mrf.mxu1 }
 0x52f   :  { %8891 = vst [vmem:[#allocation98_spill] sm:$0xff] %v7486_v16  ;;  %v2511_v18 = vadd.f32 %v2452_v33, %v2298_v44  ;;  %v2454_v38 = vadd.f32 %v2453_v43, %v7031_v0 }
 0x531   :  { %5103 = vmatmul.msk.bf16.gmra.mxu2 %vm1318_vm5, %v6998_v55 }
 0x533   :  { %5131 = vmatmul.msk.bf16.gmra.mxu3 %vm1318_vm5, %v2379_v13 }
 0x534   :  { %v2639_v47 = vpop.f32.mrf.mxu2 }
 0x535   :  { %v2640_v16 = vadd.f32 %v2639_v47, %v7025_v62  ;;  %v2300_v47 = vadd.f32 %v7291_v14, %v7017_v26 }
 0x536   :  { %v2456_v40 = vpop.f32.mrf.mxu1  ;;  %v2740_v22 = vpop.f32.mrf.mxu3 }
 0x537   :  { %v2741_v8 = vadd.f32 %v2740_v22, %v7263_v36  ;;  %v7511_v36 = vrot.slane %v6620_v50, 1  ;;  %v2512_v0 = vadd.f32 %v2454_v38, %v2300_v47  ;;  %v2457_v26 = vadd.f32 %v2456_v40, %v7045_v5 }
 0x538   :  { %v2303_v38 = vadd.f32 %v7310_v35, %v7023_v52 }
 0x539   :  { %v2800_v55 = vadd.f32 %v2741_v8, %v2640_v16  ;;  %5076 = vmatmul.msk.bf16.gmra.mxu1 %vm1318_vm5, %v2379_v13  ;;  %v2381_v33 = vsel %vm2358_vm3, %v2378_v23, %v7511_v36  ;;  %v2951_v23 = vpop.permute.xlu2 %2950 }
 0x53a   :  { %v2513_v13 = vadd.f32 %v2457_v26, %v2303_v38 }
 0x53b   :  { %v2824_v24 = vadd.f32 %v2800_v55, %v2511_v18 }
 0x53c   :  { %v2641_v57 = vpop.f32.mrf.mxu2 }
 0x53d   :  { %v2848_v53 = vadd.f32 %v2824_v24, %v7278_v11  ;;  %v2642_v44 = vadd.f32 %v2641_v57, %v7035_v28 }
 0x53e   :  { %v2458_v62 = vpop.f32.mrf.mxu1  ;;  %v2742_v48 = vpop.f32.mrf.mxu3 }
 0x53f   :  { %v2743_v18 = vadd.f32 %v2742_v48, %v7271_v15  ;;  %v2876_v11 = vadd.f32 %v7508_v29, %v2848_v53  ;;  %v2459_v52 = vadd.f32 %v2458_v62, %v7060_v21  ;;  %v2966_v62 = vpop.permute.xlu1 %2965 }
 0x541   :  { %v2801_v22 = vadd.f32 %v2743_v18, %v2642_v44  ;;  %5104 = vmatmul.msk.bf16.gmra.mxu2 %vm1318_vm5, %v7015_v59  ;;  %v2900_v14 = vmax.f32 %v2876_v11, 0.0  ;;  %v2699_v44 = vrot.slane %v6685_v1, 1 }
 0x543   :  { %v2825_v43 = vadd.f32 %v2801_v22, %v2512_v0  ;;  %5132 = vmatmul.msk.bf16.gmra.mxu3 %vm1318_vm5, %v2381_v33  ;;  %v7530_v8 = vmul.f32 %v2951_v23, %v2900_v14  ;;  %v2700_v1 = vsel %vm2358_vm3, %v7511_v36, %v2699_v44 }
 0x544   :  { %v2644_v50 = vpop.f32.mrf.mxu2 }
 0x545   :  { %v2849_v28 = vadd.f32 %v2825_v43, %v7286_v51  ;;  %v2645_v59 = vadd.f32 %v2644_v50, %v7054_v37  ;;  %v3117_v53 = vrot.slane %v7530_v8, 1  ;;  %v8893_v43 = vld [vmem:[#allocation53_spill] sm:$0xff] }
 0x546   :  { %v2461_v15 = vpop.f32.mrf.mxu1  ;;  %v2745_v57 = vpop.f32.mrf.mxu3 }
 0x547   :  { %v2877_v7 = vadd.f32 %v7508_v29, %v2849_v28  ;;  %v2746_v16 = vadd.f32 %v2745_v57, %v7280_v30  ;;  %v2305_v30 = vadd.f32 %v7319_v2, %v7033_v3  ;;  %v2961_v3 = vpop.permute.xlu0 %2960  ;;  %v2308_v28 = vadd.f32 %v7329_v54, %v7052_v56 }
 0x549   :  { %v2901_v55 = vmax.f32 %v2877_v7, 0.0  ;;  %v2802_v5 = vadd.f32 %v2746_v16, %v2645_v59  ;;  %5077 = vmatmul.msk.bf16.gmra.mxu1 %vm1318_vm5, %v2381_v33  ;;  %v2514_v22 = vadd.f32 %v2459_v52, %v2305_v30 }
 0x54b   :  { %v3069_v51 = vmul.f32 %v2956_v6, %v2901_v55  ;;  %v2826_v40 = vadd.f32 %v2802_v5, %v2513_v13 }
 0x54c   :  { %v2646_v24 = vpop.f32.mrf.mxu2 }
 0x54d   :  { %v3118_v35 = vrot.slane %v3069_v51, 1  ;;  %v2850_v37 = vadd.f32 %v2826_v40, %v7303_v4  ;;  %v2647_v0 = vadd.f32 %v2646_v24, %v7064_v25 }
 0x54e   :  { %v2463_v48 = vpop.f32.mrf.mxu1  ;;  %v2747_v47 = vpop.f32.mrf.mxu3 }
 0x54f   :  { %v3119_v18 = vsel %vm2358_vm3, %v3117_v53, %v3118_v35  ;;  %v2878_v6 = vadd.f32 %v7508_v29, %v2850_v37  ;;  %v2748_v11 = vadd.f32 %v2747_v47, %v7289_v45  ;;  %v2462_v45 = vadd.f32 %v2461_v15, %v7070_v63  ;;  %v2976_v47 = vpop.permute.xlu0 %2975 }
 0x550   :  { %v3187_v21 = vmax.f32 %v7530_v8, %v3119_v18  ;;  %v2464_v5 = vadd.f32 %v2463_v48, %v7079_v27 }
 0x551   :  { %v2902_v4 = vmax.f32 %v2878_v6, 0.0  ;;  %v2803_v33 = vadd.f32 %v2748_v11, %v2647_v0  ;;  %5105 = vmatmul.msk.bf16.gmra.mxu2 %vm1318_vm5, %v8893_v43  ;;  %v2515_v8 = vadd.f32 %v2462_v45, %v2308_v28 }
 0x553   :  { %v3070_v2 = vmul.f32 %v2961_v3, %v2902_v4  ;;  %v2827_v50 = vadd.f32 %v2803_v33, %v2514_v22  ;;  %5133 = vmatmul.msk.bf16.gmra.mxu3 %vm1318_vm5, %v2700_v1  ;;  %v8897_v33 = vld [vmem:[#allocation36_spill] sm:$0xff]  ;;  %v8898_v1 = vld [vmem:[#allocation61_spill] sm:$0xff] }
 0x554   :  { %v2649_v25 = vpop.f32.mrf.mxu2 }
 0x555   :  { %v3120_v26 = vrot.slane %v3070_v2, 1  ;;  %v2851_v14 = vadd.f32 %v2827_v50, %v7314_v61  ;;  %v2650_v16 = vadd.f32 %v2649_v25, %v7074_v20  ;;  %v7559_v61 = vpop.permute.xlu1 %2980  ;;  %v2310_v20 = vadd.f32 %v7337_v19, %v7062_v49  ;;  %v8899_v50 = vld [vmem:[#allocation17_spill] sm:$0xff] }
 0x556   :  { %v2466_v57 = vpop.f32.mrf.mxu1  ;;  %v2750_v38 = vpop.f32.mrf.mxu3  ;;  %v2313_v25 = vadd.f32 %v7347_v31, %v8899_v50 }
 0x557   :  { %v3121_v7 = vsel %vm2358_vm3, %v3118_v35, %v3120_v26  ;;  %v2879_v59 = vadd.f32 %v7508_v29, %v2851_v14  ;;  %v2751_v23 = vadd.f32 %v2750_v38, %v7308_v17  ;;  %v8894_v35 = vld [vmem:[#allocation52_spill] sm:$0xff]  ;;  %v2516_v27 = vadd.f32 %v2464_v5, %v2310_v20  ;;  %v8900_v14 = vld [vmem:[#allocation18_spill] sm:$0xff]  ;;  %v8903_v5 = vld [vmem:[#allocation63_spill] sm:$0xff] }
 0x558   :  { %v3188_v13 = vmax.f32 %v3069_v51, %v3121_v7  ;;  %v2467_v43 = vadd.f32 %v2466_v57, %v8897_v33  ;;  %v8901_v38 = vld [vmem:[#allocation60_spill] sm:$0xff] }
 0x559   :  { %v2903_v55 = vmax.f32 %v2879_v59, 0.0  ;;  %v2804_v63 = vadd.f32 %v2751_v23, %v2650_v16  ;;  %5078 = vmatmul.msk.bf16.gmra.mxu1 %vm1318_vm5, %v7511_v36 }
 0x55a   :  { %v3232_v49 = vrot.slane %v3188_v13, 1  ;;  %v2517_v57 = vadd.f32 %v2467_v43, %v2313_v25  ;;  %v7589_v13 = vpop.permute.xlu0 %3025 }
 0x55b   :  { %v3071_v56 = vmul.f32 %v2966_v62, %v2903_v55  ;;  %v2828_v54 = vadd.f32 %v2804_v63, %v2515_v8  ;;  %v8902_v63 = vld [vmem:[#allocation8_spill] sm:$0xff] }
 0x55c   :  { %v2651_v15 = vpop.f32.mrf.mxu2 }
 0x55d   :  { %v3122_v40 = vrot.slane %v3071_v56, 1  ;;  %v2852_v24 = vadd.f32 %v2828_v54, %v7325_v42  ;;  %v2652_v36 = vadd.f32 %v2651_v15, %v7083_v60  ;;  %v8895_v42 = vld [vmem:[#allocation51_spill] sm:$0xff]  ;;  %v7578_v22 = vpop.permute.xlu1 %3030 }
 0x55e   :  { %v2468_v17 = vpop.f32.mrf.mxu1  ;;  %v2752_v51 = vpop.f32.mrf.mxu3  ;;  %v8896_v6 = vrot.slane %v8895_v42, 1 }
 0x55f   :  { %v3123_v53 = vsel %vm2358_vm3, %v3120_v26, %v3122_v40  ;;  %v2880_v52 = vadd.f32 %v7508_v29, %v2852_v24  ;;  %v2753_v37 = vadd.f32 %v2752_v51, %v8894_v35  ;;  %v2469_v54 = vadd.f32 %v2468_v17, %v8902_v63  ;;  %v8904_v24 = vld [vmem:[#allocation7_spill] sm:$0xff]  ;;  %v8912_v63 = vld [vmem:[#allocation30_spill] sm:$0xff] }
 0x560   :  { %v7569_v30 = vmax.f32 %v3070_v2, %v3123_v53  ;;  %v2315_v20 = vadd.f32 %v7356_v32, %v8904_v24  ;;  %v8914_v24 = vld [vmem:[#allocation38_spill] sm:$0xff] }
 0x561   :  { %v2904_v48 = vmax.f32 %v2880_v52, 0.0  ;;  %v2805_v18 = vadd.f32 %v2753_v37, %v2652_v36  ;;  %5106 = vmatmul.msk.bf16.gmra.mxu2 %vm1318_vm5, %v8896_v6  ;;  %v8905_v36 = vld [vmem:[#allocation29_spill] sm:$0xff]  ;;  %v8906_v37 = vld [vmem:[#allocation62_spill] sm:$0xff] }
 0x562   :  { %v3233_v19 = vrot.slane %v7569_v30, 1  ;;  %v2518_v17 = vadd.f32 %v2469_v54, %v2315_v20  ;;  %v2320_v20 = vadd.f32 %v7372_v34, %v8914_v24 }
 0x563   :  { %v3072_v0 = vmul.f32 %v7481_v58, %v2904_v48  ;;  %v2829_v11 = vadd.f32 %v2805_v18, %v2516_v27  ;;  %5134 = vmatmul.msk.bf16.gmra.mxu3 %vm1318_vm5, %v2699_v44 }
 0x564   :  { %v3234_v60 = vsel %vm2358_vm3, %v3232_v49, %v3233_v19  ;;  %v2654_v62 = vpop.f32.mrf.mxu2 }
 0x565   :  { %v3297_v4 = vmax.f32 %v3187_v21, %v3234_v60  ;;  %v3124_v3 = vrot.slane %v3072_v0, 1  ;;  %v2853_v2 = vadd.f32 %v2829_v11, %v8898_v1  ;;  %v2655_v28 = vadd.f32 %v2654_v62, %v8900_v14  ;;  %v7599_v27 = vpop.permute.xlu1 %3045  ;;  %v7606_v60 = vpop.permute.xlu0 %3040  ;;  %v8909_v1 = vld [vmem:[#allocation28_spill] sm:$0xff] }
 0x566   :  { %v2471_v45 = vpop.f32.mrf.mxu1  ;;  %v2755_v26 = vpop.f32.mrf.mxu3  ;;  %v8911_v14 = vld [vmem:[#allocation64_spill] sm:$0xff] }
 0x567   :  { %3319 = vst.msk [vmem:[#allocation2] sm:$0xff] %vm1318_vm5, %v3297_v4  ;;  %v3125_v58 = vsel %vm2358_vm3, %v3122_v40, %v3124_v3  ;;  %v2881_v44 = vadd.f32 %v7508_v29, %v2853_v2  ;;  %v2756_v21 = vadd.f32 %v2755_v26, %v8901_v38  ;;  %v8907_v4 = vld [vmem:[#allocation19_spill] sm:$0xff]  ;;  %v2318_v2 = vadd.f32 %v7367_v12, %v8909_v1 }
 0x568   :  { %v3190_v7 = vmax.f32 %v3071_v56, %v3125_v58  ;;  %v2472_v33 = vadd.f32 %v2471_v45, %v8907_v4  ;;  %v8910_v58 = vld [vmem:[#allocation39_spill] sm:$0xff] }
 0x569   :  { %v2905_v59 = vmax.f32 %v2881_v44, 0.0  ;;  %v2806_v16 = vadd.f32 %v2756_v21, %v2655_v28 }
 0x56a   :  { %v3235_v23 = vrot.slane %v3190_v7, 1  ;;  %v2519_v45 = vadd.f32 %v2472_v33, %v2318_v2  ;;  %v8917_v33 = vld [vmem:[#allocation10_spill] sm:$0xff]  ;;  %v8919_v2 = vld [vmem:[#allocation9_spill] sm:$0xff] }
 0x56b   :  { %v3073_v31 = vmul.f32 %v2976_v47, %v2905_v59  ;;  %v2830_v8 = vadd.f32 %v2806_v16, %v2517_v57 }
 0x56c   :  { %v2656_v55 = vpop.f32.mrf.mxu2 }
 0x56d   :  { %v3126_v15 = vrot.slane %v3073_v31, 1  ;;  %v2854_v40 = vadd.f32 %v2830_v8, %v8903_v5  ;;  %v2657_v35 = vadd.f32 %v2656_v55, %v8905_v36  ;;  %v2986_v57 = vpop.permute.xlu1 %2985  ;;  %v8913_v5 = vld [vmem:[#allocation67_spill] sm:$0xff]  ;;  %v8915_v36 = vld [vmem:[#allocation20_spill] sm:$0xff] }
 0x56e   :  { %v2473_v51 = vpop.f32.mrf.mxu1  ;;  %v2757_v53 = vpop.f32.mrf.mxu3 }
 0x56f   :  { %v3127_v56 = vsel %vm2358_vm3, %v3124_v3, %v3126_v15  ;;  %v2882_v52 = vadd.f32 %v7508_v29, %v2854_v40  ;;  %v2758_v47 = vadd.f32 %v2757_v53, %v8906_v37  ;;  %v2474_v54 = vadd.f32 %v2473_v51, %v8912_v63  ;;  %v8916_v37 = vld [vmem:[#allocation66_spill] sm:$0xff] }
 0x570   :  { %v7601_v48 = vmax.f32 %v3072_v0, %v3127_v56  ;;  %v8908_v0 = vld [vmem:[#allocation65_spill] sm:$0xff] }
 0x571   :  { %v2906_v18 = vmax.f32 %v2882_v52, 0.0  ;;  %v2807_v42 = vadd.f32 %v2758_v47, %v2657_v35  ;;  %v7628_v47 = vpop.permute.xlu0 %3015 }
 0x572   :  { %v3237_v6 = vrot.slane %v7601_v48, 1 }
 0x573   :  { %v3074_v32 = vmul.f32 %v7559_v61, %v2906_v18  ;;  %v2831_v49 = vadd.f32 %v2807_v42, %v2518_v17  ;;  %v2520_v17 = vadd.f32 %v2474_v54, %v2320_v20  ;;  %v8922_v54 = vld [vmem:[#allocation70_spill] sm:$0xff] }
 0x574   :  { %v3238_v19 = vsel %vm2358_vm3, %v3235_v23, %v3237_v6  ;;  %v2659_v11 = vpop.f32.mrf.mxu2 }
 0x575   :  { %v3299_v62 = vmax.f32 %v7569_v30, %v3238_v19  ;;  %v3128_v43 = vrot.slane %v3074_v32, 1  ;;  %v2855_v3 = vadd.f32 %v2831_v49, %v8908_v0  ;;  %v2660_v44 = vadd.f32 %v2659_v11, %v8910_v58 }
 0x576   :  { %v2476_v50 = vpop.f32.mrf.mxu1  ;;  %v2760_v25 = vpop.f32.mrf.mxu3 }
 0x577   :  { %3321 = vst.msk [vmem:[#allocation2 + $0x10] sm:$0xff] %vm1318_vm5, %v3299_v62  ;;  %v3129_v61 = vsel %vm2358_vm3, %v3126_v15, %v3128_v43  ;;  %v2883_v26 = vadd.f32 %v7508_v29, %v2855_v3  ;;  %v2761_v30 = vadd.f32 %v2760_v25, %v8911_v14  ;;  %v8918_v3 = vld [vmem:[#allocation69_spill] sm:$0xff] }
 0x578   :  { %v3192_v28 = vmax.f32 %v3073_v31, %v3129_v61  ;;  %v8920_v25 = vld [vmem:[#allocation41_spill] sm:$0xff] }
 0x579   :  { %v2907_v38 = vmax.f32 %v2883_v26, 0.0  ;;  %v2808_v21 = vadd.f32 %v2761_v30, %v2660_v44  ;;  %v8921_v30 = vld [vmem:[#allocation68_spill] sm:$0xff] }
 0x57a   :  { %v3239_v59 = vrot.slane %v3192_v28, 1 }
 0x57b   :  { %v3075_v16 = vmul.f32 %v2986_v57, %v2907_v38  ;;  %v2832_v12 = vadd.f32 %v2808_v21, %v2519_v45  ;;  %v2996_v57 = vpop.permute.xlu0 %2995 }
 0x57c   :  { %v3240_v23 = vsel %vm2358_vm3, %v3237_v6, %v3239_v59  ;;  %v2661_v8 = vpop.f32.mrf.mxu2  ;;  %v2991_v6 = vpop.permute.xlu2 %2990 }
 0x57d   :  { %v3300_v55 = vmax.f32 %v3190_v7, %v3240_v23  ;;  %v3130_v15 = vrot.slane %v3075_v16, 1  ;;  %v2856_v40 = vadd.f32 %v2832_v12, %v8913_v5  ;;  %v2662_v35 = vadd.f32 %v2661_v8, %v8915_v36 }
 0x57e   :  { %v2478_v31 = vpop.f32.mrf.mxu1  ;;  %v2762_v53 = vpop.f32.mrf.mxu3 }
 0x57f   :  { %3322 = vst.msk [vmem:[#allocation2 + $0x18] sm:$0xff] %vm1318_vm5, %v3300_v55  ;;  %v3131_v56 = vsel %vm2358_vm3, %v3128_v43, %v3130_v15  ;;  %v2884_v52 = vadd.f32 %v7508_v29, %v2856_v40  ;;  %v2763_v7 = vadd.f32 %v2762_v53, %v8916_v37  ;;  %v2477_v43 = vadd.f32 %v2476_v50, %v8917_v33  ;;  %v3001_v53 = vpop.permute.xlu1 %3000 }
 0x580   :  { %v3193_v51 = vmax.f32 %v3074_v32, %v3131_v56  ;;  %v2323_v32 = vadd.f32 %v7381_v10, %v8919_v2 }
 0x581   :  { %v2908_v18 = vmax.f32 %v2884_v52, 0.0  ;;  %v2809_v42 = vadd.f32 %v2763_v7, %v2662_v35 }
 0x582   :  { %v3241_v34 = vrot.slane %v3193_v51, 1  ;;  %v2521_v50 = vadd.f32 %v2477_v43, %v2323_v32  ;;  %v8924_v43 = vld [vmem:[#allocation31_spill] sm:$0xff] }
 0x583   :  { %v3076_v49 = vmul.f32 %v2991_v6, %v2908_v18  ;;  %v2833_v19 = vadd.f32 %v2809_v42, %v2520_v17 }
 0x584   :  { %v3242_v11 = vsel %vm2358_vm3, %v3239_v59, %v3241_v34  ;;  %v2664_v62 = vpop.f32.mrf.mxu2 }
 0x585   :  { %v3301_v4 = vmax.f32 %v7601_v48, %v3242_v11  ;;  %v3132_v0 = vrot.slane %v3076_v49, 1  ;;  %v2857_v1 = vadd.f32 %v2833_v19, %v8918_v3  ;;  %v2665_v61 = vadd.f32 %v2664_v62, %v8920_v25  ;;  %v8923_v11 = vld [vmem:[#allocation11_spill] sm:$0xff] }
 0x586   :  { %v2481_v26 = vpop.f32.mrf.mxu1  ;;  %v2765_v58 = vpop.f32.mrf.mxu3 }
 0x587   :  { %3323 = vst.msk [vmem:[#allocation2 + $0x20] sm:$0xff] %vm1318_vm5, %v3301_v4  ;;  %v3133_v44 = vsel %vm2358_vm3, %v3130_v15, %v3132_v0  ;;  %v2885_v14 = vadd.f32 %v7508_v29, %v2857_v1  ;;  %v2766_v48 = vadd.f32 %v2765_v58, %v8921_v30  ;;  %v8926_v26 = vld [vmem:[#allocation22_spill] sm:$0xff] }
 0x588   :  { %v3194_v45 = vmax.f32 %v3075_v16, %v3133_v44 }
 0x589   :  { %v2909_v38 = vmax.f32 %v2885_v14, 0.0  ;;  %v2810_v21 = vadd.f32 %v2766_v48, %v2665_v61  ;;  %v8927_v48 = vld [vmem:[#allocation21_spill] sm:$0xff] }
 0x58a   :  { %v3243_v59 = vrot.slane %v3194_v45, 1 }
 0x58b   :  { %v3077_v12 = vmul.f32 %v2996_v57, %v2909_v38  ;;  %v2834_v10 = vadd.f32 %v2810_v21, %v2521_v50  ;;  %v8929_v38 = vld [vmem:[#allocation43_spill] sm:$0xff] }
 0x58c   :  { %v3244_v23 = vsel %vm2358_vm3, %v3241_v34, %v3243_v59  ;;  %v2666_v8 = vpop.f32.mrf.mxu2  ;;  %v8930_v57 = vld [vmem:[#allocation71_spill] sm:$0xff] }
 0x58d   :  { %v3302_v55 = vmax.f32 %v3192_v28, %v3244_v23  ;;  %v3134_v63 = vrot.slane %v3077_v12, 1  ;;  %v2858_v5 = vadd.f32 %v2834_v10, %v8922_v54  ;;  %v8932_v54 = vld [vmem:[#allocation73_spill] sm:$0xff] }
 0x58e   :  { %v2483_v15 = vpop.f32.mrf.mxu1  ;;  %v2767_v40 = vpop.f32.mrf.mxu3 }
 0x58f   :  { %3324 = vst.msk [vmem:[#allocation2 + $0x28] sm:$0xff] %vm1318_vm5, %v3302_v55  ;;  %v3135_v16 = vsel %vm2358_vm3, %v3132_v0, %v3134_v63  ;;  %v2886_v24 = vadd.f32 %v7508_v29, %v2858_v5  ;;  %v2484_v62 = vadd.f32 %v2483_v15, %v8923_v11  ;;  %v8925_v0 = vld [vmem:[#allocation32_spill] sm:$0xff] }
 0x590   :  { %v3195_v20 = vmax.f32 %v3076_v49, %v3135_v16  ;;  %v8933_v16 = vld [vmem:[#allocation44_spill] sm:$0xff] }
 0x591   :  { %v2910_v31 = vmax.f32 %v2886_v24, 0.0  ;;  %v8934_v24 = vld [vmem:[#allocation78_spill] sm:$0xff] }
 0x592   :  { %v3245_v56 = vrot.slane %v3195_v20, 1  ;;  %v2335_v20 = vadd.f32 %v8934_v24, %v8933_v16 }
 0x593   :  { %v3078_v52 = vmul.f32 %v3001_v53, %v2910_v31  ;;  %v8935_v53 = vld [vmem:[#allocation13_spill] sm:$0xff] }
 0x594   :  { %v3246_v36 = vsel %vm2358_vm3, %v3243_v59, %v3245_v56  ;;  %v2669_v35 = vpop.f32.mrf.mxu2 }
 0x595   :  { %v3303_v28 = vmax.f32 %v3193_v51, %v3246_v36  ;;  %v3136_v37 = vrot.slane %v3078_v52, 1  ;;  %v2330_v51 = vadd.f32 %v7398_v46, %v8924_v43  ;;  %v8936_v52 = vld [vmem:[#allocation72_spill] sm:$0xff] }
 0x596   :  { %v2486_v7 = vpop.f32.mrf.mxu1  ;;  %v2770_v17 = vpop.f32.mrf.mxu3 }
 0x597   :  { %3325 = vst.msk [vmem:[#allocation2 + $0x30] sm:$0xff] %vm1318_vm5, %v3303_v28  ;;  %v3137_v18 = vsel %vm2358_vm3, %v3134_v63, %v3136_v37  ;;  %v2524_v2 = vadd.f32 %v2484_v62, %v2330_v51  ;;  %v2487_v58 = vadd.f32 %v2486_v7, %v8926_v26  ;;  %v8937_v37 = vld [vmem:[#allocation99_spill] sm:$0xff]  ;;  %v8940_v62 = vld [vmem:[#allocation12_spill] sm:$0xff] }
 0x598   :  { %v3196_v42 = vmax.f32 %v3077_v12, %v3137_v18 }
 0x59a   :  { %v3247_v6 = vrot.slane %v3196_v42, 1 }
 0x59c   :  { %v3248_v34 = vsel %vm2358_vm3, %v3245_v56, %v3247_v6  ;;  %v2671_v49 = vpop.f32.mrf.mxu2  ;;  %v8938_v6 = vld [vmem:[#allocation45_spill] sm:$0xff] }
 0x59d   :  { %v3304_v19 = vmax.f32 %v3194_v45, %v3248_v34  ;;  %v2672_v3 = vadd.f32 %v2671_v49, %v8925_v0  ;;  %v8928_v45 = vld [vmem:[#allocation75_spill] sm:$0xff] }
 0x59e   :  { %v2488_v4 = vpop.f32.mrf.mxu1  ;;  %v2772_v33 = vpop.f32.mrf.mxu3  ;;  %v2333_v50 = vadd.f32 %v8928_v45, %v8927_v48  ;;  %v8944_v45 = vld [vmem:[#allocation14_spill] sm:$0xff] }
 0x59f   :  { %3326 = vst.msk [vmem:[#allocation2 + $0x38] sm:$0xff] %vm1318_vm5, %v3304_v19  ;;  %v2773_v1 = vadd.f32 %v2772_v33, %v7384_v39  ;;  %v8939_v19 = vld [vmem:[#allocation76_spill] sm:$0xff] }
 0x5a0   :  { %v2525_v39 = vadd.f32 %v2487_v58, %v2333_v50 }
 0x5a1   :  { %v2813_v32 = vadd.f32 %v2773_v1, %v2672_v3  ;;  %v8942_v3 = vld [vmem:[#allocation24_spill] sm:$0xff] }
 0x5a3   :  { %v2837_v25 = vadd.f32 %v2813_v32, %v2524_v2  ;;  %v8943_v2 = vld [vmem:[#allocation74_spill] sm:$0xff] }
 0x5a4   :  { %v2674_v61 = vpop.f32.mrf.mxu2 }
 0x5a5   :  { %v2861_v44 = vadd.f32 %v2837_v25, %v7394_v41  ;;  %v2675_v21 = vadd.f32 %v2674_v61, %v8929_v38  ;;  %v8931_v41 = vld [vmem:[#allocation33_spill] sm:$0xff]  ;;  %v8945_v38 = vld [vmem:[#allocation79_spill] sm:$0xff] }
 0x5a6   :  { %v2491_v14 = vpop.f32.mrf.mxu1  ;;  %v2775_v30 = vpop.f32.mrf.mxu3  ;;  %v2489_v63 = vadd.f32 %v2488_v4, %v8931_v41  ;;  %v8941_v4 = vld [vmem:[#allocation81_spill] sm:$0xff] }
 0x5a7   :  { %v2889_v46 = vadd.f32 %v7508_v29, %v2861_v44  ;;  %v2776_v59 = vadd.f32 %v2775_v30, %v8930_v57  ;;  %v2492_v34 = vadd.f32 %v2491_v14, %v8938_v6  ;;  %v2338_v33 = vadd.f32 %v8941_v4, %v8940_v62  ;;  %v8946_v57 = vld [vmem:[#allocation23_spill] sm:$0xff]  ;;  %v8949_v41 = vld [vmem:[#allocation77_spill] sm:$0xff] }
 0x5a8   :  { %v2526_v35 = vadd.f32 %v2489_v63, %v2335_v20 }
 0x5a9   :  { %v2913_v12 = vmax.f32 %v2889_v46, 0.0  ;;  %v2814_v10 = vadd.f32 %v2776_v59, %v2675_v21  ;;  %v2527_v26 = vadd.f32 %v2492_v34, %v2338_v33  ;;  %v8947_v59 = vld [vmem:[#allocation84_spill] sm:$0xff] }
 0x5aa   :  { %v8955_v34 = vld [vmem:[#allocation80_spill] sm:$0xff] }
 0x5ab   :  { %v7664_v23 = vmul.f32 %v7628_v47, %v2913_v12  ;;  %v2838_v8 = vadd.f32 %v2814_v10, %v2525_v39  ;;  %v2340_v39 = vadd.f32 %v8947_v59, %v8946_v57  ;;  %v5816_v57 = vld [vmem:[%s8685_s7 + $0x74] sm:$0xf0] }
 0x5ac   :  { %v2676_v55 = vpop.f32.mrf.mxu2 }
 0x5ad   :  { %v2862_v5 = vadd.f32 %v2838_v8, %v8932_v54  ;;  %v2677_v56 = vadd.f32 %v2676_v55, %v8935_v53  ;;  %v3142_v42 = vrot.slane %v7664_v23, 1  ;;  %v8948_v8 = vld [vmem:[#allocation37_spill] sm:$0xff] }
 0x5ae   :  { %v2493_v15 = vpop.f32.mrf.mxu1  ;;  %v2777_v40 = vpop.f32.mrf.mxu3  ;;  %v8950_v53 = vld [vmem:[#allocation25_spill] sm:$0xff] }
 0x5af   :  { %v2890_v31 = vadd.f32 %v7508_v29, %v2862_v5  ;;  %v2778_v36 = vadd.f32 %v2777_v40, %v8936_v52  ;;  %v2494_v50 = vadd.f32 %v2493_v15, %v8944_v45 }
 0x5b1   :  { %v2914_v47 = vmax.f32 %v2890_v31, 0.0  ;;  %v2815_v28 = vadd.f32 %v2778_v36, %v2677_v56  ;;  %v2528_v54 = vadd.f32 %v2494_v50, %v2340_v39  ;;  %v8951_v36 = vld [vmem:[#allocation82_spill] sm:$0xff]  ;;  %v8960_v50 = vld [vmem:[#allocation16_spill] sm:$0xff] }
 0x5b3   :  { %v3082_v7 = vmul.f32 %v8937_v37, %v2914_v47  ;;  %v2839_v17 = vadd.f32 %v2815_v28, %v2526_v35  ;;  %v8952_v47 = vld [vmem:[#allocation34_spill] sm:$0xff] }
 0x5b4   :  { %v2679_v18 = vpop.f32.mrf.mxu2  ;;  %v8953_v28 = vld [vmem:[#allocation86_spill] sm:$0xff] }
 0x5b5   :  { %v3144_v49 = vrot.slane %v3082_v7, 1  ;;  %v2863_v11 = vadd.f32 %v2839_v17, %v8939_v19  ;;  %v2680_v1 = vadd.f32 %v2679_v18, %v8942_v3  ;;  %v2343_v37 = vadd.f32 %v8953_v28, %v8952_v47  ;;  %v8967_v28 = vld [vmem:[#allocation85_spill] sm:$0xff] }
 0x5b6   :  { %v2780_v43 = vpop.f32.mrf.mxu3  ;;  %v2496_v61 = vpop.f32.mrf.mxu1 }
 0x5b7   :  { %v3145_v51 = vsel %vm2358_vm3, %v3142_v42, %v3144_v49  ;;  %v2891_v0 = vadd.f32 %v7508_v29, %v2863_v11  ;;  %v2781_v32 = vadd.f32 %v2780_v43, %v8943_v2  ;;  %v2497_v56 = vadd.f32 %v2496_v61, %v8950_v53  ;;  %v8954_v42 = vld [vmem:[#allocation46_spill] sm:$0xff]  ;;  %v8956_v2 = vld [vmem:[#allocation40_spill] sm:$0xff] }
 0x5b8   :  { %v3200_v25 = vmax.f32 %v7664_v23, %v3145_v51 }
 0x5b9   :  { %v2915_v58 = vmax.f32 %v2891_v0, 0.0  ;;  %v2816_v44 = vadd.f32 %v2781_v32, %v2680_v1  ;;  %v2529_v19 = vadd.f32 %v2497_v56, %v2343_v37 }
 0x5bb   :  { %v3083_v14 = vmul.f32 %v7589_v13, %v2915_v58  ;;  %v2840_v30 = vadd.f32 %v2816_v44, %v2527_v26  ;;  %v8957_v26 = vld [vmem:[#allocation35_spill] sm:$0xff] }
 0x5bc   :  { %v2681_v48 = vpop.f32.mrf.mxu2  ;;  %v8958_v44 = vld [vmem:[#allocation47_spill] sm:$0xff] }
 0x5bd   :  { %v3146_v46 = vrot.slane %v3083_v14, 1  ;;  %v2864_v21 = vadd.f32 %v2840_v30, %v8945_v38  ;;  %v2682_v55 = vadd.f32 %v2681_v48, %v8948_v8  ;;  %v8961_v38 = vld [vmem:[#allocation83_spill] sm:$0xff] }
 0x5be   :  { %v2782_v12 = vpop.f32.mrf.mxu3  ;;  %v2498_v16 = vpop.f32.mrf.mxu1 }
 0x5bf   :  { %v3147_v10 = vsel %vm2358_vm3, %v3144_v49, %v3146_v46  ;;  %v2892_v23 = vadd.f32 %v7508_v29, %v2864_v21  ;;  %v2783_v63 = vadd.f32 %v2782_v12, %v8949_v41  ;;  %v2499_v32 = vadd.f32 %v2498_v16, %v8956_v2  ;;  %v8964_v16 = vld [vmem:[#allocation15_spill] sm:$0xff] }
 0x5c0   :  { %v3201_v13 = vmax.f32 %v3082_v7, %v3147_v10 }
 0x5c1   :  { %v2916_v5 = vmax.f32 %v2892_v23, 0.0  ;;  %v2817_v40 = vadd.f32 %v2783_v63, %v2682_v55 }
 0x5c2   :  { %v3257_v15 = vrot.slane %v3201_v13, 1  ;;  %v8962_v13 = vld [vmem:[#allocation48_spill] sm:$0xff] }
 0x5c3   :  { %v3084_v24 = vmul.f32 %v7578_v22, %v2916_v5  ;;  %v2841_v20 = vadd.f32 %v2817_v40, %v2528_v54  ;;  %v8963_v40 = vld [vmem:[#allocation87_spill] sm:$0xff] }
 0x5c4   :  { %v2684_v31 = vpop.f32.mrf.mxu2 }
 0x5c5   :  { %v3148_v52 = vrot.slane %v3084_v24, 1  ;;  %v2865_v35 = vadd.f32 %v2841_v20, %v8951_v36  ;;  %v2685_v6 = vadd.f32 %v2684_v31, %v8954_v42 }
 0x5c6   :  { %v2785_v17 = vpop.f32.mrf.mxu3  ;;  %v2501_v0 = vpop.f32.mrf.mxu1 }
 0x5c7   :  { %v3149_v7 = vsel %vm2358_vm3, %v3146_v46, %v3148_v52  ;;  %v2893_v18 = vadd.f32 %v7508_v29, %v2865_v35  ;;  %v2786_v49 = vadd.f32 %v2785_v17, %v8955_v34  ;;  %v2502_v54 = vadd.f32 %v2501_v0, %v8962_v13  ;;  %v5257_v17 = vld [vmem:[%s8685_s7 + $0xf0] sm:$0xf]  ;;  %v5848_v34 = vld [vmem:[%s8685_s7 + $0x174] sm:$0xf0] }
 0x5c8   :  { %v7702_v22 = vmax.f32 %v3083_v14, %v3149_v7  ;;  %v8959_v14 = vld [vmem:[#allocation89_spill] sm:$0xff] }
 0x5c9   :  { %v2917_v11 = vmax.f32 %v2893_v18, 0.0  ;;  %v2818_v62 = vadd.f32 %v2786_v49, %v2685_v6  ;;  %v2345_v30 = vadd.f32 %v8959_v14, %v8958_v44  ;;  %v5832_v7 = vld [vmem:[%s8685_s7 + $0xf4] sm:$0xf0]  ;;  %v5321_v6 = vld [vmem:[%s8685_s7 + $0x170] sm:$0xf]  ;;  %v8970_v14 = vld [vmem:[#allocation26_spill] sm:$0xff] }
 0x5ca   :  { %v3259_v4 = vrot.slane %v7702_v22, 1  ;;  %v5258_v42 = vor.u32 %v5832_v7, %v5257_v17  ;;  %v5814_v17 = vld [vmem:[%s8685_s7 + $0x64] sm:$0xf0] }
 0x5cb   :  { %v3085_v33 = vmul.f32 %v7501_v9, %v2917_v11  ;;  %v2842_v43 = vadd.f32 %v2818_v62, %v2529_v19  ;;  %v2530_v12 = vadd.f32 %v2499_v32, %v2345_v30  ;;  %v5322_v62 = vor.u32 %v5848_v34, %v5321_v6  ;;  %v8968_v32 = vld [vmem:[#allocation50_spill] sm:$0xff] }
 0x5cc   :  { %v3260_v51 = vsel %vm2358_vm3, %v3257_v15, %v3259_v4  ;;  %v2686_v3 = vpop.f32.mrf.mxu2  ;;  %4241 = vmatpush.bf16.msra.mxu2 %v5258_v42  ;;  %v8971_v30 = vld [vmem:[#allocation94_spill] sm:$0xff] }
 0x5cd   :  { %v3310_v1 = vmax.f32 %v3200_v25, %v3260_v51  ;;  %v3150_v61 = vrot.slane %v3085_v33, 1  ;;  %v2866_v58 = vadd.f32 %v2842_v43, %v8957_v26  ;;  %v2687_v46 = vadd.f32 %v2686_v3, %v8960_v50  ;;  %v5193_v25 = vld [vmem:[%s8685_s7 + $0x70] sm:$0xf]  ;;  %4254 = vmatpush.bf16.msrb.mxu3 %v5322_v62  ;;  %v5249_v6 = vld [vmem:[%s8685_s7 + $0xe0] sm:$0xf] }
 0x5ce   :  { %v2787_v48 = vpop.f32.mrf.mxu3  ;;  %v5194_v39 = vor.u32 %v5816_v57, %v5193_v25  ;;  %v2503_v31 = vpop.f32.mrf.mxu1  ;;  %v8972_v50 = vld [vmem:[#allocation55_spill] sm:$0xff] }
 0x5cf   :  { %3332 = vst.msk [vmem:[#allocation2 + $0x68] sm:$0xff] %vm1318_vm5, %v3310_v1  ;;  %v3151_v45 = vsel %vm2358_vm3, %v3148_v52, %v3150_v61  ;;  %v2894_v9 = vadd.f32 %v7508_v29, %v2866_v58  ;;  %v2788_v21 = vadd.f32 %v2787_v48, %v8961_v38  ;;  %v8969_v58 = vld [vmem:[#allocation27_spill] sm:$0xff]  ;;  %v2350_v48 = vadd.f32 %v8971_v30, %v8970_v14  ;;  %v8973_v38 = vld [vmem:[#allocation88_spill] sm:$0xff] }
 0x5d0   :  { %v7722_v59 = vmax.f32 %v3084_v24, %v3151_v45  ;;  %4228 = vmatpush.bf16.msra.mxu1 %v5194_v39  ;;  %v8965_v24 = vld [vmem:[#allocation91_spill] sm:$0xff] }
 0x5d1   :  { %v2918_v10 = vmax.f32 %v2894_v9, 0.0  ;;  %v2819_v23 = vadd.f32 %v2788_v21, %v2687_v46  ;;  %v2348_v20 = vadd.f32 %v8965_v24, %v8964_v16  ;;  %v8976_v24 = vld [vmem:[#allocation42_spill] sm:$0xff] }
 0x5d2   :  { %v3261_v8 = vrot.slane %v7722_v59, 1  ;;  %v5830_v34 = vld [vmem:[%s8685_s7 + $0xe4] sm:$0xf0] }
 0x5d3   :  { %v3086_v55 = vmul.f32 %v7606_v60, %v2918_v10  ;;  %v2843_v41 = vadd.f32 %v2819_v23, %v2530_v12  ;;  %v8966_v60 = vld [vmem:[#allocation49_spill] sm:$0xff]  ;;  %v2531_v49 = vadd.f32 %v2502_v54, %v2348_v20  ;;  %v3051_v10 = vpop.permute.xlu2 %3050  ;;  %v8977_v20 = vld [vmem:[#allocation96_spill] sm:$0xff] }
 0x5d4   :  { %v2689_v63 = vpop.f32.mrf.mxu2 }
 0x5d5   :  { %v3152_v5 = vrot.slane %v3086_v55, 1  ;;  %v2867_v15 = vadd.f32 %v2843_v41, %v8963_v40  ;;  %v2690_v47 = vadd.f32 %v2689_v63, %v8966_v60 }
 0x5d6   :  { %v2790_v53 = vpop.f32.mrf.mxu3  ;;  %v3357_v56 = vld [vmem:[#allocation2 + $0x6] ss:$104 sm:$0x3]  ;;  %v3346_v52 = vld [vmem:[#allocation2 + $0x2] ss:$104 sm:$0x3]  ;;  %v2506_v25 = vpop.f32.mrf.mxu1 }
 0x5d7   :  { %v3153_v36 = vsel %vm2358_vm3, %v3150_v61, %v3152_v5  ;;  %v2895_v35 = vadd.f32 %v7508_v29, %v2867_v15  ;;  %v2791_v37 = vadd.f32 %v2790_v53, %v8967_v28  ;;  %3359 = vrot.lane.b32.xlu1 %v3357_v56, %s5988_s12  ;;  %3348 = vrot.lane.b32.xlu0 %v3346_v52, %s5988_s12  ;;  %v3354_v4 = vld [vmem:[#allocation2 + $0x4] ss:$104 sm:$0x3]  ;;  %v3342_v43 = vld [vmem:[#allocation2] ss:$104 sm:$0x3] }
 0x5d8   :  { %v7740_v18 = vmax.f32 %v3085_v33, %v3153_v36  ;;  %3355 = vst.msk [vmem:[#allocation3 + $0x2] sm:$0x3] %vm3343_vm7, %v3354_v4  ;;  %v2504_v61 = vadd.f32 %v2503_v31, %v8968_v32  ;;  %v8975_v15 = vld [vmem:[#allocation92_spill] sm:$0xff]  ;;  %v2353_v31 = vadd.f32 %v8977_v20, %v8976_v24  ;;  %v8978_v53 = vld [vmem:[#allocation57_spill] sm:$0xff]  ;;  %v5250_v4 = vor.u32 %v5830_v34, %v5249_v6 }
 0x5d9   :  { %v2919_v19 = vmax.f32 %v2895_v35, 0.0  ;;  %v2820_v11 = vadd.f32 %v2791_v37, %v2690_v47  ;;  %3344 = vst.msk [vmem:[#allocation3] sm:$0x3] %vm3343_vm7, %v3342_v43  ;;  %v8979_v47 = vld [vmem:[#allocation90_spill] sm:$0xff]  ;;  %v5177_v43 = vld [vmem:[%s8685_s7 + $0x50] sm:$0xf] }
 0x5da   :  { %v3263_v33 = vrot.slane %v7740_v18, 1  ;;  %v2532_v57 = vadd.f32 %v2504_v61, %v2350_v48  ;;  %v5185_v37 = vld [vmem:[%s8685_s7 + $0x60] sm:$0xf]  ;;  %4242 = vmatpush.bf16.msra.mxu2 %v5250_v4  ;;  %v5842_v4 = vld [vmem:[%s8685_s7 + $0x144] sm:$0xf0] }
 0x5db   :  { %v3087_v51 = vmul.f32 %v7599_v27, %v2919_v19  ;;  %v2844_v0 = vadd.f32 %v2820_v11, %v2531_v49  ;;  %v5186_v42 = vor.u32 %v5814_v17, %v5185_v37  ;;  %v5313_v49 = vld [vmem:[%s8685_s7 + $0x160] sm:$0xf] }
 0x5dc   :  { %v3264_v3 = vsel %vm2358_vm3, %v3261_v8, %v3263_v33  ;;  %v2691_v1 = vpop.f32.mrf.mxu2  ;;  %v8980_v48 = vld [vmem:[#allocation58_spill] sm:$0xff] }
 0x5dd   :  { %v3312_v2 = vmax.f32 %v7702_v22, %v3264_v3  ;;  %v3154_v26 = vrot.slane %v3087_v51, 1  ;;  %v2868_v44 = vadd.f32 %v2844_v0, %v8969_v58  ;;  %v2692_v46 = vadd.f32 %v2691_v1, %v8972_v50  ;;  %4229 = vmatpush.bf16.msra.mxu1 %v5186_v42  ;;  %v5169_v42 = vld [vmem:[%s8685_s7 + $0x40] sm:$0xf] }
 0x5de   :  { %v2792_v45 = vpop.f32.mrf.mxu3  ;;  %v2508_v3 = vpop.f32.mrf.mxu1 }
 0x5df   :  { %3334 = vst.msk [vmem:[#allocation2 + $0x78] sm:$0xff] %vm1318_vm5, %v3312_v2  ;;  %v3155_v27 = vsel %vm2358_vm3, %v3152_v5, %v3154_v26  ;;  %v2896_v9 = vadd.f32 %v7508_v29, %v2868_v44  ;;  %v2793_v21 = vadd.f32 %v2792_v45, %v8973_v38  ;;  %v8974_v5 = vld [vmem:[#allocation56_spill] sm:$0xff]  ;;  %v2509_v45 = vadd.f32 %v2508_v3, %v8980_v48  ;;  %v8983_v38 = vld [vmem:[#allocation98_spill] sm:$0xff] }
 0x5e0   :  { %v7765_v22 = vmax.f32 %v3086_v55, %v3155_v27  ;;  %v2507_v40 = vadd.f32 %v2506_v25, %v8974_v5  ;;  %v5812_v2 = vld [vmem:[%s8685_s7 + $0x54] sm:$0xf0]  ;;  %v8984_v25 = vld [vmem:[#allocation59_spill] sm:$0xff] }
 0x5e1   :  { %v2920_v39 = vmax.f32 %v2896_v9, 0.0  ;;  %v2821_v12 = vadd.f32 %v2793_v21, %v2692_v46  ;;  %v8981_v9 = vld [vmem:[#allocation95_spill] sm:$0xff]  ;;  %v8982_v46 = vld [vmem:[#allocation54_spill] sm:$0xff]  ;;  %v5808_v3 = vld [vmem:[%s8685_s7 + $0x34] sm:$0xf0] }
 0x5e2   :  { %v3265_v23 = vrot.slane %v7765_v22, 1  ;;  %v2533_v19 = vadd.f32 %v2507_v40, %v2353_v31  ;;  %v2355_v21 = vadd.f32 %v8983_v38, %v8982_v46  ;;  %v5305_v40 = vld [vmem:[%s8685_s7 + $0x150] sm:$0xf]  ;;  %v3061_v31 = vpop.permute.xlu1 %3060 }
 0x5e3   :  { %v7768_v8 = vmul.f32 %v3051_v10, %v2920_v39  ;;  %v2845_v41 = vadd.f32 %v2821_v12, %v2532_v57 }
 0x5e4   :  { %v3266_v63 = vsel %vm2358_vm3, %v3263_v33, %v3265_v23  ;;  %v2694_v13 = vpop.f32.mrf.mxu2  ;;  %v5846_v33 = vld [vmem:[%s8685_s7 + $0x164] sm:$0xf0] }
 0x5e5   :  { %v3313_v54 = vmax.f32 %v7722_v59, %v3266_v63  ;;  %v3156_v55 = vrot.slane %v7768_v8, 1  ;;  %v2869_v16 = vadd.f32 %v2845_v41, %v8975_v15  ;;  %v2695_v56 = vadd.f32 %v2694_v13, %v8978_v53  ;;  %v5241_v63 = vld [vmem:[%s8685_s7 + $0xd0] sm:$0xf]  ;;  %v5828_v13 = vld [vmem:[%s8685_s7 + $0xd4] sm:$0xf0] }
 0x5e6   :  { %v2795_v52 = vpop.f32.mrf.mxu3  ;;  %v3367_v36 = vld [vmem:[#allocation2 + $0x14] ss:$104 sm:$0x3]  ;;  %v3364_v35 = vld [vmem:[#allocation2 + $0x12] ss:$104 sm:$0x3]  ;;  %v5314_v1 = vor.u32 %v5846_v33, %v5313_v49  ;;  %v5242_v5 = vor.u32 %v5828_v13, %v5241_v63  ;;  %v2534_v15 = vadd.f32 %v2509_v45, %v2355_v21 }
 0x5e7   :  { %3335 = vst.msk [vmem:[#allocation2 + $0x80] sm:$0xff] %vm1318_vm5, %v3313_v54  ;;  %v3157_v60 = vsel %vm2358_vm3, %v3154_v26, %v3156_v55  ;;  %v2897_v59 = vadd.f32 %v7508_v29, %v2869_v16  ;;  %v2796_v28 = vadd.f32 %v2795_v52, %v8979_v47  ;;  %3369 = vrot.lane.b32.xlu2 %v3367_v36, %s5988_s12  ;;  %v3374_v58 = vld [vmem:[#allocation2 + $0x16] ss:$104 sm:$0x3]  ;;  %v5233_v49 = vld [vmem:[%s8685_s7 + $0xc0] sm:$0xf] }
 0x5e8   :  { %v7789_v7 = vmax.f32 %v3087_v51, %v3157_v60  ;;  %v3056_v51 = vpop.permute.xlu0 %3055  ;;  %3365 = vst.msk [vmem:[#allocation3 + $0x4] sm:$0x3] %vm3343_vm7, %v3364_v35  ;;  %v5178_v26 = vor.u32 %v5812_v2, %v5177_v43  ;;  %4255 = vmatpush.bf16.msrb.mxu3 %v5314_v1  ;;  %4243 = vmatpush.bf16.msra.mxu2 %v5242_v5  ;;  %v8986_v60 = vld [vmem:[#allocation97_spill] sm:$0xff]  ;;  %v5161_v33 = vld [vmem:[%s8685_s7 + $0x30] sm:$0xf]  ;;  %v3066_v43 = vpop.permute.xlu2 %3065 }
 0x5e9   :  { %v2921_v11 = vmax.f32 %v2897_v59, 0.0  ;;  %v2822_v62 = vadd.f32 %v2796_v28, %v2695_v56  ;;  %3375 = vst.msk [vmem:[#allocation3 + $0x6] sm:$0x3] %vm3343_vm7, %v3374_v58  ;;  %v5225_v1 = vld [vmem:[%s8685_s7 + $0xb0] sm:$0xf] }
 0x5ea   :  { %v3267_v0 = vrot.slane %v7789_v7, 1  ;;  %4230 = vmatpush.bf16.msra.mxu1 %v5178_v26  ;;  %v5217_v63 = vld [vmem:[%s8685_s7 + $0xa0] sm:$0xf] }
 0x5eb   :  { %v3089_v32 = vmul.f32 %v3056_v51, %v2921_v11  ;;  %v2846_v61 = vadd.f32 %v2822_v62, %v2533_v19  ;;  %v5297_v19 = vld [vmem:[%s8685_s7 + $0x140] sm:$0xf] }
 0x5ec   :  { %v3268_v44 = vsel %vm2358_vm3, %v3265_v23, %v3267_v0  ;;  %v2696_v14 = vpop.f32.mrf.mxu2  ;;  %v5281_v5 = vld [vmem:[%s8685_s7 + $0x120] sm:$0xf] }
 0x5ed   :  { %v3314_v30 = vmax.f32 %v7740_v18, %v3268_v44  ;;  %v3158_v27 = vrot.slane %v3089_v32, 1  ;;  %v2870_v50 = vadd.f32 %v2846_v61, %v8981_v9  ;;  %v2697_v57 = vadd.f32 %v2696_v14, %v8984_v25  ;;  %v8985_v18 = vld [vmem:[#allocation93_spill] sm:$0xff] }
 0x5ee   :  { %v2797_v39 = vpop.f32.mrf.mxu3  ;;  %v3377_v12 = vld [vmem:[#allocation2 + $0x18] ss:$104 sm:$0x3]  ;;  %v5824_v61 = vld [vmem:[%s8685_s7 + $0xb4] sm:$0xf0] }
 0x5ef   :  { %3336 = vst.msk [vmem:[#allocation2 + $0x88] sm:$0xff] %vm1318_vm5, %v3314_v30  ;;  %v3159_v10 = vsel %vm2358_vm3, %v3156_v55, %v3158_v27  ;;  %v2898_v23 = vadd.f32 %v7508_v29, %v2870_v50  ;;  %v2798_v41 = vadd.f32 %v2797_v39, %v8985_v18  ;;  %3379 = vrot.lane.b32.xlu0 %v3377_v12, %s5988_s12  ;;  %v5844_v55 = vld [vmem:[%s8685_s7 + $0x154] sm:$0xf0]  ;;  %v2936_v39 = vld [vmem:[%s8684_s6 + $0x60] sm:$0xff]  ;;  %v5289_v12 = vld [vmem:[%s8685_s7 + $0x130] sm:$0xf] }
 0x5f0   :  { %v7831_v54 = vmax.f32 %v7768_v8, %v3159_v10  ;;  %v5306_v20 = vor.u32 %v5844_v55, %v5305_v40  ;;  %v5226_v58 = vor.u32 %v5824_v61, %v5225_v1  ;;  %v5840_v10 = vld [vmem:[%s8685_s7 + $0x134] sm:$0xf0]  ;;  %v5153_v18 = vld [vmem:[%s8685_s7 + $0x20] sm:$0xf]  ;;  %v5838_v40 = vld [vmem:[%s8685_s7 + $0x124] sm:$0xf0] }
 0x5f1   :  { %v2922_v16 = vmax.f32 %v2898_v23, 0.0  ;;  %v2823_v24 = vadd.f32 %v2798_v41, %v2697_v57  ;;  %v5290_v23 = vor.u32 %v5840_v10, %v5289_v12  ;;  %v5806_v41 = vld [vmem:[%s8685_s7 + $0x24] sm:$0xf0] }
 0x5f2   :  { %v3269_v53 = vrot.slane %v7831_v54, 1  ;;  %4256 = vmatpush.bf16.msrb.mxu3 %v5306_v20  ;;  %v5154_v13 = vor.u32 %v5806_v41, %v5153_v18  ;;  %v5209_v20 = vld [vmem:[%s8685_s7 + $0x90] sm:$0xf]  ;;  %v5878_v1 = vld [vmem:[%s8685_s7 + $0x264] sm:$0xf0] }
 0x5f3   :  { %v3090_v56 = vmul.f32 %v3061_v31, %v2922_v16  ;;  %v2847_v8 = vadd.f32 %v2823_v24, %v2534_v15  ;;  %v5282_v15 = vor.u32 %v5838_v40, %v5281_v5  ;;  %v5145_v16 = vld [vmem:[%s8685_s7 + $0x10] sm:$0xf]  ;;  %v5804_v24 = vld [vmem:[%s8685_s7 + $0x14] sm:$0xf0]  ;;  %v5894_v61 = vld [vmem:[%s8685_s7 + $0x2e4] sm:$0xf0] }
 0x5f4   :  { %v3270_v52 = vsel %vm2358_vm3, %v3267_v0, %v3269_v53  ;;  %v5298_v0 = vor.u32 %v5842_v4, %v5297_v19  ;;  %v5146_v31 = vor.u32 %v5804_v24, %v5145_v16  ;;  %v5880_v19 = vld [vmem:[%s8685_s7 + $0x274] sm:$0xf0]  ;;  %v5890_v10 = vld [vmem:[%s8685_s7 + $0x2c4] sm:$0xf0]  ;;  %v5417_v5 = vld [vmem:[%s8685_s7 + $0x230] sm:$0xf] }
 0x5f5   :  { %v3315_v36 = vmax.f32 %v7765_v22, %v3270_v52  ;;  %v3160_v35 = vrot.slane %v3090_v56, 1  ;;  %v2871_v59 = vadd.f32 %v2847_v8, %v8986_v60  ;;  %v5810_v22 = vld [vmem:[%s8685_s7 + $0x44] sm:$0xf0]  ;;  %v5836_v8 = vld [vmem:[%s8685_s7 + $0x114] sm:$0xf0] }
 0x5f6   :  { %v3387_v47 = vld [vmem:[#allocation2 + $0x26] ss:$104 sm:$0x3]  ;;  %v3384_v28 = vld [vmem:[#allocation2 + $0x24] ss:$104 sm:$0x3]  ;;  %v5170_v34 = vor.u32 %v5810_v22, %v5169_v42  ;;  %4257 = vmatpush.bf16.msrb.mxu3 %v5298_v0 }
 0x5f7   :  { %3337 = vst.msk [vmem:[#allocation2 + $0x90] sm:$0xff] %vm1318_vm5, %v3315_v36  ;;  %v3161_v37 = vsel %vm2358_vm3, %v3158_v27, %v3160_v35  ;;  %v2899_v17 = vadd.f32 %v7508_v29, %v2871_v59  ;;  %3389 = vrot.lane.b32.xlu1 %v3387_v47, %s5988_s12  ;;  %v5826_v29 = vld [vmem:[%s8685_s7 + $0xc4] sm:$0xf0]  ;;  %v5385_v59 = vld [vmem:[%s8685_s7 + $0x1f0] sm:$0xf] }
 0x5f8   :  { %v3208_v6 = vmax.f32 %v3089_v32, %v3161_v37  ;;  %v5234_v62 = vor.u32 %v5826_v29, %v5233_v49  ;;  %4231 = vmatpush.bf16.msra.mxu1 %v5170_v34  ;;  %v5162_v32 = vor.u32 %v5808_v3, %v5161_v33  ;;  %3385 = vst.msk [vmem:[#allocation3 + $0x8] sm:$0x3] %vm3343_vm7, %v3384_v28  ;;  %v5802_v60 = vld [vmem:[%s8685_s7 + $0x4] sm:$0xf0]  ;;  %v5864_v47 = vld [vmem:[%s8685_s7 + $0x1f4] sm:$0xf0] }
 0x5f9   :  { %v2923_v11 = vmax.f32 %v2899_v17, 0.0  ;;  %v5201_v28 = vld [vmem:[%s8685_s7 + $0x80] sm:$0xf]  ;;  %v5818_v37 = vld [vmem:[%s8685_s7 + $0x84] sm:$0xf0] }
 0x5fa   :  { %v3271_v51 = vrot.slane %v3208_v6, 1  ;;  %4244 = vmatpush.bf16.msra.mxu2 %v5234_v62  ;;  %4258 = vmatpush.bf16.msrb.mxu3 %v5290_v23  ;;  %v5265_v17 = vld [vmem:[%s8685_s7 + $0x100] sm:$0xf]  ;;  %v5834_v42 = vld [vmem:[%s8685_s7 + $0x104] sm:$0xf0]  ;;  %v5386_v6 = vor.u32 %v5864_v47, %v5385_v59  ;;  %v5202_v34 = vor.u32 %v5818_v37, %v5201_v28 }
 0x5fb   :  { %v3091_v2 = vmul.f32 %v3066_v43, %v2923_v11  ;;  %v5266_v49 = vor.u32 %v5834_v42, %v5265_v17  ;;  %v5449_v29 = vld [vmem:[%s8685_s7 + $0x270] sm:$0xf]  ;;  %v5896_v4 = vld [vmem:[%s8685_s7 + $0x2f4] sm:$0xf0]  ;;  %v5377_v33 = vld [vmem:[%s8685_s7 + $0x1e0] sm:$0xf] }
 0x5fc   :  { %v3272_v26 = vsel %vm2358_vm3, %v3269_v53, %v3271_v51  ;;  %4232 = vmatpush.bf16.msra.mxu1 %v5162_v32  ;;  %v5820_v53 = vld [vmem:[%s8685_s7 + $0x94] sm:$0xf0]  ;;  %v5513_v11 = vld [vmem:[%s8685_s7 + $0x2f0] sm:$0xf]  ;;  %v5450_v62 = vor.u32 %v5880_v19, %v5449_v29  ;;  %v5862_v43 = vld [vmem:[%s8685_s7 + $0x1e4] sm:$0xf0] }
 0x5fd   :  { %v3316_v44 = vmax.f32 %v7789_v7, %v3272_v26  ;;  %v3162_v14 = vrot.slane %v3091_v2, 1  ;;  %v2935_v7 = vld [vmem:[%s8684_s6 + $0x58] sm:$0xff]  ;;  %v5210_v52 = vor.u32 %v5820_v53, %v5209_v20  ;;  %v5378_v0 = vor.u32 %v5862_v43, %v5377_v33  ;;  %v5441_v3 = vld [vmem:[%s8685_s7 + $0x260] sm:$0xf]  ;;  %v5369_v26 = vld [vmem:[%s8685_s7 + $0x1d0] sm:$0xf] }
 0x5fe   :  { %v3397_v30 = vld [vmem:[#allocation2 + $0x2a] ss:$104 sm:$0x3]  ;;  %v3394_v48 = vld [vmem:[#allocation2 + $0x28] ss:$104 sm:$0x3]  ;;  %4245 = vmatpush.bf16.msra.mxu2 %v5226_v58  ;;  %4259 = vmatpush.bf16.msrb.mxu3 %v5282_v15  ;;  %v5442_v32 = vor.u32 %v5878_v1, %v5441_v3 }
 0x5ff   :  { %3338 = vst.msk [vmem:[#allocation2 + $0x98] sm:$0xff] %vm1318_vm5, %v3316_v44  ;;  %v3163_v45 = vsel %vm2358_vm3, %v3160_v35, %v3162_v14  ;;  %3399 = vrot.lane.b32.xlu2 %v3397_v30, %s5988_s12  ;;  %v5137_v35 = vld [vmem:[%s8685_s7] sm:$0xf]  ;;  %v5860_v58 = vld [vmem:[%s8685_s7 + $0x1d4] sm:$0xf0] }
 0x600   :  { %v3209_v27 = vmax.f32 %v3090_v56, %v3163_v45  ;;  %3395 = vst.msk [vmem:[#allocation3 + $0xa] sm:$0x3] %vm3343_vm7, %v3394_v48  ;;  %4233 = vmatpush.bf16.msra.mxu1 %v5154_v13  ;;  %v5273_v56 = vld [vmem:[%s8685_s7 + $0x110] sm:$0xf]  ;;  %v5138_v22 = vor.u32 %v5802_v60, %v5137_v35  ;;  %v5505_v2 = vld [vmem:[%s8685_s7 + $0x2e0] sm:$0xf]  ;;  %v5370_v14 = vor.u32 %v5860_v58, %v5369_v26 }
 0x601   :  { %v5274_v36 = vor.u32 %v5836_v8, %v5273_v56  ;;  %v5506_v44 = vor.u32 %v5894_v61, %v5505_v2  ;;  %v5433_v48 = vld [vmem:[%s8685_s7 + $0x250] sm:$0xf]  ;;  %v5876_v45 = vld [vmem:[%s8685_s7 + $0x254] sm:$0xf0]  ;;  %v5345_v24 = vld [vmem:[%s8685_s7 + $0x1a0] sm:$0xf] }
 0x602   :  { %v3273_v9 = vrot.slane %v3209_v27, 1  ;;  %v5497_v27 = vld [vmem:[%s8685_s7 + $0x2d0] sm:$0xf]  ;;  %v5856_v18 = vld [vmem:[%s8685_s7 + $0x1b4] sm:$0xf0] }
 0x603   :  { %4260 = vmatpush.bf16.msrb.mxu3 %v5274_v36  ;;  %v5353_v23 = vld [vmem:[%s8685_s7 + $0x1b0] sm:$0xf]  ;;  %v5872_v40 = vld [vmem:[%s8685_s7 + $0x234] sm:$0xf0]  ;;  %v5409_v53 = vld [vmem:[%s8685_s7 + $0x220] sm:$0xf] }
 0x604   :  { %v3274_v50 = vsel %vm2358_vm3, %v3271_v51, %v3273_v9  ;;  %4234 = vmatpush.bf16.msra.mxu1 %v5146_v31  ;;  %v5514_v51 = vor.u32 %v5896_v4, %v5513_v11  ;;  %v5434_v9 = vor.u32 %v5876_v45, %v5433_v48  ;;  %v5481_v15 = vld [vmem:[%s8685_s7 + $0x2b0] sm:$0xf]  ;;  %v5888_v16 = vld [vmem:[%s8685_s7 + $0x2b4] sm:$0xf0]  ;;  %v5854_v31 = vld [vmem:[%s8685_s7 + $0x1a4] sm:$0xf0] }
 0x605   :  { %v3317_v46 = vmax.f32 %v7831_v54, %v3274_v50  ;;  %v5822_v54 = vld [vmem:[%s8685_s7 + $0xa4] sm:$0xf0]  ;;  %v5892_v50 = vld [vmem:[%s8685_s7 + $0x2d4] sm:$0xf0]  ;;  %v5482_v20 = vor.u32 %v5888_v16, %v5481_v15  ;;  %v5346_v8 = vor.u32 %v5854_v31, %v5345_v24  ;;  %v5473_v36 = vld [vmem:[%s8685_s7 + $0x2a0] sm:$0xf] }
 0x606   :  { %v3404_v38 = vld [vmem:[#allocation2 + $0x36] ss:$104 sm:$0x3]  ;;  %v5218_v55 = vor.u32 %v5822_v54, %v5217_v63  ;;  %v5354_v54 = vor.u32 %v5856_v18, %v5353_v23  ;;  %v5870_v56 = vld [vmem:[%s8685_s7 + $0x224] sm:$0xf0] }
 0x607   :  { %3339 = vst.msk [vmem:[#allocation2 + $0xa0] sm:$0xff] %vm1318_vm5, %v3317_v46  ;;  %3005 = vperm.xlu2 %5956, %v2935_v7   ;;  %4261 = vmatpush.bf16.msrb.mxu3 %v5266_v49  ;;  %v5361_v7 = vld [vmem:[%s8685_s7 + $0x1c0] sm:$0xf]  ;;  %v5858_v46 = vld [vmem:[%s8685_s7 + $0x1c4] sm:$0xf0] }
 0x608   :  { %3405 = vst.msk [vmem:[#allocation3 + $0xc] sm:$0x3] %vm3343_vm7, %v3404_v38  ;;  %4246 = vmatpush.bf16.msra.mxu2 %v5218_v55  ;;  %4235 = vmatpush.bf16.msra.mxu1 %v5138_v22  ;;  %v5498_v38 = vor.u32 %v5892_v50, %v5497_v27  ;;  %v5418_v55 = vor.u32 %v5872_v40, %v5417_v5  ;;  %v5886_v35 = vld [vmem:[%s8685_s7 + $0x2a4] sm:$0xf0]  ;;  %v5337_v60 = vld [vmem:[%s8685_s7 + $0x190] sm:$0xf] }
 0x609   :  { %v5474_v59 = vor.u32 %v5886_v35, %v5473_v36  ;;  %v5852_v47 = vld [vmem:[%s8685_s7 + $0x194] sm:$0xf0]  ;;  %v5401_v28 = vld [vmem:[%s8685_s7 + $0x210] sm:$0xf]  ;;  %v5393_v11 = vld [vmem:[%s8685_s7 + $0x200] sm:$0xf] }
 0x60a   :  { %v5868_v37 = vld [vmem:[%s8685_s7 + $0x214] sm:$0xf0]  ;;  %v5338_v17 = vor.u32 %v5852_v47, %v5337_v60  ;;  %v5465_v42 = vld [vmem:[%s8685_s7 + $0x290] sm:$0xf]  ;;  %v5457_v4 = vld [vmem:[%s8685_s7 + $0x280] sm:$0xf] }
 0x60b   :  { %4293 = vmatpush.bf16.msra.mxu3 %v5514_v51  ;;  %v5884_v22 = vld [vmem:[%s8685_s7 + $0x294] sm:$0xf0]  ;;  %v5402_v49 = vor.u32 %v5868_v37, %v5401_v28  ;;  %v5882_v33 = vld [vmem:[%s8685_s7 + $0x284] sm:$0xf0]  ;;  %v5577_v61 = vld [vmem:[%s8685_s7 + $0x370] sm:$0xf] }
 0x60c   :  { %4247 = vmatpush.bf16.msra.mxu2 %v5210_v52  ;;  %4267 = vmatpush.bf16.msrb.mxu1 %v5386_v6  ;;  %v5410_v52 = vor.u32 %v5870_v56, %v5409_v53  ;;  %v5329_v6 = vld [vmem:[%s8685_s7 + $0x180] sm:$0xf]  ;;  %v5466_v29 = vor.u32 %v5884_v22, %v5465_v42  ;;  %v5458_v51 = vor.u32 %v5882_v33, %v5457_v4  ;;  %v5912_v26 = vld [vmem:[%s8685_s7 + $0x374] sm:$0xf0]  ;;  %v5641_v58 = vld [vmem:[%s8685_s7 + $0x3f0] sm:$0xf] }
 0x60d   :  { %v5569_v48 = vld [vmem:[%s8685_s7 + $0x360] sm:$0xf]  ;;  %v5910_v45 = vld [vmem:[%s8685_s7 + $0x364] sm:$0xf0]  ;;  %v5578_v50 = vor.u32 %v5912_v26, %v5577_v61  ;;  %v5187_v23 = vld [vmem:[%s8685_s7 + $0x68] sm:$0xf0] }
 0x60e   :  { %v3417_v21 = vld [vmem:[#allocation2 + $0x3c] ss:$104 sm:$0x3]  ;;  %v3407_v25 = vld [vmem:[#allocation2 + $0x38] ss:$104 sm:$0x3]  ;;  %v5570_v18 = vor.u32 %v5910_v45, %v5569_v48 }
 0x60f   :  { %3419 = vrot.lane.b32.xlu1 %v3417_v21, %s5988_s12  ;;  %3409 = vrot.lane.b32.xlu0 %v3407_v25, %s5988_s12  ;;  %v3414_v57 = vld [vmem:[#allocation2 + $0x3a] ss:$104 sm:$0x3]  ;;  %v5362_v21 = vor.u32 %v5858_v46, %v5361_v7  ;;  %v5625_v5 = vld [vmem:[%s8685_s7 + $0x3d0] sm:$0xf] }
 0x610   :  { %3415 = vst.msk [vmem:[#allocation3 + $0xe] sm:$0x3] %vm3343_vm7, %v3414_v57  ;;  %4248 = vmatpush.bf16.msra.mxu2 %v5202_v34  ;;  %4268 = vmatpush.bf16.msrb.mxu1 %v5378_v0  ;;  %v5425_v25 = vld [vmem:[%s8685_s7 + $0x240] sm:$0xf]  ;;  %v5874_v57 = vld [vmem:[%s8685_s7 + $0x244] sm:$0xf0] }
 0x611   :  { %4294 = vmatpush.bf16.msra.mxu3 %v5506_v44  ;;  %v5426_v12 = vor.u32 %v5874_v57, %v5425_v25  ;;  %v5850_v34 = vld [vmem:[%s8685_s7 + $0x184] sm:$0xf0]  ;;  %v5928_v44 = vld [vmem:[%s8685_s7 + $0x3f4] sm:$0xf0]  ;;  %v5633_v57 = vld [vmem:[%s8685_s7 + $0x3e0] sm:$0xf] }
 0x612   :  { %v5330_v19 = vor.u32 %v5850_v34, %v5329_v6  ;;  %v5924_v40 = vld [vmem:[%s8685_s7 + $0x3d4] sm:$0xf0]  ;;  %v5179_v15 = vld [vmem:[%s8685_s7 + $0x58] sm:$0xf0]  ;;  %v5553_v31 = vld [vmem:[%s8685_s7 + $0x340] sm:$0xf] }
 0x613   :  { %v5626_v24 = vor.u32 %v5924_v40, %v5625_v5  ;;  %v5906_v53 = vld [vmem:[%s8685_s7 + $0x344] sm:$0xf0]  ;;  %v5617_v56 = vld [vmem:[%s8685_s7 + $0x3c0] sm:$0xf]  ;;  %v5171_v36 = vld [vmem:[%s8685_s7 + $0x48] sm:$0xf0] }
 0x614   :  { %4280 = vmatpush.bf16.msrb.mxu2 %v5450_v62  ;;  %4269 = vmatpush.bf16.msrb.mxu1 %v5370_v14  ;;  %v5866_v62 = vld [vmem:[%s8685_s7 + $0x204] sm:$0xf0]  ;;  %v5815_v14 = vld [vmem:[%s8685_s7 + $0x74] sm:$0xf]  ;;  %v5554_v35 = vor.u32 %v5906_v53, %v5553_v31  ;;  %v5545_v60 = vld [vmem:[%s8685_s7 + $0x330] sm:$0xf] }
 0x615   :  { %4295 = vmatpush.bf16.msra.mxu3 %v5498_v38  ;;  %v5394_v43 = vor.u32 %v5866_v62, %v5393_v11  ;;  %v5609_v37 = vld [vmem:[%s8685_s7 + $0x3b0] sm:$0xf]  ;;  %v5807_v42 = vld [vmem:[%s8685_s7 + $0x34] sm:$0xf]  ;;  %v5163_v6 = vld [vmem:[%s8685_s7 + $0x38] sm:$0xf0] }
 0x616   :  { %v5902_v11 = vld [vmem:[%s8685_s7 + $0x324] sm:$0xf0]  ;;  %v5166_v33 = vor.u32 %v5807_v42, %v5163_v6  ;;  %v5529_v61 = vld [vmem:[%s8685_s7 + $0x310] sm:$0xf]  ;;  %v5900_v26 = vld [vmem:[%s8685_s7 + $0x314] sm:$0xf0] }
 0x617   :  { %3010 = vperm.xlu0 %5954, %v2936_v39   ;;  %v5489_v39 = vld [vmem:[%s8685_s7 + $0x2c0] sm:$0xf]  ;;  %v5530_v45 = vor.u32 %v5900_v26, %v5529_v61  ;;  %v5323_v5 = vld [vmem:[%s8685_s7 + $0x178] sm:$0xf0]  ;;  %v5863_v40 = vld [vmem:[%s8685_s7 + $0x1f4] sm:$0xf] }
 0x618   :  { %4281 = vmatpush.bf16.msrb.mxu2 %v5442_v32  ;;  %4270 = vmatpush.bf16.msrb.mxu1 %v5362_v21  ;;  %v5490_v13 = vor.u32 %v5890_v10, %v5489_v39  ;;  %v5642_v21 = vor.u32 %v5928_v44, %v5641_v58  ;;  %v5813_v10 = vld [vmem:[%s8685_s7 + $0x64] sm:$0xf]  ;;  %v5593_v58 = vld [vmem:[%s8685_s7 + $0x390] sm:$0xf]  ;;  %v5916_v44 = vld [vmem:[%s8685_s7 + $0x394] sm:$0xf0] }
 0x619   :  { %v5379_v42 = vld [vmem:[%s8685_s7 + $0x1e8] sm:$0xf0]  ;;  %v5825_v6 = vld [vmem:[%s8685_s7 + $0xc4] sm:$0xf] }
 0x61a   :  { %4296 = vmatpush.bf16.msra.mxu3 %v5490_v13  ;;  %v5561_v13 = vld [vmem:[%s8685_s7 + $0x350] sm:$0xf]  ;;  %v5857_v61 = vld [vmem:[%s8685_s7 + $0x1c4] sm:$0xf]  ;;  %v5363_v26 = vld [vmem:[%s8685_s7 + $0x1c8] sm:$0xf0] }
 0x61c   :  { %4282 = vmatpush.bf16.msrb.mxu2 %v5434_v9  ;;  %4271 = vmatpush.bf16.msrb.mxu1 %v5354_v54  ;;  %v5908_v54 = vld [vmem:[%s8685_s7 + $0x354] sm:$0xf0] }
 0x61d   :  { %v5562_v16 = vor.u32 %v5908_v54, %v5561_v13  ;;  %v5847_v54 = vld [vmem:[%s8685_s7 + $0x174] sm:$0xf] }
 0x61e   :  { %4297 = vmatpush.bf16.msra.mxu3 %v5482_v20 }
 0x620   :  { %4283 = vmatpush.bf16.msrb.mxu2 %v5426_v12  ;;  %4272 = vmatpush.bf16.msrb.mxu1 %v5346_v8  ;;  %v5926_v12 = vld [vmem:[%s8685_s7 + $0x3e4] sm:$0xf0] }
 0x621   :  { %v5922_v8 = vld [vmem:[%s8685_s7 + $0x3c4] sm:$0xf0] }
 0x622   :  { %4298 = vmatpush.bf16.msra.mxu3 %v5474_v59  ;;  %v5904_v59 = vld [vmem:[%s8685_s7 + $0x334] sm:$0xf0]  ;;  %v5618_v47 = vor.u32 %v5922_v8, %v5617_v56  ;;  %v5326_v56 = vor.u32 %v5847_v54, %v5323_v5  ;;  %v5817_v5 = vld [vmem:[%s8685_s7 + $0x84] sm:$0xf] }
 0x624   :  { %4284 = vmatpush.bf16.msrb.mxu2 %v5418_v55  ;;  %4273 = vmatpush.bf16.msrb.mxu1 %v5338_v17  ;;  %v5811_v55 = vld [vmem:[%s8685_s7 + $0x54] sm:$0xf]  ;;  %v5920_v17 = vld [vmem:[%s8685_s7 + $0x3b4] sm:$0xf0] }
 0x625   :  { %v5182_v20 = vor.u32 %v5811_v55, %v5179_v15  ;;  %v5610_v4 = vor.u32 %v5920_v17, %v5609_v37  ;;  %v5387_v15 = vld [vmem:[%s8685_s7 + $0x1f8] sm:$0xf0]  ;;  %v5315_v37 = vld [vmem:[%s8685_s7 + $0x168] sm:$0xf0]  ;;  %v5861_v17 = vld [vmem:[%s8685_s7 + $0x1e4] sm:$0xf] }
 0x626   :  { %4299 = vmatpush.bf16.msra.mxu3 %v5466_v29  ;;  %v5546_v29 = vor.u32 %v5904_v59, %v5545_v60  ;;  %v5390_v8 = vor.u32 %v5863_v40, %v5387_v15  ;;  %v5845_v59 = vld [vmem:[%s8685_s7 + $0x164] sm:$0xf]  ;;  %v5203_v40 = vld [vmem:[%s8685_s7 + $0x88] sm:$0xf0] }
 0x628   :  { %4285 = vmatpush.bf16.msrb.mxu2 %v5410_v52  ;;  %4274 = vmatpush.bf16.msrb.mxu1 %v5330_v19  ;;  %v5809_v52 = vld [vmem:[%s8685_s7 + $0x44] sm:$0xf]  ;;  %v5537_v19 = vld [vmem:[%s8685_s7 + $0x320] sm:$0xf] }
 0x629   :  { %v5174_v28 = vor.u32 %v5809_v52, %v5171_v36 }
 0x62a   :  { %4300 = vmatpush.bf16.msra.mxu3 %v5458_v51  ;;  %v5918_v51 = vld [vmem:[%s8685_s7 + $0x3a4] sm:$0xf0] }
 0x62c   :  { %4286 = vmatpush.bf16.msrb.mxu2 %v5402_v49 }
 0x630   :  { %4287 = vmatpush.bf16.msrb.mxu2 %v5394_v43  ;;  %v5601_v43 = vld [vmem:[%s8685_s7 + $0x3a0] sm:$0xf] }
 0x641   :  { %v3370_v30 = vpop.permute.xlu2 %3369 }
 0x642   :  { %3372 = vst.msk [vmem:[#allocation3 + $0x4] sm:$0x3] %vm3351_vm8, %v3370_v30  ;;  %v5195_v30 = vld [vmem:[%s8685_s7 + $0x78] sm:$0xf0] }
 0x643   :  { %v5198_v25 = vor.u32 %v5815_v14, %v5195_v30  ;;  %v5803_v14 = vld [vmem:[%s8685_s7 + $0x14] sm:$0xf]  ;;  %v5147_v30 = vld [vmem:[%s8685_s7 + $0x18] sm:$0xf0] }
 0x649   :  { %v3360_v41 = vpop.permute.xlu1 %3359  ;;  %v3349_v63 = vpop.permute.xlu0 %3348 }
 0x64a   :  { %3362 = vst.msk [vmem:[#allocation3 + $0x2] sm:$0x3] %vm3351_vm8, %v3360_v41  ;;  %v5634_v41 = vor.u32 %v5926_v12, %v5633_v57  ;;  %v5259_v57 = vld [vmem:[%s8685_s7 + $0xf8] sm:$0xf0]  ;;  %v5585_v12 = vld [vmem:[%s8685_s7 + $0x380] sm:$0xf] }
 0x64b   :  { %3352 = vst.msk [vmem:[#allocation3] sm:$0x3] %vm3351_vm8, %v3349_v63  ;;  %v5190_v63 = vor.u32 %v5813_v10, %v5187_v23  ;;  %v5914_v10 = vld [vmem:[%s8685_s7 + $0x384] sm:$0xf0]  ;;  %v5801_v23 = vld [vmem:[%s8685_s7 + $0x4] sm:$0xf] }
 0x64c   :  { %v5586_v13 = vor.u32 %v5914_v10, %v5585_v12 }
 0x659   :  { %v3400_v0 = vpop.permute.xlu2 %3399 }
 0x65a   :  { %3402 = vst.msk [vmem:[#allocation3 + $0xa] sm:$0x3] %vm3351_vm8, %v3400_v0  ;;  %v5805_v0 = vld [vmem:[%s8685_s7 + $0x24] sm:$0xf] }
 0x661   :  { %v3006_v3 = vpop.permute.xlu2 %3005  ;;  %v3380_v1 = vpop.permute.xlu0 %3379 }
 0x662   :  { %3382 = vst.msk [vmem:[#allocation3 + $0x6] sm:$0x3] %vm3351_vm8, %v3380_v1  ;;  %v5155_v3 = vld [vmem:[%s8685_s7 + $0x28] sm:$0xf0]  ;;  %v5538_v1 = vor.u32 %v5902_v11, %v5537_v19  ;;  %v5843_v19 = vld [vmem:[%s8685_s7 + $0x154] sm:$0xf] }
 0x663   :  { %v5307_v11 = vld [vmem:[%s8685_s7 + $0x158] sm:$0xf0] }
 0x669   :  { %v3423_v2 = vld [vmem:[#allocation3] sm:$0xff]  ;;  %v3390_v32 = vpop.permute.xlu1 %3389 }
 0x66a   :  { %3427 = vst [vmem:[#allocation1] ss:$4 sm:$0xff] %v3423_v2  ;;  %v5602_v2 = vor.u32 %v5918_v51, %v5601_v43  ;;  %v5823_v51 = vld [vmem:[%s8685_s7 + $0xb4] sm:$0xf] }
 0x66b   :  { %3392 = vst.msk [vmem:[#allocation3 + $0x8] sm:$0x3] %vm3351_vm8, %v3390_v32  ;;  %v5158_v32 = vor.u32 %v5805_v0, %v5155_v3  ;;  %v5227_v0 = vld [vmem:[%s8685_s7 + $0xb8] sm:$0xf0]  ;;  %v5310_v3 = vor.u32 %v5843_v19, %v5307_v11 }
 0x671   :  { %v3430_v27 = vld.sshfl [vmem:[#allocation1] sm:$0xff pattern:$0x73625140]  ;;  %v3431_v9 = vld.sshfl [vmem:[#allocation1 + $0x8] sm:$0xff pattern:$0x73625140] }
 0x672   :  { %v8131_v7 = vpack.c.bf16 %v3430_v27, %v3430_v27  ;;  %v8133_v46 = vpack.c.bf16 %v3431_v9, %v3431_v9  ;;  %v3432_v38 = vld.sshfl [vmem:[#allocation1 + $0x10] sm:$0xff pattern:$0x73625140]  ;;  %v3433_v22 = vld.sshfl [vmem:[#allocation1 + $0x18] sm:$0xff pattern:$0x73625140] }
 0x673   :  { %v8138_v39 = vpack.c.bf16 %v3432_v38, %v3432_v38  ;;  %v8213_v62 = vpack.c.bf16 %v3433_v22, %v3433_v22  ;;  %v5521_v27 = vld [vmem:[%s8685_s7 + $0x300] sm:$0xf]  ;;  %v5898_v9 = vld [vmem:[%s8685_s7 + $0x304] sm:$0xf0]  ;;  %v5594_v38 = vor.u32 %v5916_v44, %v5593_v58  ;;  %v5230_v58 = vor.u32 %v5823_v51, %v5227_v0  ;;  %v5821_v44 = vld [vmem:[%s8685_s7 + $0xa4] sm:$0xf] }
 0x674   :  { %4236 = vmatmul.bf16.vlgmr.msra.gmra.mxu1 %v8131_v7  ;;  %4249 = vmatmul.bf16.vlgmr.msra.gmra.mxu2 %v8133_v46  ;;  %v5893_v51 = vld [vmem:[%s8685_s7 + $0x2e4] sm:$0xf]  ;;  %v5875_v0 = vld [vmem:[%s8685_s7 + $0x254] sm:$0xf] }
 0x675   :  { %4262 = vmatmul.bf16.vlgmr.msrb.gmra.mxu3 %v8138_v39  ;;  %4306 = vmatpush.bf16.msra.mxu1 %v5578_v50 }
 0x676   :  { %4319 = vmatpush.bf16.msra.mxu2 %v5642_v21  ;;  %4332 = vmatpush.bf16.msrb.mxu3 %v5198_v25  ;;  %v5150_v21 = vor.u32 %v5803_v14, %v5147_v30  ;;  %v5831_v25 = vld [vmem:[%s8685_s7 + $0xf4] sm:$0xf]  ;;  %v5219_v14 = vld [vmem:[%s8685_s7 + $0xa8] sm:$0xf0] }
 0x679   :  { %4307 = vmatpush.bf16.msra.mxu1 %v5570_v18  ;;  %v5139_v18 = vld [vmem:[%s8685_s7 + $0x8] sm:$0xf0] }
 0x67a   :  { %4320 = vmatpush.bf16.msra.mxu2 %v5634_v41  ;;  %4333 = vmatpush.bf16.msrb.mxu3 %v5190_v63  ;;  %v5522_v41 = vor.u32 %v5898_v9, %v5521_v27  ;;  %v5262_v63 = vor.u32 %v5831_v25, %v5259_v57  ;;  %v5142_v55 = vor.u32 %v5801_v23, %v5139_v18  ;;  %v5291_v27 = vld [vmem:[%s8685_s7 + $0x138] sm:$0xf0]  ;;  %v5855_v9 = vld [vmem:[%s8685_s7 + $0x1b4] sm:$0xf]  ;;  %v5837_v18 = vld [vmem:[%s8685_s7 + $0x124] sm:$0xf] }
 0x67b   :  { %v5819_v25 = vld [vmem:[%s8685_s7 + $0x94] sm:$0xf]  ;;  %v5211_v57 = vld [vmem:[%s8685_s7 + $0x98] sm:$0xf0] }
 0x67c   :  { %v5214_v54 = vor.u32 %v5819_v25, %v5211_v57  ;;  %v5905_v25 = vld [vmem:[%s8685_s7 + $0x344] sm:$0xf]  ;;  %v5555_v57 = vld [vmem:[%s8685_s7 + $0x348] sm:$0xf0] }
 0x67d   :  { %4308 = vmatpush.bf16.msra.mxu1 %v5562_v16  ;;  %v5829_v16 = vld [vmem:[%s8685_s7 + $0xe4] sm:$0xf] }
 0x67e   :  { %4321 = vmatpush.bf16.msra.mxu2 %v5626_v24  ;;  %4334 = vmatpush.bf16.msrb.mxu3 %v5182_v20  ;;  %v5251_v24 = vld [vmem:[%s8685_s7 + $0xe8] sm:$0xf0]  ;;  %v5827_v20 = vld [vmem:[%s8685_s7 + $0xd4] sm:$0xf] }
 0x67f   :  { %v5254_v52 = vor.u32 %v5829_v16, %v5251_v24  ;;  %v5835_v16 = vld [vmem:[%s8685_s7 + $0x114] sm:$0xf]  ;;  %v5451_v24 = vld [vmem:[%s8685_s7 + $0x278] sm:$0xf0] }
 0x681   :  { %4309 = vmatpush.bf16.msra.mxu1 %v5554_v35  ;;  %v3420_v34 = vpop.permute.xlu1 %3419  ;;  %v3410_v49 = vpop.permute.xlu0 %3409  ;;  %v5243_v35 = vld [vmem:[%s8685_s7 + $0xd8] sm:$0xf0] }
 0x682   :  { %3422 = vst.msk [vmem:[#allocation3 + $0xe] sm:$0x3] %vm3351_vm8, %v3420_v34  ;;  %4322 = vmatpush.bf16.msra.mxu2 %v5618_v47  ;;  %4335 = vmatpush.bf16.msrb.mxu3 %v5174_v28  ;;  %v5246_v22 = vor.u32 %v5827_v20, %v5243_v35  ;;  %v5235_v34 = vld [vmem:[%s8685_s7 + $0xc8] sm:$0xf0]  ;;  %v5275_v20 = vld [vmem:[%s8685_s7 + $0x118] sm:$0xf0] }
 0x683   :  { %3412 = vst.msk [vmem:[#allocation3 + $0xc] sm:$0x3] %vm3351_vm8, %v3410_v49  ;;  %v5318_v49 = vor.u32 %v5845_v59, %v5315_v37  ;;  %v5238_v43 = vor.u32 %v5825_v6, %v5235_v34  ;;  %v5267_v59 = vld [vmem:[%s8685_s7 + $0x108] sm:$0xf0]  ;;  %v5877_v37 = vld [vmem:[%s8685_s7 + $0x264] sm:$0xf] }
 0x684   :  { %4275 = vmatmul.bf16.vlgmr.msrb.gmra.mxu1 %v8213_v62  ;;  %v5895_v6 = vld [vmem:[%s8685_s7 + $0x2f4] sm:$0xf]  ;;  %v5515_v34 = vld [vmem:[%s8685_s7 + $0x2f8] sm:$0xf0] }
 0x685   :  { %4310 = vmatpush.bf16.msra.mxu1 %v5546_v29  ;;  %v5382_v29 = vor.u32 %v5861_v17, %v5379_v42  ;;  %v5443_v17 = vld [vmem:[%s8685_s7 + $0x268] sm:$0xf0]  ;;  %v5849_v42 = vld [vmem:[%s8685_s7 + $0x184] sm:$0xf] }
 0x686   :  { %4323 = vmatpush.bf16.msra.mxu2 %v5610_v4  ;;  %4336 = vmatpush.bf16.msrb.mxu3 %v5166_v33  ;;  %v5859_v4 = vld [vmem:[%s8685_s7 + $0x1d4] sm:$0xf]  ;;  %v5371_v33 = vld [vmem:[%s8685_s7 + $0x1d8] sm:$0xf0]  ;;  %v5446_v19 = vor.u32 %v5877_v37, %v5443_v17  ;;  %v5395_v37 = vld [vmem:[%s8685_s7 + $0x208] sm:$0xf0] }
 0x687   :  { %v5467_v17 = vld [vmem:[%s8685_s7 + $0x298] sm:$0xf0] }
 0x689   :  { %4311 = vmatpush.bf16.msra.mxu1 %v5538_v1  ;;  %v3011_v48 = vpop.permute.xlu0 %3010  ;;  %v5374_v1 = vor.u32 %v5859_v4, %v5371_v33  ;;  %v5518_v33 = vor.u32 %v5895_v6, %v5515_v34  ;;  %v5927_v6 = vld [vmem:[%s8685_s7 + $0x3f4] sm:$0xf]  ;;  %v5643_v34 = vld [vmem:[%s8685_s7 + $0x3f8] sm:$0xf0] }
 0x68a   :  { %v3424_v50 = vld [vmem:[#allocation3 + $0x8] sm:$0xff]  ;;  %4324 = vmatpush.bf16.msra.mxu2 %v5602_v2  ;;  %4337 = vmatpush.bf16.msrb.mxu3 %v5158_v32  ;;  %v5299_v32 = vld [vmem:[%s8685_s7 + $0x148] sm:$0xf0]  ;;  %v5366_v48 = vor.u32 %v5857_v61, %v5363_v26 }
 0x68b   :  { %3429 = vst [vmem:[#allocation1 + $0x20] ss:$4 sm:$0xff] %v3424_v50  ;;  %v5841_v2 = vld [vmem:[%s8685_s7 + $0x144] sm:$0xf] }
 0x68c   :  { %v5302_v30 = vor.u32 %v5841_v2, %v5299_v32  ;;  %v5571_v2 = vld [vmem:[%s8685_s7 + $0x368] sm:$0xf0] }
 0x68d   :  { %4312 = vmatpush.bf16.msra.mxu1 %v5530_v45  ;;  %v5839_v45 = vld [vmem:[%s8685_s7 + $0x134] sm:$0xf] }
 0x68e   :  { %4325 = vmatpush.bf16.msra.mxu2 %v5594_v38  ;;  %4338 = vmatpush.bf16.msrb.mxu3 %v5150_v21  ;;  %v5355_v38 = vld [vmem:[%s8685_s7 + $0x1b8] sm:$0xf0]  ;;  %v5222_v21 = vor.u32 %v5821_v44, %v5219_v14  ;;  %v5294_v10 = vor.u32 %v5839_v45, %v5291_v27  ;;  %v5873_v44 = vld [vmem:[%s8685_s7 + $0x244] sm:$0xf]  ;;  %v5427_v14 = vld [vmem:[%s8685_s7 + $0x248] sm:$0xf0] }
 0x68f   :  { %v5358_v23 = vor.u32 %v5855_v9, %v5355_v38  ;;  %v5563_v45 = vld [vmem:[%s8685_s7 + $0x358] sm:$0xf0]  ;;  %v5430_v27 = vor.u32 %v5873_v44, %v5427_v14  ;;  %v5889_v38 = vld [vmem:[%s8685_s7 + $0x2c4] sm:$0xf]  ;;  %v5919_v14 = vld [vmem:[%s8685_s7 + $0x3b4] sm:$0xf] }
 0x691   :  { %4313 = vmatpush.bf16.msra.mxu1 %v5522_v41  ;;  %v5283_v41 = vld [vmem:[%s8685_s7 + $0x128] sm:$0xf0] }
 0x692   :  { %4326 = vmatpush.bf16.msra.mxu2 %v5586_v13  ;;  %v3434_v31 = vld.sshfl [vmem:[#allocation1 + $0x20] sm:$0xff pattern:$0x73625140]  ;;  %v3435_v53 = vld.sshfl [vmem:[#allocation1 + $0x28] sm:$0xff pattern:$0x73625140]  ;;  %4339 = vmatpush.bf16.msrb.mxu3 %v5142_v55  ;;  %v5286_v55 = vor.u32 %v5837_v18, %v5283_v41  ;;  %v5558_v18 = vor.u32 %v5905_v25, %v5555_v57 }
 0x693   :  { %v3436_v36 = vld.sshfl [vmem:[#allocation1 + $0x30] sm:$0xff pattern:$0x73625140]  ;;  %v8295_v60 = vpack.c.bf16 %v3434_v31, %v3434_v31  ;;  %v8300_v47 = vpack.c.bf16 %v3435_v53, %v3435_v53  ;;  %v3437_v50 = vld.sshfl [vmem:[#allocation1 + $0x38] sm:$0xff pattern:$0x73625140] }
 0x694   :  { %v8302_v28 = vpack.c.bf16 %v3436_v36, %v3436_v36  ;;  %v8376_v12 = vpack.c.bf16 %v3437_v50, %v3437_v50  ;;  %v5347_v13 = vld [vmem:[%s8685_s7 + $0x1a8] sm:$0xf0]  ;;  %v5851_v31 = vld [vmem:[%s8685_s7 + $0x194] sm:$0xf]  ;;  %v5339_v53 = vld [vmem:[%s8685_s7 + $0x198] sm:$0xf0]  ;;  %v5278_v36 = vor.u32 %v5835_v16, %v5275_v20 }
 0x695   :  { %4345 = vmatpush.bf16.msrb.mxu1 %v5262_v63  ;;  %4288 = vmatmul.bf16.vlgmr.msrb.gmra.mxu2 %v8295_v60  ;;  %v5853_v63 = vld [vmem:[%s8685_s7 + $0x1a4] sm:$0xf]  ;;  %v5342_v35 = vor.u32 %v5851_v31, %v5339_v53  ;;  %v5887_v41 = vld [vmem:[%s8685_s7 + $0x2b4] sm:$0xf]  ;;  %v5403_v20 = vld [vmem:[%s8685_s7 + $0x218] sm:$0xf0] }
 0x696   :  { %4301 = vmatmul.bf16.vlgmr.msra.gmra.mxu3 %v8300_v47  ;;  %4314 = vmatmul.bf16.vlgmr.msra.gmra.mxu1 %v8302_v28  ;;  %v5350_v15 = vor.u32 %v5853_v63, %v5347_v13  ;;  %v5869_v63 = vld [vmem:[%s8685_s7 + $0x224] sm:$0xf]  ;;  %v5411_v13 = vld [vmem:[%s8685_s7 + $0x228] sm:$0xf0]  ;;  %v5935_v57 = vld [vmem:[%s8687_s9 + $0x30] sm:$0xff] }
 0x697   :  { %4358 = vmatpush.bf16.msrb.mxu2 %v5326_v56  ;;  %4371 = vmatpush.bf16.msra.mxu3 %v5390_v8  ;;  %v5206_v56 = vor.u32 %v5817_v5, %v5203_v40  ;;  %v5903_v5 = vld [vmem:[%s8685_s7 + $0x334] sm:$0xf]  ;;  %v5547_v40 = vld [vmem:[%s8685_s7 + $0x338] sm:$0xf0]  ;;  %v5475_v31 = vld [vmem:[%s8685_s7 + $0x2a8] sm:$0xf0] }
 0x698   :  { %v5550_v16 = vor.u32 %v5903_v5, %v5547_v40  ;;  %v5901_v53 = vld [vmem:[%s8685_s7 + $0x324] sm:$0xf]  ;;  %v5932_v5 = vld [vmem:[%s8687_s9 + $0x18] sm:$0xff]  ;;  %v5931_v40 = vld [vmem:[%s8687_s9 + $0x10] sm:$0xff] }
 0x699   :  { %4346 = vmatpush.bf16.msrb.mxu1 %v5254_v52  ;;  %v5833_v52 = vld [vmem:[%s8685_s7 + $0x104] sm:$0xf] }
 0x69a   :  { %v5270_v11 = vor.u32 %v5833_v52, %v5267_v59  ;;  %v5865_v59 = vld [vmem:[%s8685_s7 + $0x204] sm:$0xf] }
 0x69b   :  { %4359 = vmatpush.bf16.msrb.mxu2 %v5318_v49  ;;  %4372 = vmatpush.bf16.msra.mxu3 %v5382_v29  ;;  %v5911_v49 = vld [vmem:[%s8685_s7 + $0x374] sm:$0xf]  ;;  %v5579_v29 = vld [vmem:[%s8685_s7 + $0x378] sm:$0xf0] }
 0x69d   :  { %4347 = vmatpush.bf16.msrb.mxu1 %v5246_v22  ;;  %v5331_v22 = vld [vmem:[%s8685_s7 + $0x188] sm:$0xf0] }
 0x69e   :  { %v5334_v4 = vor.u32 %v5849_v42, %v5331_v22  ;;  %v5899_v42 = vld [vmem:[%s8685_s7 + $0x314] sm:$0xf]  ;;  %v5531_v22 = vld [vmem:[%s8685_s7 + $0x318] sm:$0xf0] }
 0x69f   :  { %4360 = vmatpush.bf16.msrb.mxu2 %v5310_v3  ;;  %4373 = vmatpush.bf16.msra.mxu3 %v5374_v1  ;;  %v5435_v3 = vld [vmem:[%s8685_s7 + $0x258] sm:$0xf0]  ;;  %v5507_v1 = vld [vmem:[%s8685_s7 + $0x2e8] sm:$0xf0] }
 0x6a0   :  { %v5438_v32 = vor.u32 %v5875_v0, %v5435_v3  ;;  %v5510_v61 = vor.u32 %v5893_v51, %v5507_v1  ;;  %v5523_v51 = vld [vmem:[%s8685_s7 + $0x308] sm:$0xf0]  ;;  %v5925_v0 = vld [vmem:[%s8685_s7 + $0x3e4] sm:$0xf] }
 0x6a1   :  { %4348 = vmatpush.bf16.msrb.mxu1 %v5238_v43  ;;  %v5582_v43 = vor.u32 %v5911_v49, %v5579_v29  ;;  %v5398_v49 = vor.u32 %v5865_v59, %v5395_v37  ;;  %v5635_v3 = vld [vmem:[%s8685_s7 + $0x3e8] sm:$0xf0] }
 0x6a3   :  { %4361 = vmatpush.bf16.msrb.mxu2 %v5302_v30  ;;  %4374 = vmatpush.bf16.msra.mxu3 %v5366_v48  ;;  %v5499_v30 = vld [vmem:[%s8685_s7 + $0x2d8] sm:$0xf0]  ;;  %v5907_v48 = vld [vmem:[%s8685_s7 + $0x354] sm:$0xf] }
 0x6a4   :  { %v5566_v50 = vor.u32 %v5907_v48, %v5563_v45  ;;  %v5917_v45 = vld [vmem:[%s8685_s7 + $0x3a4] sm:$0xf] }
 0x6a5   :  { %4349 = vmatpush.bf16.msrb.mxu1 %v5230_v58  ;;  %4327 = vmatmul.bf16.vlgmr.msra.gmra.mxu2 %v8376_v12  ;;  %v5891_v58 = vld [vmem:[%s8685_s7 + $0x2d4] sm:$0xf] }
 0x6a6   :  { %4340 = vmatmul.bf16.vlgmr.msrb.gmra.mxu3 %v8131_v7  ;;  %v5879_v7 = vld [vmem:[%s8685_s7 + $0x274] sm:$0xf]  ;;  %v5502_v9 = vor.u32 %v5891_v58, %v5499_v30  ;;  %v5921_v58 = vld [vmem:[%s8685_s7 + $0x3c4] sm:$0xf]  ;;  %v5611_v30 = vld [vmem:[%s8685_s7 + $0x3b8] sm:$0xf0] }
 0x6a7   :  { %4362 = vmatpush.bf16.msrb.mxu2 %v5294_v10  ;;  %4375 = vmatpush.bf16.msra.mxu3 %v5358_v23  ;;  %v5454_v8 = vor.u32 %v5879_v7, %v5451_v24  ;;  %v5885_v7 = vld [vmem:[%s8685_s7 + $0x2a4] sm:$0xf]  ;;  %v5867_v24 = vld [vmem:[%s8685_s7 + $0x214] sm:$0xf]  ;;  %v5614_v48 = vor.u32 %v5919_v14, %v5611_v30 }
 0x6a8   :  { %v5478_v52 = vor.u32 %v5885_v7, %v5475_v31  ;;  %v3582_v7 = vld [vmem:[%s8686_s8] sm:$0x3] }
 0x6a9   :  { %4350 = vmatpush.bf16.msrb.mxu1 %v5222_v21  ;;  %v5871_v21 = vld [vmem:[%s8685_s7 + $0x234] sm:$0xf]  ;;  %v5937_v14 = vld [vmem:[%s8687_s9 + $0x40] sm:$0xff] }
 0x6ab   :  { %4363 = vmatpush.bf16.msrb.mxu2 %v5286_v55  ;;  %4376 = vmatpush.bf16.msra.mxu3 %v5350_v15  ;;  %v5414_v55 = vor.u32 %v5869_v63, %v5411_v13  ;;  %v5933_v63 = vld [vmem:[%s8687_s9 + $0x20] sm:$0xff] }
 0x6ad   :  { %4351 = vmatpush.bf16.msrb.mxu1 %v5214_v54  ;;  %v5483_v54 = vld [vmem:[%s8685_s7 + $0x2b8] sm:$0xf0] }
 0x6ae   :  { %v5486_v15 = vor.u32 %v5887_v41, %v5483_v54  ;;  %v5934_v41 = vld [vmem:[%s8687_s9 + $0x28] sm:$0xff] }
 0x6af   :  { %4364 = vmatpush.bf16.msrb.mxu2 %v5278_v36  ;;  %4377 = vmatpush.bf16.msra.mxu3 %v5342_v35  ;;  %v5883_v35 = vld [vmem:[%s8685_s7 + $0x294] sm:$0xf] }
 0x6b0   :  { %v5470_v29 = vor.u32 %v5883_v35, %v5467_v17 }
 0x6b1   :  { %4352 = vmatpush.bf16.msrb.mxu1 %v5206_v56  ;;  %v5539_v56 = vld [vmem:[%s8685_s7 + $0x328] sm:$0xf0] }
 0x6b2   :  { %v5542_v36 = vor.u32 %v5901_v53, %v5539_v56 }
 0x6b3   :  { %4365 = vmatpush.bf16.msrb.mxu2 %v5270_v11  ;;  %4378 = vmatpush.bf16.msra.mxu3 %v5334_v4  ;;  %v5881_v11 = vld [vmem:[%s8685_s7 + $0x284] sm:$0xf]  ;;  %v5646_v4 = vor.u32 %v5927_v6, %v5643_v34 }
 0x6b4   :  { %4353 = vmatmul.bf16.vlgmr.msrb.gmra.mxu1 %v8133_v46  ;;  %v5909_v46 = vld [vmem:[%s8685_s7 + $0x364] sm:$0xf] }
 0x6b5   :  { %4384 = vmatpush.bf16.msra.mxu1 %v5454_v8  ;;  %v5574_v26 = vor.u32 %v5909_v46, %v5571_v2  ;;  %v5406_v8 = vor.u32 %v5867_v24, %v5403_v20  ;;  %v5638_v2 = vor.u32 %v5925_v0, %v5635_v3  ;;  %v3584_v24 = vperm.slane %v3582_v7, 0  ;;  %v5943_v0 = vld [vmem:[%s8687_s9 + $0x70] sm:$0xff] }
 0x6b6   :  { %4366 = vmatmul.bf16.vlgmr.msrb.gmra.mxu2 %v8138_v39  ;;  %4379 = vmatmul.bf16.vlgmr.msra.gmra.mxu3 %v8213_v62  ;;  %v5419_v39 = vld [vmem:[%s8685_s7 + $0x238] sm:$0xf0]  ;;  %v5491_v62 = vld [vmem:[%s8685_s7 + $0x2c8] sm:$0xf0] }
 0x6b7   :  { %4397 = vmatpush.bf16.msra.mxu2 %v5518_v33  ;;  %4410 = vmatpush.bf16.msrb.mxu3 %v5582_v43  ;;  %v5422_v10 = vor.u32 %v5871_v21, %v5419_v39  ;;  %v5494_v23 = vor.u32 %v5889_v38, %v5491_v62  ;;  %v5459_v33 = vld [vmem:[%s8685_s7 + $0x288] sm:$0xf0]  ;;  %v5897_v43 = vld [vmem:[%s8685_s7 + $0x304] sm:$0xf]  ;;  %v5936_v62 = vld [vmem:[%s8687_s9 + $0x38] sm:$0xff] }
 0x6b8   :  { %v5462_v1 = vor.u32 %v5881_v11, %v5459_v33  ;;  %v5526_v46 = vor.u32 %v5897_v43, %v5523_v51  ;;  %v5913_v38 = vld [vmem:[%s8685_s7 + $0x384] sm:$0xf]  ;;  %v5587_v21 = vld [vmem:[%s8685_s7 + $0x388] sm:$0xf0] }
 0x6b9   :  { %4385 = vmatpush.bf16.msra.mxu1 %v5446_v19  ;;  %v5534_v19 = vor.u32 %v5899_v42, %v5531_v22  ;;  %v5590_v39 = vor.u32 %v5913_v38, %v5587_v21 }
 0x6bb   :  { %4398 = vmatpush.bf16.msra.mxu2 %v5510_v61  ;;  %4411 = vmatpush.bf16.msrb.mxu3 %v5574_v26  ;;  %v5627_v61 = vld [vmem:[%s8685_s7 + $0x3d8] sm:$0xf0] }
 0x6bd   :  { %4386 = vmatpush.bf16.msra.mxu1 %v5438_v32  ;;  %v5923_v32 = vld [vmem:[%s8685_s7 + $0x3d4] sm:$0xf] }
 0x6be   :  { %v5630_v26 = vor.u32 %v5923_v32, %v5627_v61  ;;  %v5940_v32 = vld [vmem:[%s8687_s9 + $0x58] sm:$0xff] }
 0x6bf   :  { %4399 = vmatpush.bf16.msra.mxu2 %v5502_v9  ;;  %4412 = vmatpush.bf16.msrb.mxu3 %v5566_v50  ;;  %v5595_v9 = vld [vmem:[%s8685_s7 + $0x398] sm:$0xf0] }
 0x6c1   :  { %4387 = vmatpush.bf16.msra.mxu1 %v5430_v27  ;;  %v5915_v27 = vld [vmem:[%s8685_s7 + $0x394] sm:$0xf] }
 0x6c2   :  { %v5598_v50 = vor.u32 %v5915_v27, %v5595_v9 }
 0x6c3   :  { %4400 = vmatpush.bf16.msra.mxu2 %v5494_v23  ;;  %4413 = vmatpush.bf16.msrb.mxu3 %v5558_v18 }
 0x6c5   :  { %4388 = vmatpush.bf16.msra.mxu1 %v5422_v10 }
 0x6c7   :  { %4401 = vmatpush.bf16.msra.mxu2 %v5486_v15  ;;  %4414 = vmatpush.bf16.msrb.mxu3 %v5550_v16  ;;  %v5930_v15 = vld [vmem:[%s8687_s9 + $0x8] sm:$0xff]  ;;  %v5929_v16 = vld [vmem:[%s8687_s9] sm:$0xff] }
 0x6c9   :  { %4389 = vmatpush.bf16.msra.mxu1 %v5414_v55 }
 0x6cb   :  { %4402 = vmatpush.bf16.msra.mxu2 %v5478_v52  ;;  %4415 = vmatpush.bf16.msrb.mxu3 %v5542_v36 }
 0x6cd   :  { %4390 = vmatpush.bf16.msra.mxu1 %v5406_v8 }
 0x6cf   :  { %4403 = vmatpush.bf16.msra.mxu2 %v5470_v29  ;;  %4416 = vmatpush.bf16.msrb.mxu3 %v5534_v19  ;;  %v5944_v19 = vld [vmem:[%s8687_s9 + $0x78] sm:$0xff] }
 0x6d1   :  { %4391 = vmatpush.bf16.msra.mxu1 %v5398_v49 }
 0x6d3   :  { %4404 = vmatpush.bf16.msra.mxu2 %v5462_v1  ;;  %4417 = vmatpush.bf16.msrb.mxu3 %v5526_v46  ;;  %v5942_v46 = vld [vmem:[%s8687_s9 + $0x68] sm:$0xff] }
 0x6d4   :  { %4392 = vmatmul.bf16.vlgmr.msra.gmra.mxu1 %v8295_v60  ;;  %v5619_v60 = vld [vmem:[%s8685_s7 + $0x3c8] sm:$0xf0] }
 0x6d5   :  { %4423 = vmatpush.bf16.msrb.mxu1 %v5646_v4  ;;  %v5622_v44 = vor.u32 %v5921_v58, %v5619_v60  ;;  %v5939_v58 = vld [vmem:[%s8687_s9 + $0x50] sm:$0xff]  ;;  %v5938_v60 = vld [vmem:[%s8687_s9 + $0x48] sm:$0xff] }
 0x6d6   :  { %4405 = vmatmul.bf16.vlgmr.msra.gmra.mxu2 %v8300_v47  ;;  %4418 = vmatmul.bf16.vlgmr.msrb.gmra.mxu3 %v8302_v28  ;;  %v5603_v47 = vld [vmem:[%s8685_s7 + $0x3a8] sm:$0xf0] }
 0x6d7   :  { %v5606_v28 = vor.u32 %v5917_v45, %v5603_v47  ;;  %4572 = vmatpush.bf16.msrb.mxu2 %v5936_v62  ;;  %4585 = vmatpush.bf16.msra.mxu3 %v5944_v19 }
 0x6d9   :  { %4424 = vmatpush.bf16.msrb.mxu1 %v5638_v2  ;;  %v5941_v2 = vld [vmem:[%s8687_s9 + $0x60] sm:$0xff] }
 0x6db   :  { %4573 = vmatpush.bf16.msrb.mxu2 %v5935_v57  ;;  %4586 = vmatpush.bf16.msra.mxu3 %v5943_v0 }
 0x6dd   :  { %4425 = vmatpush.bf16.msrb.mxu1 %v5630_v26 }
 0x6df   :  { %4574 = vmatpush.bf16.msrb.mxu2 %v5934_v41  ;;  %4587 = vmatpush.bf16.msra.mxu3 %v5942_v46 }
 0x6e1   :  { %4426 = vmatpush.bf16.msrb.mxu1 %v5622_v44 }
 0x6e3   :  { %4575 = vmatpush.bf16.msrb.mxu2 %v5933_v63  ;;  %4588 = vmatpush.bf16.msra.mxu3 %v5941_v2 }
 0x6e5   :  { %4427 = vmatpush.bf16.msrb.mxu1 %v5614_v48  ;;  %v3585_v48 = vperm.slane %v3582_v7, 1 }
 0x6e7   :  { %4576 = vmatpush.bf16.msrb.mxu2 %v5932_v5  ;;  %4589 = vmatpush.bf16.msra.mxu3 %v5940_v32 }
 0x6e9   :  { %4428 = vmatpush.bf16.msrb.mxu1 %v5606_v28 }
 0x6eb   :  { %4577 = vmatpush.bf16.msrb.mxu2 %v5931_v40  ;;  %4590 = vmatpush.bf16.msra.mxu3 %v5939_v58 }
 0x6ed   :  { %4429 = vmatpush.bf16.msrb.mxu1 %v5598_v50 }
 0x6ef   :  { %4578 = vmatpush.bf16.msrb.mxu2 %v5930_v15  ;;  %4591 = vmatpush.bf16.msra.mxu3 %v5938_v60 }
 0x6f1   :  { %4430 = vmatpush.bf16.msrb.mxu1 %v5590_v39  ;;  %v4237_v25 = vpop.f32.mrf.mxu1 }
 0x6f2   :  { %v4238_v31 = vadd.f32 %v4237_v25, %v3584_v24 }
 0x6f3   :  { %4579 = vmatpush.bf16.msrb.mxu2 %v5929_v16  ;;  %4592 = vmatpush.bf16.msra.mxu3 %v5937_v14 }
 0x6f4   :  { %4431 = vmatmul.bf16.vlgmr.msrb.gmra.mxu1 %v8376_v12 }
 0x6f7   :  { %v4250_v10 = vpop.f32.mrf.mxu2 }
 0x6f8   :  { %v4263_v23 = vpop.f32.mrf.mxu3  ;;  %v4251_v53 = vadd.f32 %v4250_v10, %v4238_v31 }
 0x6f9   :  { %v4239_v18 = vpop.f32.mrf.mxu1 }
 0x6fa   :  { %v4264_v52 = vadd.f32 %v4263_v23, %v4251_v53 }
 0x6ff   :  { %v4252_v13 = vpop.f32.mrf.mxu2 }
 0x700   :  { %v4265_v12 = vpop.f32.mrf.mxu3 }
 0x701   :  { %v4276_v54 = vpop.f32.mrf.mxu1  ;;  %v5959_v12 = vld [vmem:[%s8688_s10] ss:$0 sm:$0xff] }
 0x702   :  { %v4277_v35 = vadd.f32 %v4276_v54, %v4264_v52 }
 0x709   :  { %v4278_v55 = vpop.f32.mrf.mxu1 }
 0x713   :  { %v4315_v20 = vpop.f32.mrf.mxu1 }
 0x718   :  { %v4289_v56 = vpop.f32.mrf.mxu2 }
 0x719   :  { %v4302_v8 = vpop.f32.mrf.mxu3  ;;  %v4290_v59 = vadd.f32 %v4289_v56, %v4277_v35 }
 0x71b   :  { %v4317_v36 = vpop.f32.mrf.mxu1  ;;  %v4303_v42 = vadd.f32 %v4302_v8, %v4290_v59 }
 0x71d   :  { %v4316_v22 = vadd.f32 %v4315_v20, %v4303_v42 }
 0x720   :  { %v4291_v37 = vpop.f32.mrf.mxu2 }
 0x721   :  { %v4304_v17 = vpop.f32.mrf.mxu3 }
 0x728   :  { %v4328_v6 = vpop.f32.mrf.mxu2 }
 0x729   :  { %v4329_v34 = vadd.f32 %v4328_v6, %v4316_v22  ;;  %v4341_v49 = vpop.f32.mrf.mxu3 }
 0x72a   :  { %v4342_v28 = vadd.f32 %v4341_v49, %v3585_v48 }
 0x72b   :  { %v4436_v29 = vmax.f32 %v4329_v34, 0.0 }
 0x72d   :  { %v4438_v11 = vpack.c.bf16 %v4436_v29, %v4436_v29 }
 0x72f   :  { %4580 = vmatmul.bf16.vlgmr.msrb.gmra.mxu2 %v4438_v11 }
 0x730   :  { %v4330_v33 = vpop.f32.mrf.mxu2 }
 0x731   :  { %v4354_v4 = vpop.f32.mrf.mxu1  ;;  %v4343_v43 = vpop.f32.mrf.mxu3 }
 0x732   :  { %v4355_v27 = vadd.f32 %v4354_v4, %v4342_v28 }
 0x739   :  { %v4356_v51 = vpop.f32.mrf.mxu1  ;;  %v4367_v3 = vpop.f32.mrf.mxu2 }
 0x73a   :  { %v4380_v1 = vpop.f32.mrf.mxu3  ;;  %v4368_v9 = vadd.f32 %v4367_v3, %v4355_v27 }
 0x73c   :  { %v4381_v21 = vadd.f32 %v4380_v1, %v4368_v9 }
 0x741   :  { %v4369_v61 = vpop.f32.mrf.mxu2 }
 0x742   :  { %v4382_v26 = vpop.f32.mrf.mxu3 }
 0x751   :  { %v4393_v44 = vpop.f32.mrf.mxu1 }
 0x752   :  { %v4394_v39 = vadd.f32 %v4393_v44, %v4381_v21 }
 0x759   :  { %v4395_v30 = vpop.f32.mrf.mxu1  ;;  %v4406_v45 = vpop.f32.mrf.mxu2 }
 0x75a   :  { %v4419_v47 = vpop.f32.mrf.mxu3  ;;  %v4407_v62 = vadd.f32 %v4406_v45, %v4394_v39 }
 0x75c   :  { %v4420_v25 = vadd.f32 %v4419_v47, %v4407_v62 }
 0x761   :  { %v4408_v50 = vpop.f32.mrf.mxu2 }
 0x762   :  { %v4421_v38 = vpop.f32.mrf.mxu3 }
 0x771   :  { %v4432_v57 = vpop.f32.mrf.mxu1 }
 0x772   :  { %v4433_v10 = vadd.f32 %v4432_v57, %v4420_v25 }
 0x774   :  { %v4437_v23 = vmax.f32 %v4433_v10, 0.0 }
 0x776   :  { %v4439_v18 = vpack.c.bf16 %v4437_v23, %v4437_v23 }
 0x778   :  { %4593 = vmatmul.bf16.vlgmr.msra.gmra.mxu3 %v4439_v18 }
 0x779   :  { %v4434_v41 = vpop.f32.mrf.mxu1 }
 0x7b2   :  { %v4581_v63 = vpop.f32.mrf.mxu2 }
 0x7b3   :  { %v4582_v54 = vadd.f32 %v5959_v12, %v4581_v63 }
 0x7ba   :  { %v4583_v13 = vpop.f32.mrf.mxu2 }
 0x7fb   :  { %v4594_v5 = vpop.f32.mrf.mxu3 }
 0x7fc   :  { %v4595_v40 = vadd.f32 %v4594_v5, %v4582_v54 }
 0x7fe   :  { %4598 = vst [vmem:[#allocation4] sm:$0x3] %v4595_v40 }
 0x7ff   :  { %4609 = dma.vmem_to_hbm [thread:$0]  %s4605_s30, 32, %s4607_s2, [#allocation5]  }
 0x803   :  { %v4596_v55 = vpop.f32.mrf.mxu3 }
 0x804   :  { %5985 = dma.done.wait [#allocation5], 32  }
 0x805   :  { %5986 = vsyncadd [#allocation5], 4294967264 }
 0x806   :  { %4614 = vsyncpa [#allocation5], 1 }

</bundles_post_ra>
